<compile_context>
chip_gen: v7x
topology: tpu7x:2x2x1
jax: 0.10.0
libtpu: 0.0.40
codegen_flags: <defaults>
</compile_context>

<pallas_src>
import functools

import jax
import jax.numpy as jnp
from jax.experimental import pallas as pl
from jax.experimental.pallas import tpu as pltpu

EPS = 1e-5


# ---------------------------------------------------------------------------
# In-kernel helpers
# ---------------------------------------------------------------------------
def _zero_pad_hw(x):
    """(H, W, C) -> (H+2, W+2, C) with a zero border (conv3x3 padding=1)."""
    H, W, C = x.shape
    zrow = jnp.zeros((1, W, C), x.dtype)
    x = jnp.concatenate([zrow, x, zrow], axis=0)           # (H+2, W, C)
    zcol = jnp.zeros((H + 2, 1, C), x.dtype)
    return jnp.concatenate([zcol, x, zcol], axis=1)        # (H+2, W+2, C)


def _conv3x3_taps(xp, w_ref, H, W):
    """3x3 conv via 9 shifted-slice matmuls accumulated in f32.

    xp:    (H+2, W+2, C) f32 zero-padded tile (in VMEM / vregs)
    w_ref: (9, C, Cout) bf16 weight ref, tap order (kh, kw)
    returns (H*W, Cout) f32
    """
    C = xp.shape[-1]
    Cout = w_ref.shape[-1]
    acc = jnp.zeros((H * W, Cout), jnp.float32)
    for kh in range(3):
        for kw in range(3):
            tap = xp[kh:kh + H, kw:kw + W, :].reshape(H * W, C)
            acc = acc + jnp.dot(tap.astype(jnp.bfloat16),       # bf16 MXU operands
                                w_ref[kh * 3 + kw],
                                preferred_element_type=jnp.float32)
    return acc


def _partial_stats(y):
    """Per-tile (sum, sum_sq) over rows -> (2, Cout) f32."""
    return jnp.concatenate(
        [jnp.sum(y, axis=0, keepdims=True),
         jnp.sum(y * y, axis=0, keepdims=True)], axis=0)


# ---------------------------------------------------------------------------
# Pallas kernels
# ---------------------------------------------------------------------------
def conv_stats_kernel(H, W, x_ref, w_ref, y_ref, stats_ref):
    # x_ref: (1, H, W, C) f32   w_ref: (9, C, Cout) bf16
    # y_ref: (1, H*W, Cout) f32 (pre-BN conv output)
    # stats_ref: (1, 2, Cout) f32 per-image partial (sum, sum_sq)
    xp = _zero_pad_hw(x_ref[0])                      # pad in VMEM, no HBM im2col
    y = _conv3x3_taps(xp, w_ref, H, W)
    y_ref[0] = y
    stats_ref[0] = _partial_stats(y)


def bn_relu_conv_stats_kernel(H, W, y1_ref, s_ref, w_ref, y2_ref, stats_ref):
    # Fused: BN1 apply + ReLU + conv2 + per-image BN2 partial stats.
    # y1_ref: (1, H*W, C) f32   s_ref: (2, C) f32 (row0=scale, row1=shift)
    # w_ref:  (9, C, Cout) bf16
    scale = s_ref[0:1, :]
    shift = s_ref[1:2, :]
    out1 = jnp.maximum(y1_ref[0] * scale + shift, 0.0)           # f32, stays in VMEM
    xp = _zero_pad_hw(out1.reshape(H, W, out1.shape[-1]))
    y = _conv3x3_taps(xp, w_ref, H, W)
    y2_ref[0] = y
    stats_ref[0] = _partial_stats(y)


def bn_apply_add_kernel(y2_ref, s_ref, res_ref, out_ref):
    # BN2 apply + residual add (elementwise, tiled over images).
    scale = s_ref[0:1, :]
    shift = s_ref[1:2, :]
    out_ref[0] = y2_ref[0] * scale + shift + res_ref[0]


# ---------------------------------------------------------------------------
# Host-side glue
# ---------------------------------------------------------------------------
def _compiler_params():
    return pltpu.CompilerParams(
        dimension_semantics=("parallel",),            # megacore on v7x
        vmem_limit_bytes=48 * 1024 * 1024,            # > scoped defaults, < v7x 64 MiB
    )


def _finalize_bn(partial_stats, gamma, beta, count):
    """Reduce per-image (sum, sum_sq) partials -> (2, C) [scale; shift]."""
    tot = jnp.sum(partial_stats, axis=0)              # (2, C)
    mean = tot[0] / count
    var = jnp.maximum(tot[1] / count - mean * mean, 0.0)   # biased var (train-mode BN)
    scale = gamma * jax.lax.rsqrt(var + EPS)
    shift = beta - mean * scale
    return jnp.stack([scale, shift], axis=0)


@jax.jit
def basic_block_forward(x_nchw, w1, w2, gamma, beta):
    """x_nchw: (N,C,H,W); w1,w2: (Cout,Cin,3,3) OIHW; gamma/beta: (Cout,)."""
    N, C, H, W = x_nchw.shape
    Cout = w1.shape[0]
    HW = H * W
    M = N * HW

    x_nhwc = jnp.transpose(x_nchw, (0, 2, 3, 1)).astype(jnp.float32)   # single layout change
    x_flat = x_nhwc.reshape(N, HW, C)                                  # free reshape
    w1r = jnp.transpose(w1, (2, 3, 1, 0)).reshape(9, C, Cout).astype(jnp.bfloat16)
    w2r = jnp.transpose(w2, (2, 3, 1, 0)).reshape(9, Cout, Cout).astype(jnp.bfloat16)
    gamma = gamma.astype(jnp.float32)
    beta = beta.astype(jnp.float32)

    # ---- Pass 1: conv1 (in-VMEM tap expansion) + per-image BN1 partials ----
    y1, st1 = pl.pallas_call(
        functools.partial(conv_stats_kernel, H, W),
        grid=(N,),
        in_specs=[
            pl.BlockSpec((1, H, W, C), lambda n: (n, 0, 0, 0)),
            pl.BlockSpec((9, C, Cout), lambda n: (0, 0, 0)),      # resident weight
        ],
        out_specs=(
            pl.BlockSpec((1, HW, Cout), lambda n: (n, 0, 0)),
            pl.BlockSpec((1, 2, Cout), lambda n: (n, 0, 0)),
        ),
        out_shape=(
            jax.ShapeDtypeStruct((N, HW, Cout), jnp.float32),
            jax.ShapeDtypeStruct((N, 2, Cout), jnp.float32),
        ),
        compiler_params=_compiler_params(),
    )(x_nhwc, w1r)
    s1 = _finalize_bn(st1, gamma, beta, M)            # tiny (2, Cout) vector math

    # ---- Pass 2 (fused): BN1 apply + ReLU + conv2 + per-image BN2 partials ----
    y2, st2 = pl.pallas_call(
        functools.partial(bn_relu_conv_stats_kernel, H, W),
        grid=(N,),
        in_specs=[
            pl.BlockSpec((1, HW, Cout), lambda n: (n, 0, 0)),
            pl.BlockSpec((2, Cout), lambda n: (0, 0)),
            pl.BlockSpec((9, Cout, Cout), lambda n: (0, 0, 0)),
        ],
        out_specs=(
            pl.BlockSpec((1, HW, Cout), lambda n: (n, 0, 0)),
            pl.BlockSpec((1, 2, Cout), lambda n: (n, 0, 0)),
        ),
        out_shape=(
            jax.ShapeDtypeStruct((N, HW, Cout), jnp.float32),
            jax.ShapeDtypeStruct((N, 2, Cout), jnp.float32),
        ),
        compiler_params=_compiler_params(),
    )(y1, s1, w2r)
    s2 = _finalize_bn(st2, gamma, beta, M)

    # ---- Pass 3: BN2 apply + residual add ----
    out = pl.pallas_call(
        bn_apply_add_kernel,
        grid=(N,),
        in_specs=[
            pl.BlockSpec((1, HW, Cout), lambda n: (n, 0, 0)),
            pl.BlockSpec((2, Cout), lambda n: (0, 0)),
            pl.BlockSpec((1, HW, C), lambda n: (n, 0, 0)),
        ],
        out_specs=pl.BlockSpec((1, HW, Cout), lambda n: (n, 0, 0)),
        out_shape=jax.ShapeDtypeStruct((N, HW, Cout), jnp.float32),
        compiler_params=_compiler_params(),
    )(y2, s2, x_flat)

    return jnp.transpose(out.reshape(N, H, W, Cout), (0, 3, 1, 2))     # back to NCHW


# ---------------------------------------------------------------------------
# Pure-JAX references for correctness checks
# ---------------------------------------------------------------------------
def ref_forward(x_nchw, w1, w2, gamma, beta, use_bf16):
    """use_bf16=True mirrors the kernel's MXU precision (bf16 operands, f32 acc);
    use_bf16=False is the full-f32 'ideal' reference."""
    cdt = jnp.bfloat16 if use_bf16 else jnp.float32
    prec = None if use_bf16 else jax.lax.Precision.HIGHEST

    def conv(x, w):
        return jax.lax.conv_general_dilated(
            x.astype(cdt), w.astype(cdt), (1, 1), "SAME",
            dimension_numbers=("NCHW", "OIHW", "NCHW"),
            precision=prec, preferred_element_type=jnp.float32)

    def bn(y):
        mean = jnp.mean(y, axis=(0, 2, 3), keepdims=True)
        var = jnp.maximum(jnp.mean(y * y, axis=(0, 2, 3), keepdims=True)
                          - mean * mean, 0.0)
        return ((y - mean) * jax.lax.rsqrt(var + EPS)
                * gamma.reshape(1, -1, 1, 1) + beta.reshape(1, -1, 1, 1))

    out = jnp.maximum(bn(conv(x_nchw, w1)), 0.0)
    out = bn(conv(out, w2))
    return out + x_nchw.astype(jnp.float32)


if __name__ == "__main__":
    key = jax.random.PRNGKey(0)
    k_x, k_w1, k_w2, k_g, k_b = jax.random.split(key, 5)

    N, C, H, W = 2, 4, 16, 16          # in_channels == out_channels, stride=1
    x = jax.random.normal(k_x, (N, C, H, W), dtype=jnp.float32)
    w1 = jax.random.normal(k_w1, (C, C, 3, 3), dtype=jnp.float32) * 0.2
    w2 = jax.random.normal(k_w2, (C, C, 3, 3), dtype=jnp.float32) * 0.2
    gamma = 1.0 + 0.1 * jax.random.normal(k_g, (C,), dtype=jnp.float32)
    beta = 0.1 * jax.random.normal(k_b, (C,), dtype=jnp.float32)

    out = jax.block_until_ready(basic_block_forward(x, w1, w2, gamma, beta))
    assert out.shape == (N, C, H, W)

    # Matched-precision reference (bf16 MXU operands, f32 accumulate): tight check.
    ref_m = jax.block_until_ready(ref_forward(x, w1, w2, gamma, beta, use_bf16=True))
    err_m = float(jnp.max(jnp.abs(out - ref_m)))
    assert jnp.allclose(out, ref_m, atol=2e-3, rtol=2e-3), err_m

    # Full-f32 reference: loose check (bf16 operands introduce ~1e-2 deviation).
    ref_f = jax.block_until_ready(ref_forward(x, w1, w2, gamma, beta, use_bf16=False))
    err_f = float(jnp.max(jnp.abs(out - ref_f)))
    assert jnp.allclose(out, ref_f, atol=5e-2, rtol=5e-2), err_f

    print("KERNEL_OK")
</pallas_src>

<mosaic_0001>
module attributes {stable_mosaic.version = 11 : i64} {
  func.func @conv_stats_kernel(%arg0: i32, %arg1: memref<1x16x16x4xf32, #tpu.memory_space<vmem>>, %arg2: memref<9x4x4xbf16, #tpu.memory_space<vmem>>, %arg3: memref<1x256x4xf32, #tpu.memory_space<vmem>>, %arg4: memref<1x2x4xf32, #tpu.memory_space<vmem>>) attributes {dimension_semantics = [#tpu.dimension_semantics<parallel>], iteration_bounds = array<i64: 2>, scalar_prefetch = 0 : i64, scratch_operands = 0 : i64, tpu.core_type = #tpu.core_type<tc>, window_params = [{transform_indices = @transform_0, window_bounds = array<i64: 1, 16, 16, 4>}, {pipeline_mode = #tpu.pipeline_mode<synchronous>, transform_indices = @transform_1, window_bounds = array<i64: 9, 4, 4>}, {transform_indices = @transform_2, window_bounds = array<i64: 1, 256, 4>}, {transform_indices = @transform_3, window_bounds = array<i64: 1, 2, 4>}]} {
    %c0 = arith.constant 0 : index
    %c0_0 = arith.constant 0 : index
    %c0_1 = arith.constant 0 : index
    %c0_2 = arith.constant 0 : index
    %0 = vector.load %arg1[%c0, %c0_0, %c0_1, %c0_2] : memref<1x16x16x4xf32, #tpu.memory_space<vmem>>, vector<1x16x16x4xf32>
    %1 = vector.shape_cast %0 : vector<1x16x16x4xf32> to vector<16x16x4xf32>
    %cst = arith.constant 0.000000e+00 : f32
    %2 = vector.broadcast %cst : f32 to vector<1x16x4xf32>
    %3 = tpu.concatenate %2, %1, %2 in 0 : vector<1x16x4xf32>, vector<16x16x4xf32>, vector<1x16x4xf32> -> vector<18x16x4xf32>
    %cst_3 = arith.constant 0.000000e+00 : f32
    %4 = vector.broadcast %cst_3 : f32 to vector<18x1x4xf32>
    %5 = tpu.concatenate %4, %3, %4 in 1 : vector<18x1x4xf32>, vector<18x16x4xf32>, vector<18x1x4xf32> -> vector<18x18x4xf32>
    %cst_4 = arith.constant 0.000000e+00 : f32
    %6 = vector.broadcast %cst_4 : f32 to vector<256x4xf32>
    %7 = vector.extract_strided_slice %5 {offsets = [0, 0, 0], sizes = [16, 16, 4], strides = [1, 1, 1]} : vector<18x18x4xf32> to vector<16x16x4xf32>
    %8 = vector.shape_cast %7 : vector<16x16x4xf32> to vector<256x4xf32>
    %9 = arith.truncf %8 : vector<256x4xf32> to vector<256x4xbf16>
    %c0_5 = arith.constant 0 : index
    %c0_6 = arith.constant 0 : index
    %c0_7 = arith.constant 0 : index
    %10 = vector.load %arg2[%c0_5, %c0_6, %c0_7] : memref<9x4x4xbf16, #tpu.memory_space<vmem>>, vector<1x4x4xbf16>
    %11 = vector.shape_cast %10 : vector<1x4x4xbf16> to vector<4x4xbf16>
    %cst_8 = arith.constant dense<0.000000e+00> : vector<256x4xf32>
    %12 = tpu.matmul %9, %11, %cst_8 {dimension_numbers = #tpu.dot_dimension_numbers<[1], [0], [0], [1], [0, 0, 1, 1], [], []>} : vector<256x4xbf16>, vector<4x4xbf16>, vector<256x4xf32> -> vector<256x4xf32>
    %13 = arith.addf %6, %12 : vector<256x4xf32>
    %14 = vector.extract_strided_slice %5 {offsets = [0, 1, 0], sizes = [16, 16, 4], strides = [1, 1, 1]} : vector<18x18x4xf32> to vector<16x16x4xf32>
    %15 = vector.shape_cast %14 : vector<16x16x4xf32> to vector<256x4xf32>
    %16 = arith.truncf %15 : vector<256x4xf32> to vector<256x4xbf16>
    %c1 = arith.constant 1 : index
    %c0_9 = arith.constant 0 : index
    %c0_10 = arith.constant 0 : index
    %17 = vector.load %arg2[%c1, %c0_9, %c0_10] : memref<9x4x4xbf16, #tpu.memory_space<vmem>>, vector<1x4x4xbf16>
    %18 = vector.shape_cast %17 : vector<1x4x4xbf16> to vector<4x4xbf16>
    %cst_11 = arith.constant dense<0.000000e+00> : vector<256x4xf32>
    %19 = tpu.matmul %16, %18, %cst_11 {dimension_numbers = #tpu.dot_dimension_numbers<[1], [0], [0], [1], [0, 0, 1, 1], [], []>} : vector<256x4xbf16>, vector<4x4xbf16>, vector<256x4xf32> -> vector<256x4xf32>
    %20 = arith.addf %13, %19 : vector<256x4xf32>
    %21 = vector.extract_strided_slice %5 {offsets = [0, 2, 0], sizes = [16, 16, 4], strides = [1, 1, 1]} : vector<18x18x4xf32> to vector<16x16x4xf32>
    %22 = vector.shape_cast %21 : vector<16x16x4xf32> to vector<256x4xf32>
    %23 = arith.truncf %22 : vector<256x4xf32> to vector<256x4xbf16>
    %c2 = arith.constant 2 : index
    %c0_12 = arith.constant 0 : index
    %c0_13 = arith.constant 0 : index
    %24 = vector.load %arg2[%c2, %c0_12, %c0_13] : memref<9x4x4xbf16, #tpu.memory_space<vmem>>, vector<1x4x4xbf16>
    %25 = vector.shape_cast %24 : vector<1x4x4xbf16> to vector<4x4xbf16>
    %cst_14 = arith.constant dense<0.000000e+00> : vector<256x4xf32>
    %26 = tpu.matmul %23, %25, %cst_14 {dimension_numbers = #tpu.dot_dimension_numbers<[1], [0], [0], [1], [0, 0, 1, 1], [], []>} : vector<256x4xbf16>, vector<4x4xbf16>, vector<256x4xf32> -> vector<256x4xf32>
    %27 = arith.addf %20, %26 : vector<256x4xf32>
    %28 = vector.extract_strided_slice %5 {offsets = [1, 0, 0], sizes = [16, 16, 4], strides = [1, 1, 1]} : vector<18x18x4xf32> to vector<16x16x4xf32>
    %29 = vector.shape_cast %28 : vector<16x16x4xf32> to vector<256x4xf32>
    %30 = arith.truncf %29 : vector<256x4xf32> to vector<256x4xbf16>
    %c3 = arith.constant 3 : index
    %c0_15 = arith.constant 0 : index
    %c0_16 = arith.constant 0 : index
    %31 = vector.load %arg2[%c3, %c0_15, %c0_16] : memref<9x4x4xbf16, #tpu.memory_space<vmem>>, vector<1x4x4xbf16>
    %32 = vector.shape_cast %31 : vector<1x4x4xbf16> to vector<4x4xbf16>
    %cst_17 = arith.constant dense<0.000000e+00> : vector<256x4xf32>
    %33 = tpu.matmul %30, %32, %cst_17 {dimension_numbers = #tpu.dot_dimension_numbers<[1], [0], [0], [1], [0, 0, 1, 1], [], []>} : vector<256x4xbf16>, vector<4x4xbf16>, vector<256x4xf32> -> vector<256x4xf32>
    %34 = arith.addf %27, %33 : vector<256x4xf32>
    %35 = vector.extract_strided_slice %5 {offsets = [1, 1, 0], sizes = [16, 16, 4], strides = [1, 1, 1]} : vector<18x18x4xf32> to vector<16x16x4xf32>
    %36 = vector.shape_cast %35 : vector<16x16x4xf32> to vector<256x4xf32>
    %37 = arith.truncf %36 : vector<256x4xf32> to vector<256x4xbf16>
    %c4 = arith.constant 4 : index
    %c0_18 = arith.constant 0 : index
    %c0_19 = arith.constant 0 : index
    %38 = vector.load %arg2[%c4, %c0_18, %c0_19] : memref<9x4x4xbf16, #tpu.memory_space<vmem>>, vector<1x4x4xbf16>
    %39 = vector.shape_cast %38 : vector<1x4x4xbf16> to vector<4x4xbf16>
    %cst_20 = arith.constant dense<0.000000e+00> : vector<256x4xf32>
    %40 = tpu.matmul %37, %39, %cst_20 {dimension_numbers = #tpu.dot_dimension_numbers<[1], [0], [0], [1], [0, 0, 1, 1], [], []>} : vector<256x4xbf16>, vector<4x4xbf16>, vector<256x4xf32> -> vector<256x4xf32>
    %41 = arith.addf %34, %40 : vector<256x4xf32>
    %42 = vector.extract_strided_slice %5 {offsets = [1, 2, 0], sizes = [16, 16, 4], strides = [1, 1, 1]} : vector<18x18x4xf32> to vector<16x16x4xf32>
    %43 = vector.shape_cast %42 : vector<16x16x4xf32> to vector<256x4xf32>
    %44 = arith.truncf %43 : vector<256x4xf32> to vector<256x4xbf16>
    %c5 = arith.constant 5 : index
    %c0_21 = arith.constant 0 : index
    %c0_22 = arith.constant 0 : index
    %45 = vector.load %arg2[%c5, %c0_21, %c0_22] : memref<9x4x4xbf16, #tpu.memory_space<vmem>>, vector<1x4x4xbf16>
    %46 = vector.shape_cast %45 : vector<1x4x4xbf16> to vector<4x4xbf16>
    %cst_23 = arith.constant dense<0.000000e+00> : vector<256x4xf32>
    %47 = tpu.matmul %44, %46, %cst_23 {dimension_numbers = #tpu.dot_dimension_numbers<[1], [0], [0], [1], [0, 0, 1, 1], [], []>} : vector<256x4xbf16>, vector<4x4xbf16>, vector<256x4xf32> -> vector<256x4xf32>
    %48 = arith.addf %41, %47 : vector<256x4xf32>
    %49 = vector.extract_strided_slice %5 {offsets = [2, 0, 0], sizes = [16, 16, 4], strides = [1, 1, 1]} : vector<18x18x4xf32> to vector<16x16x4xf32>
    %50 = vector.shape_cast %49 : vector<16x16x4xf32> to vector<256x4xf32>
    %51 = arith.truncf %50 : vector<256x4xf32> to vector<256x4xbf16>
    %c6 = arith.constant 6 : index
    %c0_24 = arith.constant 0 : index
    %c0_25 = arith.constant 0 : index
    %52 = vector.load %arg2[%c6, %c0_24, %c0_25] : memref<9x4x4xbf16, #tpu.memory_space<vmem>>, vector<1x4x4xbf16>
    %53 = vector.shape_cast %52 : vector<1x4x4xbf16> to vector<4x4xbf16>
    %cst_26 = arith.constant dense<0.000000e+00> : vector<256x4xf32>
    %54 = tpu.matmul %51, %53, %cst_26 {dimension_numbers = #tpu.dot_dimension_numbers<[1], [0], [0], [1], [0, 0, 1, 1], [], []>} : vector<256x4xbf16>, vector<4x4xbf16>, vector<256x4xf32> -> vector<256x4xf32>
    %55 = arith.addf %48, %54 : vector<256x4xf32>
    %56 = vector.extract_strided_slice %5 {offsets = [2, 1, 0], sizes = [16, 16, 4], strides = [1, 1, 1]} : vector<18x18x4xf32> to vector<16x16x4xf32>
    %57 = vector.shape_cast %56 : vector<16x16x4xf32> to vector<256x4xf32>
    %58 = arith.truncf %57 : vector<256x4xf32> to vector<256x4xbf16>
    %c7 = arith.constant 7 : index
    %c0_27 = arith.constant 0 : index
    %c0_28 = arith.constant 0 : index
    %59 = vector.load %arg2[%c7, %c0_27, %c0_28] : memref<9x4x4xbf16, #tpu.memory_space<vmem>>, vector<1x4x4xbf16>
    %60 = vector.shape_cast %59 : vector<1x4x4xbf16> to vector<4x4xbf16>
    %cst_29 = arith.constant dense<0.000000e+00> : vector<256x4xf32>
    %61 = tpu.matmul %58, %60, %cst_29 {dimension_numbers = #tpu.dot_dimension_numbers<[1], [0], [0], [1], [0, 0, 1, 1], [], []>} : vector<256x4xbf16>, vector<4x4xbf16>, vector<256x4xf32> -> vector<256x4xf32>
    %62 = arith.addf %55, %61 : vector<256x4xf32>
    %63 = vector.extract_strided_slice %5 {offsets = [2, 2, 0], sizes = [16, 16, 4], strides = [1, 1, 1]} : vector<18x18x4xf32> to vector<16x16x4xf32>
    %64 = vector.shape_cast %63 : vector<16x16x4xf32> to vector<256x4xf32>
    %65 = arith.truncf %64 : vector<256x4xf32> to vector<256x4xbf16>
    %c8 = arith.constant 8 : index
    %c0_30 = arith.constant 0 : index
    %c0_31 = arith.constant 0 : index
    %66 = vector.load %arg2[%c8, %c0_30, %c0_31] : memref<9x4x4xbf16, #tpu.memory_space<vmem>>, vector<1x4x4xbf16>
    %67 = vector.shape_cast %66 : vector<1x4x4xbf16> to vector<4x4xbf16>
    %cst_32 = arith.constant dense<0.000000e+00> : vector<256x4xf32>
    %68 = tpu.matmul %65, %67, %cst_32 {dimension_numbers = #tpu.dot_dimension_numbers<[1], [0], [0], [1], [0, 0, 1, 1], [], []>} : vector<256x4xbf16>, vector<4x4xbf16>, vector<256x4xf32> -> vector<256x4xf32>
    %69 = arith.addf %62, %68 : vector<256x4xf32>
    %c0_33 = arith.constant 0 : index
    %c0_34 = arith.constant 0 : index
    %c0_35 = arith.constant 0 : index
    %70 = vector.load %arg3[%c0_33, %c0_34, %c0_35] : memref<1x256x4xf32, #tpu.memory_space<vmem>>, vector<1x256x4xf32>
    %71 = vector.shape_cast %70 : vector<1x256x4xf32> to vector<256x4xf32>
    %72 = vector.shape_cast %69 : vector<256x4xf32> to vector<1x256x4xf32>
    tpu.vector_store %arg3[%c0_33, %c0_34, %c0_35], %72 {strides = array<i32>} : memref<1x256x4xf32, #tpu.memory_space<vmem>>, vector<1x256x4xf32>,
    %cst_36 = arith.constant dense<0.000000e+00> : vector<4xf32>
    %73 = vector.multi_reduction <add>, %69, %cst_36 [0] : vector<256x4xf32> to vector<4xf32>
    %74 = vector.shape_cast %73 : vector<4xf32> to vector<1x4xf32>
    %75 = arith.mulf %69, %69 : vector<256x4xf32>
    %cst_37 = arith.constant dense<0.000000e+00> : vector<4xf32>
    %76 = vector.multi_reduction <add>, %75, %cst_37 [0] : vector<256x4xf32> to vector<4xf32>
    %77 = vector.shape_cast %76 : vector<4xf32> to vector<1x4xf32>
    %78 = tpu.concatenate %74, %77 in 0 : vector<1x4xf32>, vector<1x4xf32> -> vector<2x4xf32>
    %c0_38 = arith.constant 0 : index
    %c0_39 = arith.constant 0 : index
    %c0_40 = arith.constant 0 : index
    %79 = vector.load %arg4[%c0_38, %c0_39, %c0_40] : memref<1x2x4xf32, #tpu.memory_space<vmem>>, vector<1x2x4xf32>
    %80 = vector.shape_cast %79 : vector<1x2x4xf32> to vector<2x4xf32>
    %81 = vector.shape_cast %78 : vector<2x4xf32> to vector<1x2x4xf32>
    tpu.vector_store %arg4[%c0_38, %c0_39, %c0_40], %81 {strides = array<i32>} : memref<1x2x4xf32, #tpu.memory_space<vmem>>, vector<1x2x4xf32>,
    return
  }
  func.func @transform_0(%arg0: i32) -> (i32, i32, i32, i32) {
    %c0_i32 = arith.constant 0 : i32
    %c0_i32_0 = arith.constant 0 : i32
    %c0_i32_1 = arith.constant 0 : i32
    %c0_i32_2 = arith.constant 0 : i32
    return %arg0, %c0_i32, %c0_i32_0, %c0_i32_1 : i32, i32, i32, i32
  }
  func.func @transform_1(%arg0: i32) -> (i32, i32, i32) {
    %c0_i32 = arith.constant 0 : i32
    %c0_i32_0 = arith.constant 0 : i32
    %c0_i32_1 = arith.constant 0 : i32
    %c0_i32_2 = arith.constant 0 : i32
    return %c0_i32, %c0_i32_0, %c0_i32_1 : i32, i32, i32
  }
  func.func @transform_2(%arg0: i32) -> (i32, i32, i32) {
    %c0_i32 = arith.constant 0 : i32
    %c0_i32_0 = arith.constant 0 : i32
    %c0_i32_1 = arith.constant 0 : i32
    return %arg0, %c0_i32, %c0_i32_0 : i32, i32, i32
  }
  func.func @transform_3(%arg0: i32) -> (i32, i32, i32) {
    %c0_i32 = arith.constant 0 : i32
    %c0_i32_0 = arith.constant 0 : i32
    %c0_i32_1 = arith.constant 0 : i32
    return %arg0, %c0_i32, %c0_i32_0 : i32, i32, i32
  }
}

module attributes {stable_mosaic.version = 11 : i64} {
  func.func @bn_relu_conv_stats_kernel(%arg0: i32, %arg1: memref<1x256x4xf32, #tpu.memory_space<vmem>>, %arg2: memref<2x4xf32, #tpu.memory_space<vmem>>, %arg3: memref<9x4x4xbf16, #tpu.memory_space<vmem>>, %arg4: memref<1x256x4xf32, #tpu.memory_space<vmem>>, %arg5: memref<1x2x4xf32, #tpu.memory_space<vmem>>) attributes {dimension_semantics = [#tpu.dimension_semantics<parallel>], iteration_bounds = array<i64: 2>, scalar_prefetch = 0 : i64, scratch_operands = 0 : i64, tpu.core_type = #tpu.core_type<tc>, window_params = [{transform_indices = @transform_0, window_bounds = array<i64: 1, 256, 4>}, {pipeline_mode = #tpu.pipeline_mode<synchronous>, transform_indices = @transform_1, window_bounds = array<i64: 2, 4>}, {pipeline_mode = #tpu.pipeline_mode<synchronous>, transform_indices = @transform_2, window_bounds = array<i64: 9, 4, 4>}, {transform_indices = @transform_3, window_bounds = array<i64: 1, 256, 4>}, {transform_indices = @transform_4, window_bounds = array<i64: 1, 2, 4>}]} {
    %c0 = arith.constant 0 : index
    %c0_0 = arith.constant 0 : index
    %0 = vector.load %arg2[%c0, %c0_0] : memref<2x4xf32, #tpu.memory_space<vmem>>, vector<1x4xf32>
    %c1 = arith.constant 1 : index
    %c0_1 = arith.constant 0 : index
    %1 = vector.load %arg2[%c1, %c0_1] : memref<2x4xf32, #tpu.memory_space<vmem>>, vector<1x4xf32>
    %c0_2 = arith.constant 0 : index
    %c0_3 = arith.constant 0 : index
    %c0_4 = arith.constant 0 : index
    %2 = vector.load %arg1[%c0_2, %c0_3, %c0_4] : memref<1x256x4xf32, #tpu.memory_space<vmem>>, vector<1x256x4xf32>
    %3 = vector.shape_cast %2 : vector<1x256x4xf32> to vector<256x4xf32>
    %4 = vector.broadcast %0 : vector<1x4xf32> to vector<256x4xf32>
    %5 = arith.mulf %3, %4 : vector<256x4xf32>
    %6 = vector.broadcast %1 : vector<1x4xf32> to vector<256x4xf32>
    %7 = arith.addf %5, %6 : vector<256x4xf32>
    %cst = arith.constant 0.000000e+00 : f32
    %8 = vector.broadcast %cst : f32 to vector<256x4xf32>
    %9 = arith.maximumf %7, %8 : vector<256x4xf32>
    %10 = vector.shape_cast %9 : vector<256x4xf32> to vector<16x16x4xf32>
    %cst_5 = arith.constant 0.000000e+00 : f32
    %11 = vector.broadcast %cst_5 : f32 to vector<1x16x4xf32>
    %12 = tpu.concatenate %11, %10, %11 in 0 : vector<1x16x4xf32>, vector<16x16x4xf32>, vector<1x16x4xf32> -> vector<18x16x4xf32>
    %cst_6 = arith.constant 0.000000e+00 : f32
    %13 = vector.broadcast %cst_6 : f32 to vector<18x1x4xf32>
    %14 = tpu.concatenate %13, %12, %13 in 1 : vector<18x1x4xf32>, vector<18x16x4xf32>, vector<18x1x4xf32> -> vector<18x18x4xf32>
    %cst_7 = arith.constant 0.000000e+00 : f32
    %15 = vector.broadcast %cst_7 : f32 to vector<256x4xf32>
    %16 = vector.extract_strided_slice %14 {offsets = [0, 0, 0], sizes = [16, 16, 4], strides = [1, 1, 1]} : vector<18x18x4xf32> to vector<16x16x4xf32>
    %17 = vector.shape_cast %16 : vector<16x16x4xf32> to vector<256x4xf32>
    %18 = arith.truncf %17 : vector<256x4xf32> to vector<256x4xbf16>
    %c0_8 = arith.constant 0 : index
    %c0_9 = arith.constant 0 : index
    %c0_10 = arith.constant 0 : index
    %19 = vector.load %arg3[%c0_8, %c0_9, %c0_10] : memref<9x4x4xbf16, #tpu.memory_space<vmem>>, vector<1x4x4xbf16>
    %20 = vector.shape_cast %19 : vector<1x4x4xbf16> to vector<4x4xbf16>
    %cst_11 = arith.constant dense<0.000000e+00> : vector<256x4xf32>
    %21 = tpu.matmul %18, %20, %cst_11 {dimension_numbers = #tpu.dot_dimension_numbers<[1], [0], [0], [1], [0, 0, 1, 1], [], []>} : vector<256x4xbf16>, vector<4x4xbf16>, vector<256x4xf32> -> vector<256x4xf32>
    %22 = arith.addf %15, %21 : vector<256x4xf32>
    %23 = vector.extract_strided_slice %14 {offsets = [0, 1, 0], sizes = [16, 16, 4], strides = [1, 1, 1]} : vector<18x18x4xf32> to vector<16x16x4xf32>
    %24 = vector.shape_cast %23 : vector<16x16x4xf32> to vector<256x4xf32>
    %25 = arith.truncf %24 : vector<256x4xf32> to vector<256x4xbf16>
    %c1_12 = arith.constant 1 : index
    %c0_13 = arith.constant 0 : index
    %c0_14 = arith.constant 0 : index
    %26 = vector.load %arg3[%c1_12, %c0_13, %c0_14] : memref<9x4x4xbf16, #tpu.memory_space<vmem>>, vector<1x4x4xbf16>
    %27 = vector.shape_cast %26 : vector<1x4x4xbf16> to vector<4x4xbf16>
    %cst_15 = arith.constant dense<0.000000e+00> : vector<256x4xf32>
    %28 = tpu.matmul %25, %27, %cst_15 {dimension_numbers = #tpu.dot_dimension_numbers<[1], [0], [0], [1], [0, 0, 1, 1], [], []>} : vector<256x4xbf16>, vector<4x4xbf16>, vector<256x4xf32> -> vector<256x4xf32>
    %29 = arith.addf %22, %28 : vector<256x4xf32>
    %30 = vector.extract_strided_slice %14 {offsets = [0, 2, 0], sizes = [16, 16, 4], strides = [1, 1, 1]} : vector<18x18x4xf32> to vector<16x16x4xf32>
    %31 = vector.shape_cast %30 : vector<16x16x4xf32> to vector<256x4xf32>
    %32 = arith.truncf %31 : vector<256x4xf32> to vector<256x4xbf16>
    %c2 = arith.constant 2 : index
    %c0_16 = arith.constant 0 : index
    %c0_17 = arith.constant 0 : index
    %33 = vector.load %arg3[%c2, %c0_16, %c0_17] : memref<9x4x4xbf16, #tpu.memory_space<vmem>>, vector<1x4x4xbf16>
    %34 = vector.shape_cast %33 : vector<1x4x4xbf16> to vector<4x4xbf16>
    %cst_18 = arith.constant dense<0.000000e+00> : vector<256x4xf32>
    %35 = tpu.matmul %32, %34, %cst_18 {dimension_numbers = #tpu.dot_dimension_numbers<[1], [0], [0], [1], [0, 0, 1, 1], [], []>} : vector<256x4xbf16>, vector<4x4xbf16>, vector<256x4xf32> -> vector<256x4xf32>
    %36 = arith.addf %29, %35 : vector<256x4xf32>
    %37 = vector.extract_strided_slice %14 {offsets = [1, 0, 0], sizes = [16, 16, 4], strides = [1, 1, 1]} : vector<18x18x4xf32> to vector<16x16x4xf32>
    %38 = vector.shape_cast %37 : vector<16x16x4xf32> to vector<256x4xf32>
    %39 = arith.truncf %38 : vector<256x4xf32> to vector<256x4xbf16>
    %c3 = arith.constant 3 : index
    %c0_19 = arith.constant 0 : index
    %c0_20 = arith.constant 0 : index
    %40 = vector.load %arg3[%c3, %c0_19, %c0_20] : memref<9x4x4xbf16, #tpu.memory_space<vmem>>, vector<1x4x4xbf16>
    %41 = vector.shape_cast %40 : vector<1x4x4xbf16> to vector<4x4xbf16>
    %cst_21 = arith.constant dense<0.000000e+00> : vector<256x4xf32>
    %42 = tpu.matmul %39, %41, %cst_21 {dimension_numbers = #tpu.dot_dimension_numbers<[1], [0], [0], [1], [0, 0, 1, 1], [], []>} : vector<256x4xbf16>, vector<4x4xbf16>, vector<256x4xf32> -> vector<256x4xf32>
    %43 = arith.addf %36, %42 : vector<256x4xf32>
    %44 = vector.extract_strided_slice %14 {offsets = [1, 1, 0], sizes = [16, 16, 4], strides = [1, 1, 1]} : vector<18x18x4xf32> to vector<16x16x4xf32>
    %45 = vector.shape_cast %44 : vector<16x16x4xf32> to vector<256x4xf32>
    %46 = arith.truncf %45 : vector<256x4xf32> to vector<256x4xbf16>
    %c4 = arith.constant 4 : index
    %c0_22 = arith.constant 0 : index
    %c0_23 = arith.constant 0 : index
    %47 = vector.load %arg3[%c4, %c0_22, %c0_23] : memref<9x4x4xbf16, #tpu.memory_space<vmem>>, vector<1x4x4xbf16>
    %48 = vector.shape_cast %47 : vector<1x4x4xbf16> to vector<4x4xbf16>
    %cst_24 = arith.constant dense<0.000000e+00> : vector<256x4xf32>
    %49 = tpu.matmul %46, %48, %cst_24 {dimension_numbers = #tpu.dot_dimension_numbers<[1], [0], [0], [1], [0, 0, 1, 1], [], []>} : vector<256x4xbf16>, vector<4x4xbf16>, vector<256x4xf32> -> vector<256x4xf32>
    %50 = arith.addf %43, %49 : vector<256x4xf32>
    %51 = vector.extract_strided_slice %14 {offsets = [1, 2, 0], sizes = [16, 16, 4], strides = [1, 1, 1]} : vector<18x18x4xf32> to vector<16x16x4xf32>
    %52 = vector.shape_cast %51 : vector<16x16x4xf32> to vector<256x4xf32>
    %53 = arith.truncf %52 : vector<256x4xf32> to vector<256x4xbf16>
    %c5 = arith.constant 5 : index
    %c0_25 = arith.constant 0 : index
    %c0_26 = arith.constant 0 : index
    %54 = vector.load %arg3[%c5, %c0_25, %c0_26] : memref<9x4x4xbf16, #tpu.memory_space<vmem>>, vector<1x4x4xbf16>
    %55 = vector.shape_cast %54 : vector<1x4x4xbf16> to vector<4x4xbf16>
    %cst_27 = arith.constant dense<0.000000e+00> : vector<256x4xf32>
    %56 = tpu.matmul %53, %55, %cst_27 {dimension_numbers = #tpu.dot_dimension_numbers<[1], [0], [0], [1], [0, 0, 1, 1], [], []>} : vector<256x4xbf16>, vector<4x4xbf16>, vector<256x4xf32> -> vector<256x4xf32>
    %57 = arith.addf %50, %56 : vector<256x4xf32>
    %58 = vector.extract_strided_slice %14 {offsets = [2, 0, 0], sizes = [16, 16, 4], strides = [1, 1, 1]} : vector<18x18x4xf32> to vector<16x16x4xf32>
    %59 = vector.shape_cast %58 : vector<16x16x4xf32> to vector<256x4xf32>
    %60 = arith.truncf %59 : vector<256x4xf32> to vector<256x4xbf16>
    %c6 = arith.constant 6 : index
    %c0_28 = arith.constant 0 : index
    %c0_29 = arith.constant 0 : index
    %61 = vector.load %arg3[%c6, %c0_28, %c0_29] : memref<9x4x4xbf16, #tpu.memory_space<vmem>>, vector<1x4x4xbf16>
    %62 = vector.shape_cast %61 : vector<1x4x4xbf16> to vector<4x4xbf16>
    %cst_30 = arith.constant dense<0.000000e+00> : vector<256x4xf32>
    %63 = tpu.matmul %60, %62, %cst_30 {dimension_numbers = #tpu.dot_dimension_numbers<[1], [0], [0], [1], [0, 0, 1, 1], [], []>} : vector<256x4xbf16>, vector<4x4xbf16>, vector<256x4xf32> -> vector<256x4xf32>
    %64 = arith.addf %57, %63 : vector<256x4xf32>
    %65 = vector.extract_strided_slice %14 {offsets = [2, 1, 0], sizes = [16, 16, 4], strides = [1, 1, 1]} : vector<18x18x4xf32> to vector<16x16x4xf32>
    %66 = vector.shape_cast %65 : vector<16x16x4xf32> to vector<256x4xf32>
    %67 = arith.truncf %66 : vector<256x4xf32> to vector<256x4xbf16>
    %c7 = arith.constant 7 : index
    %c0_31 = arith.constant 0 : index
    %c0_32 = arith.constant 0 : index
    %68 = vector.load %arg3[%c7, %c0_31, %c0_32] : memref<9x4x4xbf16, #tpu.memory_space<vmem>>, vector<1x4x4xbf16>
    %69 = vector.shape_cast %68 : vector<1x4x4xbf16> to vector<4x4xbf16>
    %cst_33 = arith.constant dense<0.000000e+00> : vector<256x4xf32>
    %70 = tpu.matmul %67, %69, %cst_33 {dimension_numbers = #tpu.dot_dimension_numbers<[1], [0], [0], [1], [0, 0, 1, 1], [], []>} : vector<256x4xbf16>, vector<4x4xbf16>, vector<256x4xf32> -> vector<256x4xf32>
    %71 = arith.addf %64, %70 : vector<256x4xf32>
    %72 = vector.extract_strided_slice %14 {offsets = [2, 2, 0], sizes = [16, 16, 4], strides = [1, 1, 1]} : vector<18x18x4xf32> to vector<16x16x4xf32>
    %73 = vector.shape_cast %72 : vector<16x16x4xf32> to vector<256x4xf32>
    %74 = arith.truncf %73 : vector<256x4xf32> to vector<256x4xbf16>
    %c8 = arith.constant 8 : index
    %c0_34 = arith.constant 0 : index
    %c0_35 = arith.constant 0 : index
    %75 = vector.load %arg3[%c8, %c0_34, %c0_35] : memref<9x4x4xbf16, #tpu.memory_space<vmem>>, vector<1x4x4xbf16>
    %76 = vector.shape_cast %75 : vector<1x4x4xbf16> to vector<4x4xbf16>
    %cst_36 = arith.constant dense<0.000000e+00> : vector<256x4xf32>
    %77 = tpu.matmul %74, %76, %cst_36 {dimension_numbers = #tpu.dot_dimension_numbers<[1], [0], [0], [1], [0, 0, 1, 1], [], []>} : vector<256x4xbf16>, vector<4x4xbf16>, vector<256x4xf32> -> vector<256x4xf32>
    %78 = arith.addf %71, %77 : vector<256x4xf32>
    %c0_37 = arith.constant 0 : index
    %c0_38 = arith.constant 0 : index
    %c0_39 = arith.constant 0 : index
    %79 = vector.load %arg4[%c0_37, %c0_38, %c0_39] : memref<1x256x4xf32, #tpu.memory_space<vmem>>, vector<1x256x4xf32>
    %80 = vector.shape_cast %79 : vector<1x256x4xf32> to vector<256x4xf32>
    %81 = vector.shape_cast %78 : vector<256x4xf32> to vector<1x256x4xf32>
    tpu.vector_store %arg4[%c0_37, %c0_38, %c0_39], %81 {strides = array<i32>} : memref<1x256x4xf32, #tpu.memory_space<vmem>>, vector<1x256x4xf32>,
    %cst_40 = arith.constant dense<0.000000e+00> : vector<4xf32>
    %82 = vector.multi_reduction <add>, %78, %cst_40 [0] : vector<256x4xf32> to vector<4xf32>
    %83 = vector.shape_cast %82 : vector<4xf32> to vector<1x4xf32>
    %84 = arith.mulf %78, %78 : vector<256x4xf32>
    %cst_41 = arith.constant dense<0.000000e+00> : vector<4xf32>
    %85 = vector.multi_reduction <add>, %84, %cst_41 [0] : vector<256x4xf32> to vector<4xf32>
    %86 = vector.shape_cast %85 : vector<4xf32> to vector<1x4xf32>
    %87 = tpu.concatenate %83, %86 in 0 : vector<1x4xf32>, vector<1x4xf32> -> vector<2x4xf32>
    %c0_42 = arith.constant 0 : index
    %c0_43 = arith.constant 0 : index
    %c0_44 = arith.constant 0 : index
    %88 = vector.load %arg5[%c0_42, %c0_43, %c0_44] : memref<1x2x4xf32, #tpu.memory_space<vmem>>, vector<1x2x4xf32>
    %89 = vector.shape_cast %88 : vector<1x2x4xf32> to vector<2x4xf32>
    %90 = vector.shape_cast %87 : vector<2x4xf32> to vector<1x2x4xf32>
    tpu.vector_store %arg5[%c0_42, %c0_43, %c0_44], %90 {strides = array<i32>} : memref<1x2x4xf32, #tpu.memory_space<vmem>>, vector<1x2x4xf32>,
    return
  }
  func.func @transform_0(%arg0: i32) -> (i32, i32, i32) {
    %c0_i32 = arith.constant 0 : i32
    %c0_i32_0 = arith.constant 0 : i32
    %c0_i32_1 = arith.constant 0 : i32
    return %arg0, %c0_i32, %c0_i32_0 : i32, i32, i32
  }
  func.func @transform_1(%arg0: i32) -> (i32, i32) {
    %c0_i32 = arith.constant 0 : i32
    %c0_i32_0 = arith.constant 0 : i32
    %c0_i32_1 = arith.constant 0 : i32
    return %c0_i32, %c0_i32_0 : i32, i32
  }
  func.func @transform_2(%arg0: i32) -> (i32, i32, i32) {
    %c0_i32 = arith.constant 0 : i32
    %c0_i32_0 = arith.constant 0 : i32
    %c0_i32_1 = arith.constant 0 : i32
    %c0_i32_2 = arith.constant 0 : i32
    return %c0_i32, %c0_i32_0, %c0_i32_1 : i32, i32, i32
  }
  func.func @transform_3(%arg0: i32) -> (i32, i32, i32) {
    %c0_i32 = arith.constant 0 : i32
    %c0_i32_0 = arith.constant 0 : i32
    %c0_i32_1 = arith.constant 0 : i32
    return %arg0, %c0_i32, %c0_i32_0 : i32, i32, i32
  }
  func.func @transform_4(%arg0: i32) -> (i32, i32, i32) {
    %c0_i32 = arith.constant 0 : i32
    %c0_i32_0 = arith.constant 0 : i32
    %c0_i32_1 = arith.constant 0 : i32
    return %arg0, %c0_i32, %c0_i32_0 : i32, i32, i32
  }
}

module attributes {stable_mosaic.version = 11 : i64} {
  func.func @bn_apply_add_kernel(%arg0: i32, %arg1: memref<1x256x4xf32, #tpu.memory_space<vmem>>, %arg2: memref<2x4xf32, #tpu.memory_space<vmem>>, %arg3: memref<1x256x4xf32, #tpu.memory_space<vmem>>, %arg4: memref<1x256x4xf32, #tpu.memory_space<vmem>>) attributes {dimension_semantics = [#tpu.dimension_semantics<parallel>], iteration_bounds = array<i64: 2>, scalar_prefetch = 0 : i64, scratch_operands = 0 : i64, tpu.core_type = #tpu.core_type<tc>, window_params = [{transform_indices = @transform_0, window_bounds = array<i64: 1, 256, 4>}, {pipeline_mode = #tpu.pipeline_mode<synchronous>, transform_indices = @transform_1, window_bounds = array<i64: 2, 4>}, {transform_indices = @transform_2, window_bounds = array<i64: 1, 256, 4>}, {transform_indices = @transform_3, window_bounds = array<i64: 1, 256, 4>}]} {
    %c0 = arith.constant 0 : index
    %c0_0 = arith.constant 0 : index
    %0 = vector.load %arg2[%c0, %c0_0] : memref<2x4xf32, #tpu.memory_space<vmem>>, vector<1x4xf32>
    %c1 = arith.constant 1 : index
    %c0_1 = arith.constant 0 : index
    %1 = vector.load %arg2[%c1, %c0_1] : memref<2x4xf32, #tpu.memory_space<vmem>>, vector<1x4xf32>
    %c0_2 = arith.constant 0 : index
    %c0_3 = arith.constant 0 : index
    %c0_4 = arith.constant 0 : index
    %2 = vector.load %arg1[%c0_2, %c0_3, %c0_4] : memref<1x256x4xf32, #tpu.memory_space<vmem>>, vector<1x256x4xf32>
    %3 = vector.shape_cast %2 : vector<1x256x4xf32> to vector<256x4xf32>
    %4 = vector.broadcast %0 : vector<1x4xf32> to vector<256x4xf32>
    %5 = arith.mulf %3, %4 : vector<256x4xf32>
    %6 = vector.broadcast %1 : vector<1x4xf32> to vector<256x4xf32>
    %7 = arith.addf %5, %6 : vector<256x4xf32>
    %c0_5 = arith.constant 0 : index
    %c0_6 = arith.constant 0 : index
    %c0_7 = arith.constant 0 : index
    %8 = vector.load %arg3[%c0_5, %c0_6, %c0_7] : memref<1x256x4xf32, #tpu.memory_space<vmem>>, vector<1x256x4xf32>
    %9 = vector.shape_cast %8 : vector<1x256x4xf32> to vector<256x4xf32>
    %10 = arith.addf %7, %9 : vector<256x4xf32>
    %c0_8 = arith.constant 0 : index
    %c0_9 = arith.constant 0 : index
    %c0_10 = arith.constant 0 : index
    %11 = vector.load %arg4[%c0_8, %c0_9, %c0_10] : memref<1x256x4xf32, #tpu.memory_space<vmem>>, vector<1x256x4xf32>
    %12 = vector.shape_cast %11 : vector<1x256x4xf32> to vector<256x4xf32>
    %13 = vector.shape_cast %10 : vector<256x4xf32> to vector<1x256x4xf32>
    tpu.vector_store %arg4[%c0_8, %c0_9, %c0_10], %13 {strides = array<i32>} : memref<1x256x4xf32, #tpu.memory_space<vmem>>, vector<1x256x4xf32>,
    return
  }
  func.func @transform_0(%arg0: i32) -> (i32, i32, i32) {
    %c0_i32 = arith.constant 0 : i32
    %c0_i32_0 = arith.constant 0 : i32
    %c0_i32_1 = arith.constant 0 : i32
    return %arg0, %c0_i32, %c0_i32_0 : i32, i32, i32
  }
  func.func @transform_1(%arg0: i32) -> (i32, i32) {
    %c0_i32 = arith.constant 0 : i32
    %c0_i32_0 = arith.constant 0 : i32
    %c0_i32_1 = arith.constant 0 : i32
    return %c0_i32, %c0_i32_0 : i32, i32
  }
  func.func @transform_2(%arg0: i32) -> (i32, i32, i32) {
    %c0_i32 = arith.constant 0 : i32
    %c0_i32_0 = arith.constant 0 : i32
    %c0_i32_1 = arith.constant 0 : i32
    return %arg0, %c0_i32, %c0_i32_0 : i32, i32, i32
  }
  func.func @transform_3(%arg0: i32) -> (i32, i32, i32) {
    %c0_i32 = arith.constant 0 : i32
    %c0_i32_0 = arith.constant 0 : i32
    %c0_i32_1 = arith.constant 0 : i32
    return %arg0, %c0_i32, %c0_i32_0 : i32, i32, i32
  }
}

</mosaic_0001>

<bundles_post_ra>
// kernel: basic_block_forward.5
= control target key start
LH: loop header
LB: loop body
LE: loop exit
PB: predicated region body
PF: predicated region fallthrough
CT: control target
= control target key end

     0   :  { %s515_s12 = smov 0   ;;  %s743_s0 = inlined_call_operand.vmem [shape: f32[2,256,4], index: 0, kind: input, shape index: {}]   ;;  %s744_s1 = inlined_call_operand.vmem [shape: f32[2,4], index: 1, kind: input, shape index: {}]   ;;  %s745_s2 = inlined_call_operand.vmem [shape: f32[2,256,4], index: 2, kind: input, shape index: {}]   ;;  %s746_s3 = inlined_call_operand.vmem [shape: f32[2,256,4], index: 3, kind: output, shape index: {}]  }
   0x1 LB: > { %s461_s13 = sadd.s32 4294967295, %s493_s12   ;;  %p465_p0 = scmp.ge.s32.totalorder %s493_s12, 1  ;;  %s493_s12 = sphi %s515_s12, %s13_s12  }
   0x2   : > { %p147_p1 = scmp.lt.s32.totalorder %s493_s12, 3 }
   0x4   : > { %p148_p2 = pnand %p465_p0, %p147_p1 }
   0x5   : > { %p176_p3 = scmp.lt.s32.totalorder (!%p148_p2), %s461_s13, 1  ;;  %v526_v0 = vld [vmem:[%s744_s1] ss:$0 sm:$0xff] (!%p148_p2)  ;;  %v541_v1 = vld [vmem:[%s744_s1 + $0x1] ss:$0 sm:$0xff] (!%p148_p2)  ;;  %vm361_vm0 = vcmask (!%p148_p2), 31744  }
   0x6   : > { %151 = sbr.rel (%p148_p2) target bundleno = 49 (0x31), region = 32 }
   0xd   : > { %s748_s13 = smov (!%p176_p3, %s461_s13), 1 }
   0xe   : > { %s476_s14 = sshll.u32 %s748_s13, 8 }
   0xf   : > { %s531_s19 = scalar_lea.vmem %s743_s0, %s476_s14  ;;  %s536_s22 = scalar_lea.vmem %s745_s2, %s476_s14 }
  0x10   : > { %v193_v2 = vld [vmem:[%s531_s19] sm:$0xff]  ;;  %v194_v3 = vld [vmem:[%s531_s19 + $0x8] sm:$0xff]  ;;  %v195_v7 = vld [vmem:[%s531_s19 + $0x10] sm:$0xff]  ;;  %s563_s27 = scalar_lea.vmem %s746_s3, %s476_s14 }
  0x11   : > { %v229_v4 = vmul.f32 %v526_v0, %v193_v2  ;;  %v297_v5 = vld [vmem:[%s536_s22] sm:$0xff]  ;;  %v230_v6 = vmul.f32 %v526_v0, %v194_v3  ;;  %v298_v8 = vld [vmem:[%s536_s22 + $0x8] sm:$0xff]  ;;  %v231_v9 = vmul.f32 %v526_v0, %v195_v7  ;;  %v196_v10 = vld [vmem:[%s531_s19 + $0x18] sm:$0xff] }
  0x12   : > { %v197_v11 = vld [vmem:[%s531_s19 + $0x20] sm:$0xff]  ;;  %v299_v14 = vld [vmem:[%s536_s22 + $0x10] sm:$0xff]  ;;  %v232_v15 = vmul.f32 %v526_v0, %v196_v10  ;;  %v300_v16 = vld [vmem:[%s536_s22 + $0x18] sm:$0xff] }
  0x13   : > { %v265_v12 = vadd.f32 %v541_v1, %v229_v4  ;;  %v266_v13 = vadd.f32 %v541_v1, %v230_v6  ;;  %v233_v17 = vmul.f32 %v526_v0, %v197_v11  ;;  %v198_v18 = vld [vmem:[%s531_s19 + $0x28] sm:$0xff]  ;;  %v267_v19 = vadd.f32 %v541_v1, %v231_v9  ;;  %v301_v20 = vld [vmem:[%s536_s22 + $0x20] sm:$0xff]  ;;  %v199_v22 = vld [vmem:[%s531_s19 + $0x30] sm:$0xff] }
  0x14   : > { %v234_v21 = vmul.f32 %v526_v0, %v198_v18  ;;  %v200_v23 = vld [vmem:[%s531_s19 + $0x38] sm:$0xff]  ;;  %v268_v26 = vadd.f32 %v541_v1, %v232_v15  ;;  %v302_v28 = vld [vmem:[%s536_s22 + $0x28] sm:$0xff]  ;;  %v201_v29 = vld [vmem:[%s531_s19 + $0x40] sm:$0xff]  ;;  %v235_v32 = vmul.f32 %v526_v0, %v199_v22 }
  0x15   : > { %v329_v24 = vadd.f32 %v297_v5, %v265_v12  ;;  %v330_v25 = vadd.f32 %v298_v8, %v266_v13  ;;  %v269_v27 = vadd.f32 %v541_v1, %v233_v17  ;;  %v331_v30 = vadd.f32 %v299_v14, %v267_v19  ;;  %v303_v33 = vld [vmem:[%s536_s22 + $0x30] sm:$0xff]  ;;  %v202_v35 = vld [vmem:[%s531_s19 + $0x48] sm:$0xff]  ;;  %v304_v39 = vld [vmem:[%s536_s22 + $0x38] sm:$0xff] }
  0x16   : > { %v270_v31 = vadd.f32 %v541_v1, %v234_v21  ;;  %v236_v34 = vmul.f32 %v526_v0, %v200_v23  ;;  %v203_v36 = vld [vmem:[%s531_s19 + $0x50] sm:$0xff]  ;;  %v332_v37 = vadd.f32 %v300_v16, %v268_v26  ;;  %v237_v40 = vmul.f32 %v526_v0, %v201_v29  ;;  %v305_v41 = vld [vmem:[%s536_s22 + $0x40] sm:$0xff]  ;;  %v204_v43 = vld [vmem:[%s531_s19 + $0x58] sm:$0xff] }
  0x17   : > { %362 = vst.msk [vmem:[%s563_s27] sm:$0xff] %vm361_vm0, %v329_v24  ;;  %363 = vst.msk [vmem:[%s563_s27 + $0x8] sm:$0xff] %vm361_vm0, %v330_v25  ;;  %v333_v38 = vadd.f32 %v301_v20, %v269_v27  ;;  %v238_v42 = vmul.f32 %v526_v0, %v202_v35  ;;  %v271_v45 = vadd.f32 %v541_v1, %v235_v32  ;;  %v306_v47 = vld [vmem:[%s536_s22 + $0x48] sm:$0xff]  ;;  %v205_v49 = vld [vmem:[%s531_s19 + $0x60] sm:$0xff] }
  0x18   : > { %364 = vst.msk [vmem:[%s563_s27 + $0x10] sm:$0xff] %vm361_vm0, %v331_v30  ;;  %v334_v44 = vadd.f32 %v302_v28, %v270_v31  ;;  %v272_v46 = vadd.f32 %v541_v1, %v236_v34  ;;  %v239_v48 = vmul.f32 %v526_v0, %v203_v36  ;;  %v206_v50 = vld [vmem:[%s531_s19 + $0x68] sm:$0xff]  ;;  %365 = vst.msk [vmem:[%s563_s27 + $0x18] sm:$0xff] %vm361_vm0, %v332_v37  ;;  %v307_v53 = vld [vmem:[%s536_s22 + $0x50] sm:$0xff] }
  0x19   : > { %366 = vst.msk [vmem:[%s563_s27 + $0x20] sm:$0xff] %vm361_vm0, %v333_v38  ;;  %v273_v51 = vadd.f32 %v541_v1, %v237_v40  ;;  %v274_v52 = vadd.f32 %v541_v1, %v238_v42  ;;  %v240_v54 = vmul.f32 %v526_v0, %v204_v43  ;;  %v308_v55 = vld [vmem:[%s536_s22 + $0x58] sm:$0xff]  ;;  %v241_v56 = vmul.f32 %v526_v0, %v205_v49  ;;  %v207_v57 = vld [vmem:[%s531_s19 + $0x70] sm:$0xff]  ;;  %v309_v61 = vld [vmem:[%s536_s22 + $0x60] sm:$0xff] }
  0x1a   : > { %367 = vst.msk [vmem:[%s563_s27 + $0x28] sm:$0xff] %vm361_vm0, %v334_v44  ;;  %v335_v58 = vadd.f32 %v303_v33, %v271_v45  ;;  %v336_v59 = vadd.f32 %v304_v39, %v272_v46  ;;  %v275_v60 = vadd.f32 %v541_v1, %v239_v48  ;;  %v242_v62 = vmul.f32 %v526_v0, %v206_v50  ;;  %v208_v63 = vld [vmem:[%s531_s19 + $0x78] sm:$0xff]  ;;  %v209_v2 = vld [vmem:[%s531_s19 + $0x80] sm:$0xff]  ;;  %v310_v7 = vld [vmem:[%s536_s22 + $0x68] sm:$0xff] }
  0x1b   : > { %v337_v3 = vadd.f32 %v305_v41, %v273_v51  ;;  %v338_v4 = vadd.f32 %v306_v47, %v274_v52  ;;  %v276_v5 = vadd.f32 %v541_v1, %v240_v54  ;;  %v277_v6 = vadd.f32 %v541_v1, %v241_v56  ;;  %v210_v8 = vld [vmem:[%s531_s19 + $0x88] sm:$0xff]  ;;  %v311_v12 = vld [vmem:[%s536_s22 + $0x70] sm:$0xff]  ;;  %v212_v15 = vld [vmem:[%s531_s19 + $0x98] sm:$0xff] }
  0x1c   : > { %368 = vst.msk [vmem:[%s563_s27 + $0x30] sm:$0xff] %vm361_vm0, %v335_v58  ;;  %369 = vst.msk [vmem:[%s563_s27 + $0x38] sm:$0xff] %vm361_vm0, %v336_v59  ;;  %v339_v9 = vadd.f32 %v307_v53, %v275_v60  ;;  %v278_v10 = vadd.f32 %v541_v1, %v242_v62  ;;  %v243_v11 = vmul.f32 %v526_v0, %v207_v57  ;;  %v211_v14 = vld [vmem:[%s531_s19 + $0x90] sm:$0xff]  ;;  %v312_v18 = vld [vmem:[%s536_s22 + $0x78] sm:$0xff] }
  0x1d   : > { %v244_v13 = vmul.f32 %v526_v0, %v208_v63  ;;  %370 = vst.msk [vmem:[%s563_s27 + $0x40] sm:$0xff] %vm361_vm0, %v337_v3  ;;  %371 = vst.msk [vmem:[%s563_s27 + $0x48] sm:$0xff] %vm361_vm0, %v338_v4  ;;  %v340_v16 = vadd.f32 %v308_v55, %v276_v5  ;;  %v341_v17 = vadd.f32 %v309_v61, %v277_v6  ;;  %v313_v20 = vld [vmem:[%s536_s22 + $0x80] sm:$0xff]  ;;  %v314_v26 = vld [vmem:[%s536_s22 + $0x88] sm:$0xff] }
  0x1e   : > { %v245_v19 = vmul.f32 %v526_v0, %v209_v2  ;;  %v246_v21 = vmul.f32 %v526_v0, %v210_v8  ;;  %v213_v22 = vld [vmem:[%s531_s19 + $0xa0] sm:$0xff]  ;;  %372 = vst.msk [vmem:[%s563_s27 + $0x50] sm:$0xff] %vm361_vm0, %v339_v9  ;;  %v342_v23 = vadd.f32 %v310_v7, %v278_v10  ;;  %v279_v24 = vadd.f32 %v541_v1, %v243_v11  ;;  %v315_v28 = vld [vmem:[%s536_s22 + $0x90] sm:$0xff]  ;;  %v214_v29 = vld [vmem:[%s531_s19 + $0xa8] sm:$0xff] }
  0x1f   : > { %v280_v25 = vadd.f32 %v541_v1, %v244_v13  ;;  %v247_v27 = vmul.f32 %v526_v0, %v211_v14  ;;  %373 = vst.msk [vmem:[%s563_s27 + $0x58] sm:$0xff] %vm361_vm0, %v340_v16  ;;  %374 = vst.msk [vmem:[%s563_s27 + $0x60] sm:$0xff] %vm361_vm0, %v341_v17  ;;  %v248_v32 = vmul.f32 %v526_v0, %v212_v15  ;;  %v316_v33 = vld [vmem:[%s536_s22 + $0x98] sm:$0xff]  ;;  %v215_v35 = vld [vmem:[%s531_s19 + $0xb0] sm:$0xff] }
  0x20   : > { %v281_v30 = vadd.f32 %v541_v1, %v245_v19  ;;  %v282_v31 = vadd.f32 %v541_v1, %v246_v21  ;;  %v249_v34 = vmul.f32 %v526_v0, %v213_v22  ;;  %v216_v36 = vld [vmem:[%s531_s19 + $0xb8] sm:$0xff]  ;;  %375 = vst.msk [vmem:[%s563_s27 + $0x68] sm:$0xff] %vm361_vm0, %v342_v23  ;;  %v343_v37 = vadd.f32 %v311_v12, %v279_v24  ;;  %v317_v40 = vld [vmem:[%s536_s22 + $0xa0] sm:$0xff]  ;;  %v218_v43 = vld [vmem:[%s531_s19 + $0xc8] sm:$0xff] }
  0x21   : > { %v344_v38 = vadd.f32 %v312_v18, %v280_v25  ;;  %v283_v39 = vadd.f32 %v541_v1, %v247_v27  ;;  %v250_v41 = vmul.f32 %v526_v0, %v214_v29  ;;  %v217_v42 = vld [vmem:[%s531_s19 + $0xc0] sm:$0xff]  ;;  %v284_v46 = vadd.f32 %v541_v1, %v248_v32  ;;  %v318_v48 = vld [vmem:[%s536_s22 + $0xa8] sm:$0xff]  ;;  %v219_v49 = vld [vmem:[%s531_s19 + $0xd0] sm:$0xff] }
  0x22   : > { %v345_v44 = vadd.f32 %v313_v20, %v281_v30  ;;  %v346_v45 = vadd.f32 %v314_v26, %v282_v31  ;;  %v285_v47 = vadd.f32 %v541_v1, %v249_v34  ;;  %376 = vst.msk [vmem:[%s563_s27 + $0x70] sm:$0xff] %vm361_vm0, %v343_v37  ;;  %v251_v52 = vmul.f32 %v526_v0, %v215_v35  ;;  %v220_v54 = vld [vmem:[%s531_s19 + $0xd8] sm:$0xff]  ;;  %v221_v55 = vld [vmem:[%s531_s19 + $0xe0] sm:$0xff]  ;;  %v319_v58 = vld [vmem:[%s536_s22 + $0xb0] sm:$0xff] }
  0x23   : > { %377 = vst.msk [vmem:[%s563_s27 + $0x78] sm:$0xff] %vm361_vm0, %v344_v38  ;;  %v347_v50 = vadd.f32 %v315_v28, %v283_v39  ;;  %v286_v51 = vadd.f32 %v541_v1, %v250_v41  ;;  %v252_v53 = vmul.f32 %v526_v0, %v216_v36  ;;  %v348_v56 = vadd.f32 %v316_v33, %v284_v46  ;;  %v320_v59 = vld [vmem:[%s536_s22 + $0xb8] sm:$0xff]  ;;  %v222_v62 = vld [vmem:[%s531_s19 + $0xe8] sm:$0xff]  ;;  %v321_v4 = vld [vmem:[%s536_s22 + $0xc0] sm:$0xff] }
  0x24   : > { %378 = vst.msk [vmem:[%s563_s27 + $0x80] sm:$0xff] %vm361_vm0, %v345_v44  ;;  %379 = vst.msk [vmem:[%s563_s27 + $0x88] sm:$0xff] %vm361_vm0, %v346_v45  ;;  %v349_v57 = vadd.f32 %v317_v40, %v285_v47  ;;  %v253_v60 = vmul.f32 %v526_v0, %v217_v42  ;;  %v254_v61 = vmul.f32 %v526_v0, %v218_v43  ;;  %v322_v5 = vld [vmem:[%s536_s22 + $0xc8] sm:$0xff]  ;;  %v323_v9 = vld [vmem:[%s536_s22 + $0xd0] sm:$0xff] }
  0x25   : > { %380 = vst.msk [vmem:[%s563_s27 + $0x90] sm:$0xff] %vm361_vm0, %v347_v50  ;;  %v350_v63 = vadd.f32 %v318_v48, %v286_v51  ;;  %v287_v2 = vadd.f32 %v541_v1, %v251_v52  ;;  %v288_v3 = vadd.f32 %v541_v1, %v252_v53  ;;  %v255_v6 = vmul.f32 %v526_v0, %v219_v49  ;;  %v223_v12 = vld [vmem:[%s531_s19 + $0xf0] sm:$0xff]  ;;  %v224_v13 = vld [vmem:[%s531_s19 + $0xf8] sm:$0xff]  ;;  %v325_v18 = vld [vmem:[%s536_s22 + $0xe0] sm:$0xff] }
  0x26   : > { %381 = vst.msk [vmem:[%s563_s27 + $0x98] sm:$0xff] %vm361_vm0, %v348_v56  ;;  %382 = vst.msk [vmem:[%s563_s27 + $0xa0] sm:$0xff] %vm361_vm0, %v349_v57  ;;  %v289_v7 = vadd.f32 %v541_v1, %v253_v60  ;;  %v290_v8 = vadd.f32 %v541_v1, %v254_v61  ;;  %v256_v10 = vmul.f32 %v526_v0, %v220_v54  ;;  %v324_v17 = vld [vmem:[%s536_s22 + $0xd8] sm:$0xff]  ;;  %v326_v24 = vld [vmem:[%s536_s22 + $0xe8] sm:$0xff] }
  0x27   : > { %v257_v11 = vmul.f32 %v526_v0, %v221_v55  ;;  %383 = vst.msk [vmem:[%s563_s27 + $0xa8] sm:$0xff] %vm361_vm0, %v350_v63  ;;  %v351_v14 = vadd.f32 %v319_v58, %v287_v2  ;;  %v352_v15 = vadd.f32 %v320_v59, %v288_v3  ;;  %v291_v16 = vadd.f32 %v541_v1, %v255_v6  ;;  %v327_v31 = vld [vmem:[%s536_s22 + $0xf0] sm:$0xff]  ;;  %v328_v32 = vld [vmem:[%s536_s22 + $0xf8] sm:$0xff] }
  0x28   : > { %v258_v19 = vmul.f32 %v526_v0, %v222_v62  ;;  %v353_v20 = vadd.f32 %v321_v4, %v289_v7  ;;  %v354_v21 = vadd.f32 %v322_v5, %v290_v8  ;;  %v292_v22 = vadd.f32 %v541_v1, %v256_v10 }
  0x29   : > { %v293_v23 = vadd.f32 %v541_v1, %v257_v11  ;;  %384 = vst.msk [vmem:[%s563_s27 + $0xb0] sm:$0xff] %vm361_vm0, %v351_v14  ;;  %385 = vst.msk [vmem:[%s563_s27 + $0xb8] sm:$0xff] %vm361_vm0, %v352_v15  ;;  %v355_v25 = vadd.f32 %v323_v9, %v291_v16  ;;  %v259_v27 = vmul.f32 %v526_v0, %v223_v12 }
  0x2a   : > { %v294_v26 = vadd.f32 %v541_v1, %v258_v19  ;;  %v260_v28 = vmul.f32 %v526_v0, %v224_v13  ;;  %386 = vst.msk [vmem:[%s563_s27 + $0xc0] sm:$0xff] %vm361_vm0, %v353_v20  ;;  %387 = vst.msk [vmem:[%s563_s27 + $0xc8] sm:$0xff] %vm361_vm0, %v354_v21  ;;  %v356_v29 = vadd.f32 %v324_v17, %v292_v22 }
  0x2b   : > { %v357_v30 = vadd.f32 %v325_v18, %v293_v23  ;;  %388 = vst.msk [vmem:[%s563_s27 + $0xd0] sm:$0xff] %vm361_vm0, %v355_v25  ;;  %v295_v34 = vadd.f32 %v541_v1, %v259_v27 }
  0x2c   : > { %v358_v33 = vadd.f32 %v326_v24, %v294_v26  ;;  %v296_v35 = vadd.f32 %v541_v1, %v260_v28  ;;  %389 = vst.msk [vmem:[%s563_s27 + $0xd8] sm:$0xff] %vm361_vm0, %v356_v29 }
  0x2d   : > { %390 = vst.msk [vmem:[%s563_s27 + $0xe0] sm:$0xff] %vm361_vm0, %v357_v30  ;;  %v359_v0 = vadd.f32 %v327_v31, %v295_v34 }
  0x2e   : > { %391 = vst.msk [vmem:[%s563_s27 + $0xe8] sm:$0xff] %vm361_vm0, %v358_v33  ;;  %v360_v36 = vadd.f32 %v328_v32, %v296_v35 }
  0x2f   : > { %392 = vst.msk [vmem:[%s563_s27 + $0xf0] sm:$0xff] %vm361_vm0, %v359_v0 }
  0x30   : > { %393 = vst.msk [vmem:[%s563_s27 + $0xf8] sm:$0xff] %vm361_vm0, %v360_v36 }
  0x31 PF: > { %s13_s12 = sadd.s32 1, %s493_s12  }
  0x32   : > { %p10_p4 = scmp.ge.s32.totalorder %s13_s12, 4  }
  0x34   :  { %12 = sbr.rel (!%p10_p4) target bundleno = 1 (0x1), region = 65 }

// kernel: basic_block_forward.3
= control target key start
LH: loop header
LB: loop body
LE: loop exit
PB: predicated region body
PF: predicated region fallthrough
CT: control target
= control target key end

     0   :  { %s3802_s12 = smov 0   ;;  %s4815_s0 = inlined_call_operand.vmem [shape: f32[2,16,16,4], index: 0, kind: input, shape index: {}]   ;;  %s4816_s1 = inlined_call_operand.vmem [shape: bf16[9,4,4], index: 1, kind: input, shape index: {}]   ;;  %s4817_s2 = inlined_call_operand.vmem [shape: f32[2,256,4], index: 2, kind: output, shape index: {0}]   ;;  %s4818_s3 = inlined_call_operand.vmem [shape: f32[2,2,4], index: 3, kind: output, shape index: {1}]  }
   0x1 LB: > { %s2871_s13 = sadd.s32 4294967295, %s3779_s12   ;;  %p2875_p0 = scmp.ge.s32.totalorder %s3779_s12, 1  ;;  %s3779_s12 = sphi %s3802_s12, %s14_s12  }
   0x2   : > { %p140_p1 = scmp.lt.s32.totalorder %s3779_s12, 3 }
   0x4   : > { %p141_p2 = pnand %p2875_p0, %p140_p1 }
   0x6   : > { %144 = sbr.rel (%p141_p2) target bundleno = 550 (0x226), region = 28 }
   0xd   : > { %v2881_v0 = vld [vmem:[%s4816_s1 + $0x2] sm:$0x3]  ;;  %vm612_vm0 = vcmask 1041408   ;;  %v3816_v1 = vld [vmem:[%s4816_s1 + $0x8] sm:$0x3]  ;;  %vm248_vm1 = vcmask 1040384  }
   0xe   : > { %4845 = vst [vmem:[#allocation2_spill] sm:$0xff] %v3816_v1  ;;  %3754 = vmatprep.subr.msk.bf16.mxu1 %vm612_vm0, %v2881_v0  ;;  %3758 = vmatprep.subr.msk.bf16.mxu0 %vm612_vm0, %v3816_v1  ;;  %v614_v2 = vsel %vm612_vm0, %v2881_v0, 0  ;;  %v3824_v3 = vsel %vm612_vm0, %v3816_v1, 0  ;;  %p168_p3 = scmp.lt.s32.totalorder %s2871_s13, 1  ;;  %v3781_v4 = vmov 0.0   ;;  %vm432_vm2 = vcmask 1046528  }
   0xf   : > { %4846 = vst [vmem:[#allocation3_spill] sm:$0xff] %v3824_v3  ;;  %3191 = vmatpush3.bf16.msra.mxu1 %v614_v2  ;;  %3327 = vmatpush3.bf16.msra.mxu0 %v3824_v3  ;;  %v3827_v5 = vrot.slane %v3781_v4, 7  ;;  %v399_v6 = vld [vmem:[%s4816_s1] sm:$0x3]  ;;  %v2965_v7 = vld [vmem:[%s4816_s1 + $0xa] sm:$0x3] }
  0x10   : > { %s4882_s13 = smov (!%p168_p3, %s2871_s13), 1  ;;  %3755 = vmatprep.subr.msk.bf16.mxu1 %vm612_vm0, %v399_v6  ;;  %3760 = vmatprep.subr.msk.bf16.mxu0 %vm612_vm0, %v2965_v7  ;;  %vm563_vm3 = vcmask 31744   ;;  %v2982_v36 = vld [vmem:[%s4816_s1 + $0xc] sm:$0x3]  ;;  %v826_v37 = vsel %vm612_vm0, %v399_v6, 0  ;;  %v1791_v44 = vsel %vm612_vm0, %v2965_v7, 0 }
  0x11   : > { %v3841_v8 = vsel %vm248_vm1, 0.0, %v3827_v5  ;;  %v3845_v9 = vsel %vm248_vm1, %v3827_v5, 0.0  ;;  %v434_v10 = vrot.slane %v3827_v5, 1  ;;  %s3035_s22 = sshll.u32 %s4882_s13, 8  ;;  %v3911_v53 = vsel %vm612_vm0, %v2982_v36, 0  ;;  %s2880_s14 = sshll.u32 %s4882_s13, 1 }
  0x12   : > { %v433_v11 = vrot.slane %v3841_v8, 1  ;;  %v436_v12 = vrot.slane %v3845_v9, 1  ;;  %s3856_s25 = scalar_lea.vmem %s4815_s0, %s3035_s22  ;;  %v3931_v63 = vld [vmem:[%s4816_s1 + $0x4] sm:$0x3]  ;;  %vm989_vm4 = vcmask 1045504   ;;  %s4669_s11 = scalar_lea.vmem %s4817_s2, %s3035_s22  ;;  %vm2783_vm5 = vcmask 25600  }
  0x13   : > { %v183_v15 = vld [vmem:[%s3856_s25] sm:$0xff]  ;;  %v184_v16 = vld [vmem:[%s3856_s25 + $0x8] sm:$0xff]  ;;  %v185_v17 = vld [vmem:[%s3856_s25 + $0x10] sm:$0xff]  ;;  %s181_s17 = scalar_lea.vmem %s4818_s3, %s2880_s14 }
  0x14   : > { %v435_v13 = vsel %vm432_vm2, %v433_v11, %v434_v10  ;;  %v437_v14 = vsel %vm432_vm2, %v434_v10, %v436_v12  ;;  %v251_v19 = vrot.slane %v183_v15, 7  ;;  %v252_v20 = vrot.slane %v184_v16, 7  ;;  %v186_v21 = vld [vmem:[%s3856_s25 + $0x18] sm:$0xff]  ;;  %v187_v23 = vld [vmem:[%s3856_s25 + $0x20] sm:$0xff]  ;;  %v188_v24 = vld [vmem:[%s3856_s25 + $0x28] sm:$0xff] }
  0x15   : > { %v3863_v18 = vpack.c.bf16 %v437_v14, %v435_v13  ;;  %v254_v22 = vrot.slane %v185_v17, 7  ;;  %v255_v25 = vrot.slane %v186_v21, 7  ;;  %v257_v26 = vrot.slane %v187_v23, 7  ;;  %v189_v45 = vld [vmem:[%s3856_s25 + $0x30] sm:$0xff]  ;;  %v190_v46 = vld [vmem:[%s3856_s25 + $0x38] sm:$0xff]  ;;  %v191_v50 = vld [vmem:[%s3856_s25 + $0x40] sm:$0xff] }
  0x16   : > { %v258_v27 = vrot.slane %v188_v24, 7  ;;  %v3871_v28 = vsel %vm248_vm1, %v251_v19, %v252_v20  ;;  %v3874_v29 = vsel %vm248_vm1, 0.0, %v251_v19  ;;  %v3877_v30 = vsel %vm248_vm1, %v252_v20, 0.0  ;;  %v192_v51 = vld [vmem:[%s3856_s25 + $0x48] sm:$0xff]  ;;  %v193_v52 = vld [vmem:[%s3856_s25 + $0x50] sm:$0xff]  ;;  %v194_v58 = vld [vmem:[%s3856_s25 + $0x58] sm:$0xff] }
  0x17   : > { %4847 = vst [vmem:[#allocation4_spill] sm:$0xff] %v3863_v18  ;;  %3192 = vmatprep.mubr.msk.bf16.mxu1 %vm563_vm3, %v3863_v18  ;;  %v3880_v31 = vsel %vm248_vm1, 0.0, %v254_v22  ;;  %v438_v32 = vrot.slane %v3874_v29, 1  ;;  %v439_v33 = vrot.slane %v3871_v28, 1  ;;  %v441_v34 = vrot.slane %v3877_v30, 1 }
  0x18   : > { %v3886_v35 = vsel %vm248_vm1, %v254_v22, %v255_v25  ;;  %v3893_v38 = vsel %vm248_vm1, %v255_v25, 0.0  ;;  %v443_v39 = vrot.slane %v3880_v31, 1  ;;  %v3905_v49 = vsel %vm248_vm1, %v257_v26, %v258_v27 }
  0x19   : > { %v444_v40 = vrot.slane %v3886_v35, 1  ;;  %v440_v41 = vsel %vm432_vm2, %v438_v32, %v439_v33  ;;  %v442_v42 = vsel %vm432_vm2, %v439_v33, %v441_v34  ;;  %v446_v43 = vrot.slane %v3893_v38, 1 }
  0x1a   : > { %v546_v47 = vpack.c.bf16 %v442_v42, %v440_v41  ;;  %v3915_v55 = vsel %vm248_vm1, 0.0, %v257_v26  ;;  %v3918_v56 = vsel %vm248_vm1, %v258_v27, 0.0  ;;  %v449_v57 = vrot.slane %v3905_v49, 1  ;;  %v195_v26 = vld [vmem:[%s3856_s25 + $0x60] sm:$0xff] }
  0x1b   : > { %v445_v48 = vsel %vm432_vm2, %v443_v39, %v444_v40  ;;  %v447_v54 = vsel %vm432_vm2, %v444_v40, %v446_v43  ;;  %v448_v60 = vrot.slane %v3915_v55, 1  ;;  %v451_v61 = vrot.slane %v3918_v56, 1  ;;  %v198_v39 = vld [vmem:[%s3856_s25 + $0x78] sm:$0xff] }
  0x1c   : > { %3193 = vmatmul.mubr.msk.bf16.vlgmr.msra.gmra.mrb[0].mxu1 %vm563_vm3, %v546_v47  ;;  %3328 = vmatprep.mubr.msk.bf16.mxu0 %vm563_vm3, %v546_v47  ;;  %v3924_v59 = vpack.c.bf16 %v447_v54, %v445_v48  ;;  %v260_v62 = vrot.slane %v189_v45, 7  ;;  %v261_v0 = vrot.slane %v190_v46, 7  ;;  %v263_v2 = vrot.slane %v191_v50, 7 }
  0x1d   : > { %3225 = vmatpush3.bf16.msra.mxu1 %v826_v37  ;;  %v264_v4 = vrot.slane %v192_v51, 7  ;;  %v266_v6 = vrot.slane %v193_v52, 7  ;;  %v450_v7 = vsel %vm432_vm2, %v448_v60, %v449_v57  ;;  %v452_v10 = vsel %vm432_vm2, %v449_v57, %v451_v61  ;;  %v197_v37 = vld [vmem:[%s3856_s25 + $0x70] sm:$0xff]  ;;  %v200_v61 = vld [vmem:[%s3856_s25 + $0x88] sm:$0xff] }
  0x1e   : > { %4848 = vst [vmem:[#allocation5_spill] sm:$0xff] %v3924_v59  ;;  %3329 = vmatmul.mubr.msk.bf16.vlgmr.msra.gmra.mrb[0].mxu0 %vm563_vm3, %v3924_v59  ;;  %3196 = vmatprep.mubr.msk.bf16.mxu1 %vm563_vm3, %v3924_v59  ;;  %v3940_v11 = vsel %vm248_vm1, 0.0, %v260_v62  ;;  %v267_v12 = vrot.slane %v194_v58, 7  ;;  %v3942_v13 = vpack.c.bf16 %v452_v10, %v450_v7  ;;  %v3945_v14 = vsel %vm248_vm1, %v260_v62, %v261_v0 }
  0x1f   : > { %3361 = vmatpush3.bf16.msra.mxu0 %v1791_v44  ;;  %v3948_v15 = vsel %vm248_vm1, %v261_v0, 0.0  ;;  %v453_v16 = vrot.slane %v3940_v11, 1  ;;  %3756 = vmatprep.subr.msk.bf16.mxu1 %vm612_vm0, %v3931_v63  ;;  %v454_v17 = vrot.slane %v3945_v14, 1  ;;  %v3956_v20 = vsel %vm248_vm1, %v263_v2, %v264_v4  ;;  %v199_v44 = vld [vmem:[%s3856_s25 + $0x80] sm:$0xff] }
  0x20   : > { %4849 = vst [vmem:[#allocation6_spill] sm:$0xff] %v3942_v13  ;;  %v456_v19 = vrot.slane %v3948_v15, 1  ;;  %v3959_v21 = vsel %vm248_vm1, 0.0, %v263_v2  ;;  %3761 = vmatprep.subr.msk.bf16.mxu0 %vm612_vm0, %v2982_v36  ;;  %3332 = vmatprep.mubr.msk.bf16.mxu0 %vm563_vm3, %v3942_v13  ;;  %v3965_v22 = vsel %vm248_vm1, %v264_v4, 0.0  ;;  %v459_v24 = vrot.slane %v3956_v20, 1  ;;  %v196_v36 = vld [vmem:[%s3856_s25 + $0x68] sm:$0xff] }
  0x21   : > { %v458_v23 = vrot.slane %v3959_v21, 1  ;;  %v3970_v25 = vsel %vm248_vm1, %v266_v6, %v267_v12  ;;  %v455_v27 = vsel %vm432_vm2, %v453_v16, %v454_v17  ;;  %v461_v33 = vrot.slane %v3965_v22, 1 }
  0x22   : > { %v457_v32 = vsel %vm432_vm2, %v454_v17, %v456_v19  ;;  %v3977_v34 = vsel %vm248_vm1, 0.0, %v266_v6  ;;  %v3986_v42 = vsel %vm248_vm1, %v267_v12, 0.0  ;;  %v464_v46 = vrot.slane %v3970_v25, 1 }
  0x23   : > { %v3982_v40 = vpack.c.bf16 %v457_v32, %v455_v27  ;;  %v460_v41 = vsel %vm432_vm2, %v458_v23, %v459_v24  ;;  %v463_v43 = vrot.slane %v3977_v34, 1  ;;  %v462_v45 = vsel %vm432_vm2, %v459_v24, %v461_v33 }
  0x24   : > { %3197 = vmatmul.mubr.msk.bf16.gmra.mrb[4].mxu1 %vm563_vm3, %v3942_v13  ;;  %v466_v47 = vrot.slane %v3986_v42, 1  ;;  %v269_v48 = vrot.slane %v195_v26, 7  ;;  %v3997_v50 = vpack.c.bf16 %v462_v45, %v460_v41  ;;  %v270_v51 = vrot.slane %v196_v36, 7 }
  0x25   : > { %4850 = vst [vmem:[#allocation7_spill] sm:$0xff] %v3982_v40  ;;  %3200 = vmatprep.mubr.msk.bf16.mxu1 %vm563_vm3, %v3982_v40  ;;  %v272_v52 = vrot.slane %v197_v37, 7  ;;  %v273_v54 = vrot.slane %v198_v39, 7  ;;  %v465_v57 = vsel %vm432_vm2, %v463_v43, %v464_v46  ;;  %v275_v62 = vrot.slane %v199_v44, 7 }
  0x26   : > { %4851 = vst [vmem:[#allocation8_spill] sm:$0xff] %v3997_v50  ;;  %3333 = vmatmul.mubr.msk.bf16.gmra.mrb[4].mxu0 %vm563_vm3, %v3982_v40  ;;  %v467_v58 = vsel %vm432_vm2, %v464_v46, %v466_v47  ;;  %v4004_v60 = vsel %vm248_vm1, 0.0, %v269_v48  ;;  %v4012_v2 = vsel %vm248_vm1, %v269_v48, %v270_v51  ;;  %v4015_v4 = vsel %vm248_vm1, %v270_v51, 0.0 }
  0x27   : > { %3336 = vmatprep.mubr.msk.bf16.mxu0 %vm563_vm3, %v3997_v50  ;;  %v4009_v0 = vpack.c.bf16 %v467_v58, %v465_v57  ;;  %v468_v6 = vrot.slane %v4004_v60, 1  ;;  %v469_v7 = vrot.slane %v4012_v2, 1  ;;  %v471_v10 = vrot.slane %v4015_v4, 1  ;;  %v203_v57 = vld [vmem:[%s3856_s25 + $0xa0] sm:$0xff] }
  0x28   : > { %v4021_v12 = vsel %vm248_vm1, %v272_v52, %v273_v54  ;;  %v4024_v16 = vsel %vm248_vm1, 0.0, %v272_v52  ;;  %v4027_v17 = vsel %vm248_vm1, %v273_v54, 0.0  ;;  %v276_v24 = vrot.slane %v200_v61, 7  ;;  %v201_v52 = vld [vmem:[%s3856_s25 + $0x90] sm:$0xff]  ;;  %v202_v54 = vld [vmem:[%s3856_s25 + $0x98] sm:$0xff] }
  0x29   : > { %4852 = vst [vmem:[#allocation9_spill] sm:$0xff] %v4009_v0  ;;  %v473_v19 = vrot.slane %v4024_v16, 1  ;;  %v474_v23 = vrot.slane %v4021_v12, 1  ;;  %v470_v26 = vsel %vm432_vm2, %v468_v6, %v469_v7  ;;  %v472_v27 = vsel %vm432_vm2, %v469_v7, %v471_v10  ;;  %v204_v7 = vld [vmem:[%s3856_s25 + $0xa8] sm:$0xff] }
  0x2a   : > { %v476_v32 = vrot.slane %v4027_v17, 1  ;;  %v4035_v33 = vsel %vm248_vm1, 0.0, %v275_v62  ;;  %v4037_v36 = vpack.c.bf16 %v472_v27, %v470_v26  ;;  %v4041_v39 = vsel %vm248_vm1, %v275_v62, %v276_v24 }
  0x2b   : > { %v475_v37 = vsel %vm432_vm2, %v473_v19, %v474_v23  ;;  %v4044_v41 = vsel %vm248_vm1, %v276_v24, 0.0  ;;  %v478_v44 = vrot.slane %v4035_v33, 1  ;;  %v479_v45 = vrot.slane %v4041_v39, 1 }
  0x2c   : > { %4853 = vst [vmem:[#allocation10_spill] sm:$0xff] %v4037_v36  ;;  %3201 = vmatmul.mubr.msk.bf16.gmra.mrb[8].mxu1 %vm563_vm3, %v3997_v50  ;;  %v477_v43 = vsel %vm432_vm2, %v474_v23, %v476_v32  ;;  %v481_v46 = vrot.slane %v4044_v41, 1  ;;  %v995_v47 = vrot.slane %v3874_v29, 2  ;;  %v996_v48 = vrot.slane %v3871_v28, 2 }
  0x2d   : > { %3204 = vmatprep.mubr.msk.bf16.mxu1 %vm563_vm3, %v4009_v0  ;;  %v998_v51 = vrot.slane %v3877_v30, 2  ;;  %v1000_v58 = vrot.slane %v3880_v31, 2  ;;  %v1001_v61 = vrot.slane %v3886_v35, 2  ;;  %v1003_v62 = vrot.slane %v3893_v38, 2 }
  0x2e   : > { %3337 = vmatmul.mubr.msk.bf16.gmra.mrb[8].mxu0 %vm563_vm3, %v4009_v0  ;;  %v4065_v6 = vpack.c.bf16 %v477_v43, %v475_v37  ;;  %v480_v30 = vsel %vm432_vm2, %v478_v44, %v479_v45  ;;  %v482_v10 = vsel %vm432_vm2, %v479_v45, %v481_v46  ;;  %v997_v19 = vsel %vm989_vm4, %v995_v47, %v996_v48 }
  0x2f   : > { %3340 = vmatprep.mubr.msk.bf16.mxu0 %vm563_vm3, %v4037_v36  ;;  %v999_v23 = vsel %vm989_vm4, %v996_v48, %v998_v51  ;;  %v278_v38 = vrot.slane %v201_v52, 7  ;;  %v279_v26 = vrot.slane %v202_v54, 7  ;;  %v281_v27 = vrot.slane %v203_v57, 7 }
  0x30   : > { %4854 = vst [vmem:[#allocation11_spill] sm:$0xff] %v4065_v6  ;;  %v4074_v24 = vpack.c.bf16 %v999_v23, %v997_v19  ;;  %v282_v32 = vrot.slane %v204_v7, 7  ;;  %v1005_v37 = vrot.slane %v3915_v55, 2  ;;  %v1006_v43 = vrot.slane %v3905_v49, 2  ;;  %v205_v23 = vld [vmem:[%s3856_s25 + $0xb0] sm:$0xff] }
  0x31   : > { %v1008_v18 = vrot.slane %v3918_v56, 2  ;;  %v4080_v44 = vsel %vm248_vm1, %v278_v38, %v279_v26  ;;  %v4083_v45 = vsel %vm248_vm1, 0.0, %v278_v38  ;;  %v4086_v46 = vsel %vm248_vm1, %v279_v26, 0.0 }
  0x32   : > { %v4089_v47 = vsel %vm248_vm1, 0.0, %v281_v27  ;;  %v483_v48 = vrot.slane %v4083_v45, 1  ;;  %v484_v51 = vrot.slane %v4080_v44, 1  ;;  %v486_v56 = vrot.slane %v4086_v46, 1 }
  0x33   : > { %v4095_v52 = vsel %vm248_vm1, %v281_v27, %v282_v32  ;;  %v1002_v54 = vsel %vm989_vm4, %v1000_v58, %v1001_v61  ;;  %v1004_v57 = vsel %vm989_vm4, %v1001_v61, %v1003_v62  ;;  %v4102_v7 = vsel %vm248_vm1, %v282_v32, 0.0  ;;  %v206_v58 = vld [vmem:[%s3856_s25 + $0xb8] sm:$0xff]  ;;  %v208_v61 = vld [vmem:[%s3856_s25 + $0xc8] sm:$0xff] }
  0x34   : > { %3205 = vmatmul.mubr.msk.bf16.gmra.mrb[12].mxu1 %vm563_vm3, %v4037_v36  ;;  %v488_v19 = vrot.slane %v4089_v47, 1  ;;  %v485_v38 = vsel %vm432_vm2, %v483_v48, %v484_v51  ;;  %v487_v26 = vsel %vm432_vm2, %v484_v51, %v486_v56  ;;  %v489_v27 = vrot.slane %v4095_v52, 1  ;;  %v207_v36 = vld [vmem:[%s3856_s25 + $0xc0] sm:$0xff] }
  0x35   : > { %3208 = vmatprep.mubr.msk.bf16.mxu1 %vm563_vm3, %v4065_v6  ;;  %v491_v3 = vrot.slane %v4102_v7, 1  ;;  %v4117_v62 = vpack.c.bf16 %v482_v10, %v480_v30  ;;  %v1007_v32 = vsel %vm989_vm4, %v1005_v37, %v1006_v43  ;;  %v1009_v0 = vsel %vm989_vm4, %v1006_v43, %v1008_v18 }
  0x36   : > { %3341 = vmatmul.mubr.msk.bf16.gmra.mrb[12].mxu0 %vm563_vm3, %v4065_v6  ;;  %v1010_v48 = vrot.slane %v3940_v11, 2  ;;  %v4124_v51 = vpack.c.bf16 %v1004_v57, %v1002_v54  ;;  %v1011_v56 = vrot.slane %v3945_v14, 2  ;;  %v1013_v50 = vrot.slane %v3948_v15, 2 }
  0x37   : > { %4855 = vst [vmem:[#allocation12_spill] sm:$0xff] %v4117_v62  ;;  %3362 = vmatprep.mubr.msk.bf16.mxu0 %vm563_vm3, %v4074_v24  ;;  %v284_v40 = vrot.slane %v205_v23, 7  ;;  %v4128_v13 = vpack.c.bf16 %v487_v26, %v485_v38  ;;  %v285_v30 = vrot.slane %v206_v58, 7  ;;  %v287_v10 = vrot.slane %v207_v36, 7 }
  0x38   : > { %4856 = vst [vmem:[#allocation13_spill] sm:$0xff] %v4124_v51  ;;  %v288_v6 = vrot.slane %v208_v61, 7  ;;  %v490_v37 = vsel %vm432_vm2, %v488_v19, %v489_v27  ;;  %v492_v18 = vsel %vm432_vm2, %v489_v27, %v491_v3  ;;  %v4132_v43 = vpack.c.bf16 %v1009_v0, %v1007_v32  ;;  %v209_v32 = vld [vmem:[%s3856_s25 + $0xd0] sm:$0xff] }
  0x39   : > { %4857 = vst [vmem:[#allocation14_spill] sm:$0xff] %v4128_v13  ;;  %v4135_v59 = vsel %vm248_vm1, 0.0, %v284_v40  ;;  %v1012_v54 = vsel %vm989_vm4, %v1010_v48, %v1011_v56  ;;  %v4139_v57 = vsel %vm248_vm1, %v284_v40, %v285_v30  ;;  %v4142_v15 = vsel %vm248_vm1, %v285_v30, 0.0  ;;  %v210_v48 = vld [vmem:[%s3856_s25 + $0xd8] sm:$0xff] }
  0x3a   : > { %4858 = vst [vmem:[#allocation15_spill] sm:$0xff] %v4132_v43  ;;  %v493_v36 = vrot.slane %v4135_v59, 1  ;;  %v1014_v19 = vsel %vm989_vm4, %v1011_v56, %v1013_v50  ;;  %v494_v3 = vrot.slane %v4139_v57, 1  ;;  %v496_v0 = vrot.slane %v4142_v15, 1  ;;  %v4171_v56 = vld [vmem:[%s4816_s1 + $0xe] sm:$0x3] }
  0x3b   : > { %v1015_v23 = vrot.slane %v3959_v21, 2  ;;  %v4152_v40 = vsel %vm248_vm1, %v287_v10, %v288_v6  ;;  %v4155_v38 = vsel %vm248_vm1, 0.0, %v287_v10  ;;  %v4158_v26 = vsel %vm248_vm1, %v288_v6, 0.0  ;;  %v211_v10 = vld [vmem:[%s3856_s25 + $0xe0] sm:$0xff] }
  0x3c   : > { %3209 = vmatmul.mubr.msk.bf16.gmra.mrb[16].mxu1 %vm563_vm3, %v4117_v62  ;;  %v1016_v50 = vrot.slane %v3956_v20, 2  ;;  %v495_v27 = vsel %vm432_vm2, %v493_v36, %v494_v3  ;;  %v497_v58 = vsel %vm432_vm2, %v494_v3, %v496_v0  ;;  %v1018_v61 = vrot.slane %v3965_v22, 2  ;;  %v212_v36 = vld [vmem:[%s3856_s25 + $0xe8] sm:$0xff] }
  0x3d   : > { %3212 = vmatprep.mubr.msk.bf16.mxu1 %vm563_vm3, %v4128_v13  ;;  %v4175_v6 = vpack.c.bf16 %v492_v18, %v490_v37  ;;  %v4177_v30 = vpack.c.bf16 %v1014_v19, %v1012_v54  ;;  %v4184_v22 = vpack.c.bf16 %v497_v58, %v495_v27  ;;  %v498_v3 = vrot.slane %v4155_v38, 1 }
  0x3e   : > { %3363 = vmatmul.mubr.msk.bf16.vlgmr.msra.gmra.mrb[0].mxu0 %vm563_vm3, %v4124_v51  ;;  %v499_v0 = vrot.slane %v4152_v40, 1  ;;  %v501_v13 = vrot.slane %v4158_v26, 1  ;;  %v1017_v37 = vsel %vm989_vm4, %v1015_v23, %v1016_v50  ;;  %v1019_v18 = vsel %vm989_vm4, %v1016_v50, %v1018_v61 }
  0x3f   : > { %4859 = vst [vmem:[#allocation16_spill] sm:$0xff] %v4175_v6  ;;  %4860 = vst [vmem:[#allocation17_spill] sm:$0xff] %v4177_v30  ;;  %3395 = vmatpush3.bf16.msra.mxu0 %v3911_v53  ;;  %3366 = vmatprep.mubr.msk.bf16.mxu0 %vm563_vm3, %v4132_v43  ;;  %v290_v54 = vrot.slane %v209_v32, 7  ;;  %v291_v19 = vrot.slane %v210_v48, 7  ;;  %v1020_v53 = vrot.slane %v3977_v34, 2  ;;  %v1021_v27 = vrot.slane %v3970_v25, 2 }
  0x40   : > { %4861 = vst [vmem:[#allocation18_spill] sm:$0xff] %v4184_v22  ;;  %3762 = vmatprep.subr.msk.bf16.mxu0 %vm612_vm0, %v4171_v56  ;;  %v293_v58 = vrot.slane %v211_v10, 7  ;;  %v294_v62 = vrot.slane %v212_v36, 7  ;;  %v1023_v43 = vrot.slane %v3986_v42, 2  ;;  %v4205_v61 = vpack.c.bf16 %v1019_v18, %v1017_v37 }
  0x41   : > { %v4197_v1 = vsel %vm248_vm1, %v290_v54, %v291_v19  ;;  %v4200_v23 = vsel %vm248_vm1, 0.0, %v290_v54  ;;  %v4203_v50 = vsel %vm248_vm1, %v291_v19, 0.0  ;;  %v500_v42 = vsel %vm432_vm2, %v498_v3, %v499_v0 }
  0x42   : > { %4862 = vst [vmem:[#allocation19_spill] sm:$0xff] %v4205_v61  ;;  %v503_v32 = vrot.slane %v4200_v23, 1  ;;  %v504_v48 = vrot.slane %v4197_v1, 1  ;;  %v506_v10 = vrot.slane %v4203_v50, 1  ;;  %v1025_v36 = vrot.slane %v4004_v60, 2 }
  0x43   : > { %v502_v54 = vsel %vm432_vm2, %v499_v0, %v501_v13  ;;  %v4218_v37 = vsel %vm248_vm1, %v293_v58, %v294_v62  ;;  %v4221_v18 = vsel %vm248_vm1, 0.0, %v293_v58  ;;  %v4224_v19 = vsel %vm248_vm1, %v294_v62, 0.0 }
  0x44   : > { %3213 = vmatmul.mubr.msk.bf16.gmra.mrb[20].mxu1 %vm563_vm3, %v4175_v6  ;;  %v505_v3 = vsel %vm432_vm2, %v503_v32, %v504_v48  ;;  %v507_v6 = vsel %vm432_vm2, %v504_v48, %v506_v10  ;;  %v1028_v13 = vrot.slane %v4015_v4, 2  ;;  %v1022_v0 = vsel %vm989_vm4, %v1020_v53, %v1021_v27 }
  0x45   : > { %3216 = vmatprep.mubr.msk.bf16.mxu1 %vm563_vm3, %v4184_v22  ;;  %v1026_v22 = vrot.slane %v4012_v2, 2  ;;  %v1024_v58 = vsel %vm989_vm4, %v1021_v27, %v1023_v43  ;;  %v4236_v62 = vpack.c.bf16 %v502_v54, %v500_v42  ;;  %v4242_v32 = vpack.c.bf16 %v3871_v28, %v3874_v29 }
  0x46   : > { %3367 = vmatmul.mubr.msk.bf16.gmra.mrb[4].mxu0 %vm563_vm3, %v4177_v30  ;;  %v4244_v48 = vpack.c.bf16 %v507_v6, %v505_v3  ;;  %v508_v4 = vrot.slane %v4221_v18, 1  ;;  %v509_v10 = vrot.slane %v4218_v37, 1  ;;  %v511_v53 = vrot.slane %v4224_v19, 1 }
  0x47   : > { %3370 = vmatprep.mubr.msk.bf16.mxu0 %vm563_vm3, %v4205_v61  ;;  %v1027_v51 = vsel %vm989_vm4, %v1025_v36, %v1026_v22  ;;  %v1029_v30 = vsel %vm989_vm4, %v1026_v22, %v1028_v13  ;;  %v4249_v61 = vpack.c.bf16 %v1024_v58, %v1022_v0  ;;  %v1030_v43 = vrot.slane %v4024_v16, 2 }
  0x48   : > { %v1031_v27 = vrot.slane %v4021_v12, 2  ;;  %v4253_v42 = vpack.c.bf16 %v1029_v30, %v1027_v51  ;;  %v1033_v22 = vrot.slane %v4027_v17, 2  ;;  %v4258_v28 = vpack.c.bf16 %v3886_v35, %v3880_v31 }
  0x49   : > { %v4262_v29 = vpack.c.bf16 %v3905_v49, %v3915_v55  ;;  %v1035_v6 = vrot.slane %v4035_v33, 2  ;;  %v1036_v36 = vrot.slane %v4041_v39, 2  ;;  %v1038_v51 = vrot.slane %v4044_v41, 2 }
  0x4a   : > { %v510_v17 = vsel %vm432_vm2, %v508_v4, %v509_v10  ;;  %v512_v31 = vsel %vm432_vm2, %v509_v10, %v511_v53  ;;  %v1032_v35 = vsel %vm989_vm4, %v1030_v43, %v1031_v27  ;;  %v1034_v49 = vsel %vm989_vm4, %v1031_v27, %v1033_v22 }
  0x4b   : > { %v4281_v55 = vpack.c.bf16 %v3945_v14, %v3940_v11  ;;  %v4285_v41 = vpack.c.bf16 %v3956_v20, %v3959_v21  ;;  %v4287_v30 = vpack.c.bf16 %v512_v31, %v510_v17  ;;  %v1037_v54 = vsel %vm989_vm4, %v1035_v6, %v1036_v36  ;;  %v4373_v31 = vld [vmem:[%s4816_s1 + $0x6] sm:$0x3] }
  0x4c   : > { %3217 = vmatmul.mubr.msk.bf16.gmra.mrb[24].mxu1 %vm563_vm3, %v4236_v62  ;;  %v1039_v3 = vsel %vm989_vm4, %v1036_v36, %v1038_v51  ;;  %v4293_v13 = vpack.c.bf16 %v3827_v5, %v3841_v8  ;;  %v4295_v0 = vpack.c.bf16 %v1034_v49, %v1032_v35  ;;  %v1040_v58 = vrot.slane %v4083_v45, 2  ;;  %v213_v49 = vld [vmem:[%s3856_s25 + $0xf0] sm:$0xff] }
  0x4d   : > { %3220 = vmatprep.mubr.msk.bf16.mxu1 %vm563_vm3, %v4244_v48  ;;  %v4300_v11 = vpack.c.bf16 %v3970_v25, %v3977_v34  ;;  %v4302_v14 = vpack.c.bf16 %v1039_v3, %v1037_v54  ;;  %v1041_v20 = vrot.slane %v4080_v44, 2  ;;  %v1043_v21 = vrot.slane %v4086_v46, 2  ;;  %v214_v54 = vld [vmem:[%s3856_s25 + $0xf8] sm:$0xff] }
  0x4e   : > { %3371 = vmatmul.mubr.msk.bf16.gmra.mrb[8].mxu0 %vm563_vm3, %v4249_v61  ;;  %v4308_v4 = vpack.c.bf16 %v4012_v2, %v4004_v60  ;;  %v1045_v10 = vrot.slane %v4089_v47, 2  ;;  %v1046_v53 = vrot.slane %v4095_v52, 2  ;;  %v1048_v25 = vrot.slane %v4102_v7, 2 }
  0x4f   : > { %3374 = vmatprep.mubr.msk.bf16.mxu0 %vm563_vm3, %v4253_v42  ;;  %v4319_v34 = vpack.c.bf16 %v4021_v12, %v4024_v16  ;;  %v4325_v60 = vpack.c.bf16 %v4041_v39, %v4035_v33  ;;  %v4329_v2 = vpack.c.bf16 %v4080_v44, %v4083_v45  ;;  %v990_v46 = vrot.slane %v3841_v8, 2 }
  0x50   : > { %v1042_v7 = vsel %vm989_vm4, %v1040_v58, %v1041_v20  ;;  %v1044_v12 = vsel %vm989_vm4, %v1041_v20, %v1043_v21  ;;  %v993_v16 = vrot.slane %v3845_v9, 2  ;;  %v1047_v43 = vsel %vm989_vm4, %v1045_v10, %v1046_v53 }
  0x51   : > { %v1049_v33 = vsel %vm989_vm4, %v1046_v53, %v1048_v25  ;;  %v4341_v39 = vpack.c.bf16 %v4095_v52, %v4089_v47  ;;  %v4345_v8 = vpack.c.bf16 %v4139_v57, %v4135_v59  ;;  %v4349_v44 = vpack.c.bf16 %v4152_v40, %v4155_v38 }
  0x52   : > { %v4353_v45 = vpack.c.bf16 %v4197_v1, %v4200_v23  ;;  %v4357_v9 = vpack.c.bf16 %v4218_v37, %v4221_v18  ;;  %v1169_v47 = vsel %vm612_vm0, %v3931_v63, 0  ;;  %v4361_v52 = vpack.c.bf16 %v1044_v12, %v1042_v7 }
  0x53   : > { %v1050_v27 = vrot.slane %v4135_v59, 2  ;;  %v991_v22 = vrot.slane %v3827_v5, 2  ;;  %v4365_v6 = vpack.c.bf16 %v1049_v33, %v1047_v43  ;;  %v1051_v36 = vrot.slane %v4139_v57, 2 }
  0x54   : > { %3221 = vmatmul.mubr.msk.bf16.gmra.mrb[28].mxu1 %vm563_vm3, %v4287_v30  ;;  %v1053_v51 = vrot.slane %v4142_v15, 2  ;;  %v1055_v17 = vrot.slane %v4155_v38, 2  ;;  %v1056_v5 = vrot.slane %v4152_v40, 2  ;;  %v1058_v59 = vrot.slane %v4158_v26, 2 }
  0x55   : > { %3226 = vmatprep.mubr.msk.bf16.mxu1 %vm563_vm3, %v4293_v13  ;;  %v992_v63 = vsel %vm989_vm4, %v990_v46, %v991_v22  ;;  %v994_v57 = vsel %vm989_vm4, %v991_v22, %v993_v16  ;;  %v1052_v40 = vsel %vm989_vm4, %v1050_v27, %v1051_v36  ;;  %v1060_v58 = vrot.slane %v4200_v23, 2 }
  0x56   : > { %3375 = vmatmul.mubr.msk.bf16.gmra.mrb[12].mxu0 %vm563_vm3, %v4295_v0  ;;  %v4383_v15 = vpack.c.bf16 %v994_v57, %v992_v63  ;;  %v1054_v38 = vsel %vm989_vm4, %v1051_v36, %v1053_v51  ;;  %v1057_v26 = vsel %vm989_vm4, %v1055_v17, %v1056_v5  ;;  %v1059_v35 = vsel %vm989_vm4, %v1056_v5, %v1058_v59 }
  0x57   : > { %3378 = vmatprep.mubr.msk.bf16.mxu0 %vm563_vm3, %v4302_v14  ;;  %v4397_v3 = vpack.c.bf16 %v1054_v38, %v1052_v40  ;;  %v1061_v20 = vrot.slane %v4197_v1, 2  ;;  %v4401_v21 = vpack.c.bf16 %v1059_v35, %v1057_v26  ;;  %v1063_v10 = vrot.slane %v4203_v50, 2  ;;  %v3016_v35 = vld [vmem:[%s4816_s1 + $0x10] sm:$0x3] }
  0x58   : > { %v1065_v53 = vrot.slane %v4221_v18, 2  ;;  %v1066_v25 = vrot.slane %v4218_v37, 2  ;;  %v1068_v46 = vrot.slane %v4224_v19, 2  ;;  %v296_v7 = vrot.slane %v213_v49, 7  ;;  %v4863_v49 = vld [vmem:[#allocation13_spill] sm:$0xff] }
  0x59   : > { %v297_v12 = vrot.slane %v214_v54, 7  ;;  %v1062_v1 = vsel %vm989_vm4, %v1060_v58, %v1061_v20  ;;  %v1064_v23 = vsel %vm989_vm4, %v1061_v20, %v1063_v10  ;;  %v2187_v26 = vsel %vm612_vm0, %v4171_v56, 0  ;;  %v4864_v54 = vld [vmem:[#allocation2_spill] sm:$0xff]  ;;  %v4865_v58 = vld [vmem:[#allocation15_spill] sm:$0xff]  ;;  %v4868_v10 = vld [vmem:[#allocation5_spill] sm:$0xff] }
  0x5a   : > { %v1067_v50 = vsel %vm989_vm4, %v1065_v53, %v1066_v25  ;;  %v1069_v37 = vsel %vm989_vm4, %v1066_v25, %v1068_v46  ;;  %v365_v19 = vsel %vm248_vm1, 0.0, %v296_v7  ;;  %v4422_v43 = vpack.c.bf16 %v1064_v23, %v1062_v1  ;;  %v4867_v20 = vld [vmem:[#allocation19_spill] sm:$0xff]  ;;  %v4869_v25 = vld [vmem:[#allocation6_spill] sm:$0xff]  ;;  %v4875_v23 = vld [vmem:[#allocation12_spill] sm:$0xff] }
  0x5b   : > { %v298_v18 = vsel %vm248_vm1, %v296_v7, %v297_v12  ;;  %v382_v16 = vsel %vm248_vm1, %v297_v12, 0.0  ;;  %v4424_v33 = vpack.c.bf16 %v1069_v37, %v1067_v50  ;;  %v1568_v17 = vrot.slane %v365_v19, 1  ;;  %v4870_v46 = vld [vmem:[#allocation7_spill] sm:$0xff]  ;;  %v4872_v7 = vld [vmem:[#allocation9_spill] sm:$0xff]  ;;  %v4873_v12 = vld [vmem:[#allocation10_spill] sm:$0xff] }
  0x5c   : > { %3227 = vmatmul.mubr.msk.bf16.vlgmr.msra.gmra.mrb[0].mxu1 %vm563_vm3, %v4242_v32  ;;  %v1778_v27 = vrot.slane %v298_v18, 2  ;;  %v1780_v22 = vrot.slane %v382_v16, 2  ;;  %v1569_v5 = vrot.slane %v298_v18, 1  ;;  %v1571_v59 = vrot.slane %v382_v16, 1  ;;  %v4874_v1 = vld [vmem:[#allocation11_spill] sm:$0xff]  ;;  %v4876_v50 = vld [vmem:[#allocation14_spill] sm:$0xff] }
  0x5d   : > { %3259 = vmatpush3.bf16.msra.mxu1 %v1169_v47  ;;  %3230 = vmatprep.mubr.msk.bf16.mxu1 %vm563_vm3, %v4258_v28  ;;  %v1777_v47 = vrot.slane %v365_v19, 2  ;;  %v1371_v56 = vsel %vm612_vm0, %v4373_v31, 0  ;;  %v2385_v53 = vsel %vm612_vm0, %v3016_v35, 0  ;;  %v4877_v37 = vld [vmem:[#allocation3_spill] sm:$0xff] }
  0x5e   : > { %3379 = vmatmul.mubr.msk.bf16.gmra.mrb[16].mxu0 %vm563_vm3, %v4361_v52  ;;  %3757 = vmatprep.subr.msk.bf16.mxu1 %vm612_vm0, %v4373_v31  ;;  %v1781_v51 = vsel %vm989_vm4, %v1778_v27, %v1780_v22  ;;  %v1570_v57 = vsel %vm432_vm2, %v1568_v17, %v1569_v5  ;;  %v1572_v40 = vsel %vm432_vm2, %v1569_v5, %v1571_v59  ;;  %v4866_v31 = vld [vmem:[#allocation17_spill] sm:$0xff] }
  0x5f   : > { %3382 = vmatprep.mubr.msk.bf16.mxu0 %vm563_vm3, %v4365_v6  ;;  %v1779_v36 = vsel %vm989_vm4, %v1777_v47, %v1778_v27  ;;  %v4440_v38 = vpack.c.bf16 %v1572_v40, %v1570_v57 }
  0x60   : > { %v4436_v63 = vpack.c.bf16 %v1781_v51, %v1779_v36 }
  0x64   : > { %3231 = vmatmul.mubr.msk.bf16.gmra.mrb[4].mxu1 %vm563_vm3, %v4262_v29 }
  0x65   : > { %3234 = vmatprep.mubr.msk.bf16.mxu1 %vm563_vm3, %v4281_v55 }
  0x66   : > { %3383 = vmatmul.mubr.msk.bf16.gmra.mrb[20].mxu0 %vm563_vm3, %v4397_v3 }
  0x67   : > { %3386 = vmatprep.mubr.msk.bf16.mxu0 %vm563_vm3, %v4401_v21 }
  0x6c   : > { %3235 = vmatmul.mubr.msk.bf16.gmra.mrb[8].mxu1 %vm563_vm3, %v4285_v41 }
  0x6d   : > { %3238 = vmatprep.mubr.msk.bf16.mxu1 %vm563_vm3, %v4300_v11 }
  0x6e   : > { %3387 = vmatmul.mubr.msk.bf16.gmra.mrb[24].mxu0 %vm563_vm3, %v4422_v43 }
  0x6f   : > { %3390 = vmatprep.mubr.msk.bf16.mxu0 %vm563_vm3, %v4424_v33 }
  0x74   : > { %3239 = vmatmul.mubr.msk.bf16.gmra.mrb[12].mxu1 %vm563_vm3, %v4308_v4 }
  0x75   : > { %3242 = vmatprep.mubr.msk.bf16.mxu1 %vm563_vm3, %v4319_v34 }
  0x76   : > { %3391 = vmatmul.mubr.msk.bf16.gmra.mrb[28].mxu0 %vm563_vm3, %v4436_v63 }
  0x77   : > { %3396 = vmatprep.mubr.msk.bf16.mxu0 %vm563_vm3, %v4258_v28 }
  0x7c   : > { %3243 = vmatmul.mubr.msk.bf16.gmra.mrb[16].mxu1 %vm563_vm3, %v4325_v60 }
  0x7d   : > { %3246 = vmatprep.mubr.msk.bf16.mxu1 %vm563_vm3, %v4329_v2 }
  0x7e   : > { %3397 = vmatmul.mubr.msk.bf16.vlgmr.msra.gmra.mrb[0].mxu0 %vm563_vm3, %v4262_v29 }
  0x7f   : > { %3429 = vmatpush3.bf16.msra.mxu0 %v2187_v26  ;;  %3400 = vmatprep.mubr.msk.bf16.mxu0 %vm563_vm3, %v4281_v55 }
  0x80   : > { %3763 = vmatprep.subr.msk.bf16.mxu0 %vm612_vm0, %v3016_v35 }
  0x84   : > { %3247 = vmatmul.mubr.msk.bf16.gmra.mrb[20].mxu1 %vm563_vm3, %v4341_v39 }
  0x85   : > { %3250 = vmatprep.mubr.msk.bf16.mxu1 %vm563_vm3, %v4345_v8 }
  0x86   : > { %3401 = vmatmul.mubr.msk.bf16.gmra.mrb[4].mxu0 %vm563_vm3, %v4285_v41 }
  0x87   : > { %3404 = vmatprep.mubr.msk.bf16.mxu0 %vm563_vm3, %v4300_v11 }
  0x8c   : > { %3251 = vmatmul.mubr.msk.bf16.gmra.mrb[24].mxu1 %vm563_vm3, %v4349_v44 }
  0x8d   : > { %3254 = vmatprep.mubr.msk.bf16.mxu1 %vm563_vm3, %v4353_v45 }
  0x8e   : > { %3405 = vmatmul.mubr.msk.bf16.gmra.mrb[8].mxu0 %vm563_vm3, %v4308_v4 }
  0x8f   : > { %3408 = vmatprep.mubr.msk.bf16.mxu0 %vm563_vm3, %v4319_v34 }
  0x94   : > { %3255 = vmatmul.mubr.msk.bf16.gmra.mrb[28].mxu1 %vm563_vm3, %v4357_v9 }
  0x95   : > { %3260 = vmatprep.mubr.msk.bf16.mxu1 %vm563_vm3, %v4383_v15 }
  0x96   : > { %3409 = vmatmul.mubr.msk.bf16.gmra.mrb[12].mxu0 %vm563_vm3, %v4325_v60 }
  0x97   : > { %3412 = vmatprep.mubr.msk.bf16.mxu0 %vm563_vm3, %v4329_v2 }
  0x9c   : > { %3261 = vmatmul.mubr.msk.bf16.vlgmr.msra.gmra.mrb[0].mxu1 %vm563_vm3, %v4074_v24  ;;  %v1364_v24 = vpack.c.bf16 %v298_v18, %v365_v19  ;;  %v4878_v18 = vld [vmem:[#allocation16_spill] sm:$0xff]  ;;  %v4879_v19 = vld [vmem:[#allocation18_spill] sm:$0xff] }
  0x9d   : > { %3293 = vmatpush3.bf16.msra.mxu1 %v1371_v56  ;;  %3264 = vmatprep.mubr.msk.bf16.mxu1 %vm563_vm3, %v4863_v49 }
  0x9e   : > { %3413 = vmatmul.mubr.msk.bf16.gmra.mrb[16].mxu0 %vm563_vm3, %v4341_v39  ;;  %3759 = vmatprep.subr.msk.bf16.mxu1 %vm612_vm0, %v4864_v54 }
  0x9f   : > { %3416 = vmatprep.mubr.msk.bf16.mxu0 %vm563_vm3, %v4345_v8 }
  0xa4   : > { %3265 = vmatmul.mubr.msk.bf16.gmra.mrb[4].mxu1 %vm563_vm3, %v4865_v58 }
  0xa5   : > { %3268 = vmatprep.mubr.msk.bf16.mxu1 %vm563_vm3, %v4866_v31 }
  0xa6   : > { %3417 = vmatmul.mubr.msk.bf16.gmra.mrb[20].mxu0 %vm563_vm3, %v4349_v44 }
  0xa7   : > { %3420 = vmatprep.mubr.msk.bf16.mxu0 %vm563_vm3, %v4353_v45 }
  0xac   : > { %3269 = vmatmul.mubr.msk.bf16.gmra.mrb[8].mxu1 %vm563_vm3, %v4867_v20 }
  0xad   : > { %3272 = vmatprep.mubr.msk.bf16.mxu1 %vm563_vm3, %v4249_v61 }
  0xae   : > { %3421 = vmatmul.mubr.msk.bf16.gmra.mrb[24].mxu0 %vm563_vm3, %v4357_v9 }
  0xaf   : > { %3424 = vmatprep.mubr.msk.bf16.mxu0 %vm563_vm3, %v1364_v24 }
  0xb4   : > { %3273 = vmatmul.mubr.msk.bf16.gmra.mrb[12].mxu1 %vm563_vm3, %v4253_v42 }
  0xb5   : > { %3276 = vmatprep.mubr.msk.bf16.mxu1 %vm563_vm3, %v4295_v0 }
  0xb6   : > { %3425 = vmatmul.mubr.msk.bf16.gmra.mrb[28].mxu0 %vm563_vm3, %v4293_v13  ;;  %v4871_v13 = vld [vmem:[#allocation8_spill] sm:$0xff] }
  0xb7   : > { %3430 = vmatprep.mubr.msk.bf16.mxu0 %vm563_vm3, %v4868_v10 }
  0xbc   : > { %3277 = vmatmul.mubr.msk.bf16.gmra.mrb[16].mxu1 %vm563_vm3, %v4302_v14 }
  0xbd   : > { %3280 = vmatprep.mubr.msk.bf16.mxu1 %vm563_vm3, %v4361_v52 }
  0xbe   : > { %3431 = vmatmul.mubr.msk.bf16.vlgmr.msra.gmra.mrb[0].mxu0 %vm563_vm3, %v4869_v25 }
  0xbf   : > { %3463 = vmatpush3.bf16.msra.mxu0 %v2385_v53  ;;  %3434 = vmatprep.mubr.msk.bf16.mxu0 %vm563_vm3, %v4870_v46 }
  0xc4   : > { %3281 = vmatmul.mubr.msk.bf16.gmra.mrb[20].mxu1 %vm563_vm3, %v4365_v6 }
  0xc5   : > { %3284 = vmatprep.mubr.msk.bf16.mxu1 %vm563_vm3, %v4397_v3 }
  0xc6   : > { %3435 = vmatmul.mubr.msk.bf16.gmra.mrb[4].mxu0 %vm563_vm3, %v4871_v13 }
  0xc7   : > { %3438 = vmatprep.mubr.msk.bf16.mxu0 %vm563_vm3, %v4872_v7 }
  0xcc   : > { %3285 = vmatmul.mubr.msk.bf16.gmra.mrb[24].mxu1 %vm563_vm3, %v4401_v21 }
  0xcd   : > { %3288 = vmatprep.mubr.msk.bf16.mxu1 %vm563_vm3, %v4422_v43 }
  0xce   : > { %3439 = vmatmul.mubr.msk.bf16.gmra.mrb[8].mxu0 %vm563_vm3, %v4873_v12 }
  0xcf   : > { %3442 = vmatprep.mubr.msk.bf16.mxu0 %vm563_vm3, %v4874_v1 }
  0xd4   : > { %3289 = vmatmul.mubr.msk.bf16.gmra.mrb[28].mxu1 %vm563_vm3, %v4424_v33 }
  0xd5   : > { %3294 = vmatprep.mubr.msk.bf16.mxu1 %vm563_vm3, %v4242_v32  ;;  %v4880_v32 = vld [vmem:[#allocation4_spill] sm:$0xff] }
  0xd6   : > { %3443 = vmatmul.mubr.msk.bf16.gmra.mrb[12].mxu0 %vm563_vm3, %v4875_v23 }
  0xd7   : > { %3446 = vmatprep.mubr.msk.bf16.mxu0 %vm563_vm3, %v4876_v50 }
  0xdc   : > { %3295 = vmatmul.mubr.msk.bf16.vlgmr.msra.gmra.mrb[0].mxu1 %vm563_vm3, %v4258_v28 }
  0xdd   : > { %3497 = vmatpush3.bf16.msra.mxu1 %v4877_v37  ;;  %3298 = vmatprep.mubr.msk.bf16.mxu1 %vm563_vm3, %v4262_v29 }
  0xde   : > { %3447 = vmatmul.mubr.msk.bf16.gmra.mrb[16].mxu0 %vm563_vm3, %v4878_v18 }
  0xdf   : > { %3450 = vmatprep.mubr.msk.bf16.mxu0 %vm563_vm3, %v4879_v19 }
  0xe4   : > { %3299 = vmatmul.mubr.msk.bf16.gmra.mrb[4].mxu1 %vm563_vm3, %v4281_v55 }
  0xe5   : > { %3302 = vmatprep.mubr.msk.bf16.mxu1 %vm563_vm3, %v4285_v41 }
  0xe6   : > { %3451 = vmatmul.mubr.msk.bf16.gmra.mrb[20].mxu0 %vm563_vm3, %v4236_v62 }
  0xe7   : > { %3454 = vmatprep.mubr.msk.bf16.mxu0 %vm563_vm3, %v4244_v48 }
  0xec   : > { %3303 = vmatmul.mubr.msk.bf16.gmra.mrb[8].mxu1 %vm563_vm3, %v4300_v11 }
  0xed   : > { %3306 = vmatprep.mubr.msk.bf16.mxu1 %vm563_vm3, %v4308_v4 }
  0xee   : > { %3455 = vmatmul.mubr.msk.bf16.gmra.mrb[24].mxu0 %vm563_vm3, %v4287_v30 }
  0xef   : > { %3458 = vmatprep.mubr.msk.bf16.mxu0 %vm563_vm3, %v4440_v38 }
  0xf4   : > { %3307 = vmatmul.mubr.msk.bf16.gmra.mrb[12].mxu1 %vm563_vm3, %v4319_v34 }
  0xf5   : > { %3310 = vmatprep.mubr.msk.bf16.mxu1 %vm563_vm3, %v4325_v60 }
  0xf6   : > { %3459 = vmatmul.mubr.msk.bf16.gmra.mrb[28].mxu0 %vm563_vm3, %v4880_v32 }
  0xf7   : > { %3464 = vmatprep.mubr.msk.bf16.mxu0 %vm563_vm3, %v4863_v49 }
  0xfc   : > { %3311 = vmatmul.mubr.msk.bf16.gmra.mrb[16].mxu1 %vm563_vm3, %v4329_v2 }
  0xfd   : > { %3314 = vmatprep.mubr.msk.bf16.mxu1 %vm563_vm3, %v4341_v39 }
  0xfe   : > { %3465 = vmatmul.mubr.msk.bf16.vlgmr.msra.gmra.mrb[0].mxu0 %vm563_vm3, %v4865_v58 }
  0xff   : > { %3468 = vmatprep.mubr.msk.bf16.mxu0 %vm563_vm3, %v4866_v31 }
 0x104   : > { %3315 = vmatmul.mubr.msk.bf16.gmra.mrb[20].mxu1 %vm563_vm3, %v4345_v8 }
 0x105   : > { %3318 = vmatprep.mubr.msk.bf16.mxu1 %vm563_vm3, %v4349_v44 }
 0x106   : > { %3469 = vmatmul.mubr.msk.bf16.gmra.mrb[4].mxu0 %vm563_vm3, %v4867_v20 }
 0x107   : > { %3472 = vmatprep.mubr.msk.bf16.mxu0 %vm563_vm3, %v4249_v61 }
 0x10c   : > { %3319 = vmatmul.mubr.msk.bf16.gmra.mrb[24].mxu1 %vm563_vm3, %v4353_v45 }
 0x10d   : > { %3322 = vmatprep.mubr.msk.bf16.mxu1 %vm563_vm3, %v4357_v9 }
 0x10e   : > { %3473 = vmatmul.mubr.msk.bf16.gmra.mrb[8].mxu0 %vm563_vm3, %v4253_v42 }
 0x10f   : > { %3476 = vmatprep.mubr.msk.bf16.mxu0 %vm563_vm3, %v4295_v0 }
 0x114   : > { %3323 = vmatmul.mubr.msk.bf16.gmra.mrb[28].mxu1 %vm563_vm3, %v1364_v24 }
 0x115   : > { %3344 = vmatprep.mubr.msk.bf16.mxu1 %vm563_vm3, %v4875_v23 }
 0x116   : > { %3477 = vmatmul.mubr.msk.bf16.gmra.mrb[12].mxu0 %vm563_vm3, %v4302_v14 }
 0x117   : > { %3480 = vmatprep.mubr.msk.bf16.mxu0 %vm563_vm3, %v4361_v52 }
 0x11c   : > { %3345 = vmatmul.mubr.msk.bf16.vlgmr.msra.gmra.mrb[16].mxu1 %vm563_vm3, %v4876_v50 }
 0x11d   : > { %3348 = vmatprep.mubr.msk.bf16.mxu1 %vm563_vm3, %v4878_v18 }
 0x11e   : > { %3481 = vmatmul.mubr.msk.bf16.gmra.mrb[16].mxu0 %vm563_vm3, %v4365_v6 }
 0x11f   : > { %3484 = vmatprep.mubr.msk.bf16.mxu0 %vm563_vm3, %v4397_v3 }
 0x124   : > { %3349 = vmatmul.mubr.msk.bf16.gmra.mrb[20].mxu1 %vm563_vm3, %v4879_v19 }
 0x125   : > { %3352 = vmatprep.mubr.msk.bf16.mxu1 %vm563_vm3, %v4236_v62 }
 0x126   : > { %3485 = vmatmul.mubr.msk.bf16.gmra.mrb[20].mxu0 %vm563_vm3, %v4401_v21 }
 0x127   : > { %3488 = vmatprep.mubr.msk.bf16.mxu0 %vm563_vm3, %v4422_v43 }
 0x12c   : > { %3353 = vmatmul.mubr.msk.bf16.gmra.mrb[24].mxu1 %vm563_vm3, %v4244_v48 }
 0x12d   : > { %3356 = vmatprep.mubr.msk.bf16.mxu1 %vm563_vm3, %v4287_v30 }
 0x12e   : > { %3489 = vmatmul.mubr.msk.bf16.gmra.mrb[24].mxu0 %vm563_vm3, %v4424_v33 }
 0x12f   : > { %3492 = vmatprep.mubr.msk.bf16.mxu0 %vm563_vm3, %v4436_v63 }
 0x134   : > { %3357 = vmatmul.mubr.msk.bf16.gmra.mrb[28].mxu1 %vm563_vm3, %v4440_v38 }
 0x136   : > { %3493 = vmatmul.mubr.msk.bf16.gmra.mrb[28].mxu0 %vm563_vm3, %v4383_v15 }
 0x1af   : > { %v3296_v61 = vpop.f32.mrb[0].mxu1 }
 0x1b0   : > { %v1407_v62 = vpop.f32.mrb[1].mxu1 }
 0x1b1   : > { %v3297_v42 = vpop.f32.mrb[2].mxu1 }
 0x1b2   : > { %v1410_v48 = vpop.f32.mrb[3].mxu1 }
 0x1b7   : > { %v3300_v28 = vpop.f32.mrb[4].mxu1 }
 0x1b8   : > { %v1423_v29 = vpop.f32.mrb[5].mxu1 }
 0x1b9   : > { %v3301_v55 = vpop.f32.mrb[6].mxu1 }
 0x1ba   : > { %v1426_v41 = vpop.f32.mrb[7].mxu1 }
 0x1bf   : > { %v4648_v30 = vpop.f32.mrb[8].mxu1 }
 0x1c0   : > { %v4650_v0 = vpop.f32.mrb[9].mxu1 }
 0x1c1   : > { %v4652_v11 = vpop.f32.mrb[10].mxu1 }
 0x1c2   : > { %v4654_v14 = vpop.f32.mrb[11].mxu1 }
 0x1c7   : > { %v4656_v4 = vpop.f32.mrb[12].mxu1 }
 0x1c8   : > { %v4658_v34 = vpop.f32.mrb[13].mxu1 }
 0x1c9   : > { %v4660_v60 = vpop.f32.mrb[14].mxu1 }
 0x1ca   : > { %v4662_v2 = vpop.f32.mrb[15].mxu1 }
 0x1d1   : > { %v3466_v39 = vpop.f32.mrb[0].mxu0 }
 0x1d2   : > { %v3498_v8 = vadd.f32 %v3466_v39, %v3296_v61  ;;  %v2421_v44 = vpop.f32.mrb[1].mxu0 }
 0x1d3   : > { %v3499_v45 = vadd.f32 %v2421_v44, %v1407_v62  ;;  %v3467_v9 = vpop.f32.mrb[2].mxu0 }
 0x1d4   : > { %2582 = vst.msk [vmem:[%s4669_s11 + $0x10] sm:$0xff] %vm563_vm3, %v3498_v8  ;;  %v3500_v52 = vadd.f32 %v3467_v9, %v3297_v42  ;;  %v2424_v6 = vpop.f32.mrb[3].mxu0  ;;  %v2683_v21 = vmul.f32 %v3498_v8, %v3498_v8  ;;  %v2615_v22 = vsel %vm563_vm3, %v3498_v8, 0.0 }
 0x1d5   : > { %2580 = vst.msk [vmem:[%s4669_s11] sm:$0xff] %vm563_vm3, %v3499_v45  ;;  %v2681_v15 = vmul.f32 %v3499_v45, %v3499_v45  ;;  %v3501_v3 = vadd.f32 %v2424_v6, %v1410_v48  ;;  %v2612_v16 = vsel %vm563_vm3, %v3499_v45, 0.0 }
 0x1d6   : > { %2583 = vst.msk [vmem:[%s4669_s11 + $0x18] sm:$0xff] %vm563_vm3, %v3500_v52  ;;  %v2684_v47 = vmul.f32 %v3500_v52, %v3500_v52  ;;  %v2716_v40 = vsel %vm563_vm3, %v2683_v21, 0.0  ;;  %v2617_v38 = vsel %vm563_vm3, %v3500_v52, 0.0 }
 0x1d7   : > { %2581 = vst.msk [vmem:[%s4669_s11 + $0x8] sm:$0xff] %vm563_vm3, %v3501_v3  ;;  %v2613_v43 = vsel %vm563_vm3, %v3501_v3, 0.0  ;;  %v2682_v33 = vmul.f32 %v3501_v3, %v3501_v3  ;;  %v2713_v36 = vsel %vm563_vm3, %v2681_v15, 0.0 }
 0x1d8   : > { %v2614_v27 = vadd.f32 %v2613_v43, %v2612_v16  ;;  %v2718_v56 = vsel %vm563_vm3, %v2684_v47, 0.0 }
 0x1d9   : > { %v2714_v51 = vsel %vm563_vm3, %v2682_v33, 0.0  ;;  %v3470_v17 = vpop.f32.mrb[4].mxu0 }
 0x1da   : > { %v2616_v5 = vadd.f32 %v2615_v22, %v2614_v27  ;;  %v2715_v59 = vadd.f32 %v2714_v51, %v2713_v36  ;;  %v3502_v63 = vadd.f32 %v3470_v17, %v3300_v28  ;;  %v2437_v57 = vpop.f32.mrb[5].mxu0 }
 0x1db   : > { %v3503_v26 = vadd.f32 %v2437_v57, %v1423_v29  ;;  %v3471_v35 = vpop.f32.mrb[6].mxu0 }
 0x1dc   : > { %v2717_v49 = vadd.f32 %v2716_v40, %v2715_v59  ;;  %2586 = vst.msk [vmem:[%s4669_s11 + $0x30] sm:$0xff] %vm563_vm3, %v3502_v63  ;;  %v2618_v54 = vadd.f32 %v2617_v38, %v2616_v5  ;;  %v2440_v58 = vpop.f32.mrb[7].mxu0  ;;  %v3504_v20 = vadd.f32 %v3471_v35, %v3301_v55  ;;  %v2687_v7 = vmul.f32 %v3502_v63, %v3502_v63 }
 0x1dd   : > { %2584 = vst.msk [vmem:[%s4669_s11 + $0x20] sm:$0xff] %vm563_vm3, %v3503_v26  ;;  %v2619_v31 = vsel %vm563_vm3, %v3503_v26, 0.0  ;;  %v2685_v24 = vmul.f32 %v3503_v26, %v3503_v26  ;;  %v3505_v10 = vadd.f32 %v2440_v58, %v1426_v41  ;;  %v2623_v50 = vsel %vm563_vm3, %v3502_v63, 0.0 }
 0x1de   : > { %v2620_v53 = vadd.f32 %v2619_v31, %v2618_v54  ;;  %v2719_v25 = vadd.f32 %v2718_v56, %v2717_v49  ;;  %2587 = vst.msk [vmem:[%s4669_s11 + $0x38] sm:$0xff] %vm563_vm3, %v3504_v20  ;;  %v2688_v18 = vmul.f32 %v3504_v20, %v3504_v20  ;;  %v2625_v42 = vsel %vm563_vm3, %v3504_v20, 0.0 }
 0x1df   : > { %v2720_v46 = vsel %vm563_vm3, %v2685_v24, 0.0  ;;  %2585 = vst.msk [vmem:[%s4669_s11 + $0x28] sm:$0xff] %vm563_vm3, %v3505_v10  ;;  %v2621_v13 = vsel %vm563_vm3, %v3505_v10, 0.0  ;;  %v2686_v23 = vmul.f32 %v3505_v10, %v3505_v10  ;;  %v2724_v55 = vsel %vm563_vm3, %v2687_v7, 0.0 }
 0x1e0   : > { %v2721_v12 = vadd.f32 %v2720_v46, %v2719_v25  ;;  %v2622_v1 = vadd.f32 %v2621_v13, %v2620_v53 }
 0x1e1   : > { %v3474_v37 = vpop.f32.mrb[8].mxu0  ;;  %v2722_v32 = vsel %vm563_vm3, %v2686_v23, 0.0 }
 0x1e2   : > { %v2624_v19 = vadd.f32 %v2623_v50, %v2622_v1  ;;  %v3506_v61 = vadd.f32 %v3474_v37, %v4648_v30  ;;  %v2453_v62 = vpop.f32.mrb[9].mxu0  ;;  %v2723_v48 = vadd.f32 %v2722_v32, %v2721_v12 }
 0x1e3   : > { %v3507_v28 = vadd.f32 %v2453_v62, %v4650_v0  ;;  %v3475_v29 = vpop.f32.mrb[10].mxu0  ;;  %v2726_v0 = vsel %vm563_vm3, %v2688_v18, 0.0 }
 0x1e4   : > { %2590 = vst.msk [vmem:[%s4669_s11 + $0x50] sm:$0xff] %vm563_vm3, %v3506_v61  ;;  %v2626_v41 = vadd.f32 %v2625_v42, %v2624_v19  ;;  %v3508_v39 = vadd.f32 %v3475_v29, %v4652_v11  ;;  %v2456_v8 = vpop.f32.mrb[11].mxu0  ;;  %v2725_v44 = vadd.f32 %v2724_v55, %v2723_v48  ;;  %v2691_v21 = vmul.f32 %v3506_v61, %v3506_v61 }
 0x1e5   : > { %2588 = vst.msk [vmem:[%s4669_s11 + $0x40] sm:$0xff] %vm563_vm3, %v3507_v28  ;;  %v2627_v30 = vsel %vm563_vm3, %v3507_v28, 0.0  ;;  %v2689_v45 = vmul.f32 %v3507_v28, %v3507_v28  ;;  %v3509_v9 = vadd.f32 %v2456_v8, %v4654_v14  ;;  %v2631_v43 = vsel %vm563_vm3, %v3506_v61, 0.0 }
 0x1e6   : > { %v2628_v52 = vadd.f32 %v2627_v30, %v2626_v41  ;;  %2591 = vst.msk [vmem:[%s4669_s11 + $0x58] sm:$0xff] %vm563_vm3, %v3508_v39  ;;  %v2727_v6 = vadd.f32 %v2726_v0, %v2725_v44  ;;  %v2692_v27 = vmul.f32 %v3508_v39, %v3508_v39  ;;  %v2633_v17 = vsel %vm563_vm3, %v3508_v39, 0.0 }
 0x1e7   : > { %v2728_v15 = vsel %vm563_vm3, %v2689_v45, 0.0  ;;  %2589 = vst.msk [vmem:[%s4669_s11 + $0x48] sm:$0xff] %vm563_vm3, %v3509_v9  ;;  %v2629_v11 = vsel %vm563_vm3, %v3509_v9, 0.0  ;;  %v2690_v3 = vmul.f32 %v3509_v9, %v3509_v9  ;;  %v2732_v57 = vsel %vm563_vm3, %v2691_v21, 0.0 }
 0x1e8   : > { %v2630_v16 = vadd.f32 %v2629_v11, %v2628_v52  ;;  %v2729_v33 = vadd.f32 %v2728_v15, %v2727_v6 }
 0x1e9   : > { %v2730_v14 = vsel %vm563_vm3, %v2690_v3, 0.0  ;;  %v3478_v47 = vpop.f32.mrb[12].mxu0 }
 0x1ea   : > { %v2632_v22 = vadd.f32 %v2631_v43, %v2630_v16  ;;  %v3510_v36 = vadd.f32 %v3478_v47, %v4656_v4  ;;  %v2469_v51 = vpop.f32.mrb[13].mxu0  ;;  %v2731_v5 = vadd.f32 %v2730_v14, %v2729_v33 }
 0x1eb   : > { %v3511_v59 = vadd.f32 %v2469_v51, %v4658_v34  ;;  %v3479_v63 = vpop.f32.mrb[14].mxu0  ;;  %v2734_v34 = vsel %vm563_vm3, %v2692_v27, 0.0 }
 0x1ec   : > { %2594 = vst.msk [vmem:[%s4669_s11 + $0x70] sm:$0xff] %vm563_vm3, %v3510_v36  ;;  %v2634_v40 = vadd.f32 %v2633_v17, %v2632_v22  ;;  %v3512_v38 = vadd.f32 %v3479_v63, %v4660_v60  ;;  %v2472_v26 = vpop.f32.mrb[15].mxu0  ;;  %v2733_v35 = vadd.f32 %v2732_v57, %v2731_v5  ;;  %v2695_v10 = vmul.f32 %v3510_v36, %v3510_v36 }
 0x1ed   : > { %2592 = vst.msk [vmem:[%s4669_s11 + $0x60] sm:$0xff] %vm563_vm3, %v3511_v59  ;;  %v2635_v4 = vsel %vm563_vm3, %v3511_v59, 0.0  ;;  %v2693_v56 = vmul.f32 %v3511_v59, %v3511_v59  ;;  %v3513_v49 = vadd.f32 %v2472_v26, %v4662_v2  ;;  %v2639_v2 = vsel %vm563_vm3, %v3510_v36, 0.0 }
 0x1ee   : > { %v2636_v54 = vadd.f32 %v2635_v4, %v2634_v40  ;;  %2595 = vst.msk [vmem:[%s4669_s11 + $0x78] sm:$0xff] %vm563_vm3, %v3512_v38  ;;  %v2735_v58 = vadd.f32 %v2734_v34, %v2733_v35  ;;  %v2696_v1 = vmul.f32 %v3512_v38, %v3512_v38  ;;  %v2641_v19 = vsel %vm563_vm3, %v3512_v38, 0.0 }
 0x1ef   : > { %v2736_v31 = vsel %vm563_vm3, %v2693_v56, 0.0  ;;  %2593 = vst.msk [vmem:[%s4669_s11 + $0x68] sm:$0xff] %vm563_vm3, %v3513_v49  ;;  %v2637_v60 = vsel %vm563_vm3, %v3513_v49, 0.0  ;;  %v2694_v24 = vmul.f32 %v3513_v49, %v3513_v49  ;;  %v3346_v20 = vpop.f32.mrb[16].mxu1  ;;  %v2740_v42 = vsel %vm563_vm3, %v2695_v10, 0.0 }
 0x1f0   : > { %v2638_v53 = vadd.f32 %v2637_v60, %v2636_v54  ;;  %v1682_v25 = vpop.f32.mrb[17].mxu1  ;;  %v2737_v46 = vadd.f32 %v2736_v31, %v2735_v58  ;;  %v2742_v44 = vsel %vm563_vm3, %v2696_v1, 0.0 }
 0x1f1   : > { %v2738_v13 = vsel %vm563_vm3, %v2694_v24, 0.0  ;;  %v3482_v7 = vpop.f32.mrb[16].mxu0  ;;  %v3347_v12 = vpop.f32.mrb[18].mxu1 }
 0x1f2   : > { %v2640_v23 = vadd.f32 %v2639_v2, %v2638_v53  ;;  %v3514_v50 = vadd.f32 %v3482_v7, %v3346_v20  ;;  %v2485_v37 = vpop.f32.mrb[17].mxu0  ;;  %v1685_v18 = vpop.f32.mrb[19].mxu1  ;;  %v2739_v32 = vadd.f32 %v2738_v13, %v2737_v46 }
 0x1f3   : > { %v3515_v61 = vadd.f32 %v2485_v37, %v1682_v25  ;;  %v3483_v62 = vpop.f32.mrb[18].mxu0 }
 0x1f4   : > { %2598 = vst.msk [vmem:[%s4669_s11 + $0x90] sm:$0xff] %vm563_vm3, %v3514_v50  ;;  %v2642_v48 = vadd.f32 %v2641_v19, %v2640_v23  ;;  %v3516_v28 = vadd.f32 %v3483_v62, %v3347_v12  ;;  %v2488_v29 = vpop.f32.mrb[19].mxu0  ;;  %v2741_v55 = vadd.f32 %v2740_v42, %v2739_v32  ;;  %v2699_v15 = vmul.f32 %v3514_v50, %v3514_v50 }
 0x1f5   : > { %2596 = vst.msk [vmem:[%s4669_s11 + $0x80] sm:$0xff] %vm563_vm3, %v3515_v61  ;;  %v2643_v41 = vsel %vm563_vm3, %v3515_v61, 0.0  ;;  %v2697_v39 = vmul.f32 %v3515_v61, %v3515_v61  ;;  %v3517_v8 = vadd.f32 %v2488_v29, %v1685_v18  ;;  %v2647_v21 = vsel %vm563_vm3, %v3514_v50, 0.0 }
 0x1f6   : > { %v2644_v30 = vadd.f32 %v2643_v41, %v2642_v48  ;;  %2599 = vst.msk [vmem:[%s4669_s11 + $0x98] sm:$0xff] %vm563_vm3, %v3516_v28  ;;  %v2743_v45 = vadd.f32 %v2742_v44, %v2741_v55  ;;  %v2700_v47 = vmul.f32 %v3516_v28, %v3516_v28  ;;  %v2649_v17 = vsel %vm563_vm3, %v3516_v28, 0.0 }
 0x1f7   : > { %v2744_v9 = vsel %vm563_vm3, %v2697_v39, 0.0  ;;  %2597 = vst.msk [vmem:[%s4669_s11 + $0x88] sm:$0xff] %vm563_vm3, %v3517_v8  ;;  %v2645_v0 = vsel %vm563_vm3, %v3517_v8, 0.0  ;;  %v2698_v52 = vmul.f32 %v3517_v8, %v3517_v8  ;;  %v3350_v6 = vpop.f32.mrb[20].mxu1  ;;  %v2748_v57 = vsel %vm563_vm3, %v2699_v15, 0.0 }
 0x1f8   : > { %v2646_v11 = vadd.f32 %v2645_v0, %v2644_v30  ;;  %v1698_v3 = vpop.f32.mrb[21].mxu1  ;;  %v2745_v16 = vadd.f32 %v2744_v9, %v2743_v45  ;;  %v2750_v34 = vsel %vm563_vm3, %v2700_v47, 0.0 }
 0x1f9   : > { %v2746_v43 = vsel %vm563_vm3, %v2698_v52, 0.0  ;;  %v3486_v33 = vpop.f32.mrb[20].mxu0  ;;  %v3351_v14 = vpop.f32.mrb[22].mxu1 }
 0x1fa   : > { %v2648_v27 = vadd.f32 %v2647_v21, %v2646_v11  ;;  %v3518_v22 = vadd.f32 %v3486_v33, %v3350_v6  ;;  %v2501_v36 = vpop.f32.mrb[21].mxu0  ;;  %v1701_v51 = vpop.f32.mrb[23].mxu1  ;;  %v2747_v5 = vadd.f32 %v2746_v43, %v2745_v16 }
 0x1fb   : > { %v3519_v59 = vadd.f32 %v2501_v36, %v1698_v3  ;;  %v3487_v63 = vpop.f32.mrb[22].mxu0 }
 0x1fc   : > { %2602 = vst.msk [vmem:[%s4669_s11 + $0xb0] sm:$0xff] %vm563_vm3, %v3518_v22  ;;  %v2650_v40 = vadd.f32 %v2649_v17, %v2648_v27  ;;  %v3520_v38 = vadd.f32 %v3487_v63, %v3351_v14  ;;  %v2504_v26 = vpop.f32.mrb[23].mxu0  ;;  %v2749_v35 = vadd.f32 %v2748_v57, %v2747_v5  ;;  %v2703_v10 = vmul.f32 %v3518_v22, %v3518_v22 }
 0x1fd   : > { %2600 = vst.msk [vmem:[%s4669_s11 + $0xa0] sm:$0xff] %vm563_vm3, %v3519_v59  ;;  %v2651_v4 = vsel %vm563_vm3, %v3519_v59, 0.0  ;;  %v2701_v56 = vmul.f32 %v3519_v59, %v3519_v59  ;;  %v3521_v49 = vadd.f32 %v2504_v26, %v1701_v51  ;;  %v2655_v2 = vsel %vm563_vm3, %v3518_v22, 0.0 }
 0x1fe   : > { %v2652_v54 = vadd.f32 %v2651_v4, %v2650_v40  ;;  %2603 = vst.msk [vmem:[%s4669_s11 + $0xb8] sm:$0xff] %vm563_vm3, %v3520_v38  ;;  %v2751_v58 = vadd.f32 %v2750_v34, %v2749_v35  ;;  %v2704_v1 = vmul.f32 %v3520_v38, %v3520_v38  ;;  %v2657_v19 = vsel %vm563_vm3, %v3520_v38, 0.0 }
 0x1ff   : > { %v2752_v31 = vsel %vm563_vm3, %v2701_v56, 0.0  ;;  %2601 = vst.msk [vmem:[%s4669_s11 + $0xa8] sm:$0xff] %vm563_vm3, %v3521_v49  ;;  %v2653_v60 = vsel %vm563_vm3, %v3521_v49, 0.0  ;;  %v2702_v24 = vmul.f32 %v3521_v49, %v3521_v49  ;;  %v3354_v20 = vpop.f32.mrb[24].mxu1  ;;  %v2756_v42 = vsel %vm563_vm3, %v2703_v10, 0.0 }
 0x200   : > { %v2654_v53 = vadd.f32 %v2653_v60, %v2652_v54  ;;  %v1714_v25 = vpop.f32.mrb[25].mxu1  ;;  %v2753_v46 = vadd.f32 %v2752_v31, %v2751_v58  ;;  %v2758_v44 = vsel %vm563_vm3, %v2704_v1, 0.0 }
 0x201   : > { %v2754_v13 = vsel %vm563_vm3, %v2702_v24, 0.0  ;;  %v3490_v7 = vpop.f32.mrb[24].mxu0  ;;  %v3355_v12 = vpop.f32.mrb[26].mxu1 }
 0x202   : > { %v2656_v23 = vadd.f32 %v2655_v2, %v2654_v53  ;;  %v3522_v50 = vadd.f32 %v3490_v7, %v3354_v20  ;;  %v2517_v37 = vpop.f32.mrb[25].mxu0  ;;  %v1717_v18 = vpop.f32.mrb[27].mxu1  ;;  %v2755_v32 = vadd.f32 %v2754_v13, %v2753_v46 }
 0x203   : > { %v3523_v61 = vadd.f32 %v2517_v37, %v1714_v25  ;;  %v3491_v62 = vpop.f32.mrb[26].mxu0 }
 0x204   : > { %2606 = vst.msk [vmem:[%s4669_s11 + $0xd0] sm:$0xff] %vm563_vm3, %v3522_v50  ;;  %v2658_v48 = vadd.f32 %v2657_v19, %v2656_v23  ;;  %v3524_v28 = vadd.f32 %v3491_v62, %v3355_v12  ;;  %v2520_v29 = vpop.f32.mrb[27].mxu0  ;;  %v2757_v55 = vadd.f32 %v2756_v42, %v2755_v32  ;;  %v2707_v15 = vmul.f32 %v3522_v50, %v3522_v50 }
 0x205   : > { %2604 = vst.msk [vmem:[%s4669_s11 + $0xc0] sm:$0xff] %vm563_vm3, %v3523_v61  ;;  %v2659_v41 = vsel %vm563_vm3, %v3523_v61, 0.0  ;;  %v2705_v39 = vmul.f32 %v3523_v61, %v3523_v61  ;;  %v3525_v8 = vadd.f32 %v2520_v29, %v1717_v18  ;;  %v2663_v21 = vsel %vm563_vm3, %v3522_v50, 0.0 }
 0x206   : > { %v2660_v30 = vadd.f32 %v2659_v41, %v2658_v48  ;;  %2607 = vst.msk [vmem:[%s4669_s11 + $0xd8] sm:$0xff] %vm563_vm3, %v3524_v28  ;;  %v2759_v45 = vadd.f32 %v2758_v44, %v2757_v55  ;;  %v2708_v47 = vmul.f32 %v3524_v28, %v3524_v28  ;;  %v2665_v17 = vsel %vm563_vm3, %v3524_v28, 0.0 }
 0x207   : > { %v2760_v9 = vsel %vm563_vm3, %v2705_v39, 0.0  ;;  %2605 = vst.msk [vmem:[%s4669_s11 + $0xc8] sm:$0xff] %vm563_vm3, %v3525_v8  ;;  %v2661_v0 = vsel %vm563_vm3, %v3525_v8, 0.0  ;;  %v2706_v52 = vmul.f32 %v3525_v8, %v3525_v8  ;;  %v3358_v6 = vpop.f32.mrb[28].mxu1  ;;  %v2764_v57 = vsel %vm563_vm3, %v2707_v15, 0.0 }
 0x208   : > { %v2662_v11 = vadd.f32 %v2661_v0, %v2660_v30  ;;  %v1730_v3 = vpop.f32.mrb[29].mxu1  ;;  %v2761_v16 = vadd.f32 %v2760_v9, %v2759_v45  ;;  %v2766_v34 = vsel %vm563_vm3, %v2708_v47, 0.0 }
 0x209   : > { %v2762_v43 = vsel %vm563_vm3, %v2706_v52, 0.0  ;;  %v3494_v33 = vpop.f32.mrb[28].mxu0  ;;  %v3359_v14 = vpop.f32.mrb[30].mxu1 }
 0x20a   : > { %v2664_v27 = vadd.f32 %v2663_v21, %v2662_v11  ;;  %v3526_v22 = vadd.f32 %v3494_v33, %v3358_v6  ;;  %v2533_v36 = vpop.f32.mrb[29].mxu0  ;;  %v1733_v51 = vpop.f32.mrb[31].mxu1  ;;  %v2763_v5 = vadd.f32 %v2762_v43, %v2761_v16 }
 0x20b   : > { %v3527_v59 = vadd.f32 %v2533_v36, %v1730_v3  ;;  %v3495_v63 = vpop.f32.mrb[30].mxu0 }
 0x20c   : > { %2610 = vst.msk [vmem:[%s4669_s11 + $0xf0] sm:$0xff] %vm563_vm3, %v3526_v22  ;;  %v2666_v40 = vadd.f32 %v2665_v17, %v2664_v27  ;;  %v3528_v38 = vadd.f32 %v3495_v63, %v3359_v14  ;;  %v2536_v26 = vpop.f32.mrb[31].mxu0  ;;  %v2765_v35 = vadd.f32 %v2764_v57, %v2763_v5  ;;  %v2711_v20 = vmul.f32 %v3526_v22, %v3526_v22 }
 0x20d   : > { %2608 = vst.msk [vmem:[%s4669_s11 + $0xe0] sm:$0xff] %vm563_vm3, %v3527_v59  ;;  %v2667_v4 = vsel %vm563_vm3, %v3527_v59, 0.0  ;;  %v2709_v56 = vmul.f32 %v3527_v59, %v3527_v59  ;;  %v3529_v49 = vadd.f32 %v2536_v26, %v1733_v51  ;;  %v2671_v53 = vsel %vm563_vm3, %v3526_v22, 0.0 }
 0x20e   : > { %v2668_v54 = vadd.f32 %v2667_v4, %v2666_v40  ;;  %2611 = vst.msk [vmem:[%s4669_s11 + $0xf8] sm:$0xff] %vm563_vm3, %v3528_v38  ;;  %v2767_v58 = vadd.f32 %v2766_v34, %v2765_v35  ;;  %v2712_v46 = vmul.f32 %v3528_v38, %v3528_v38  ;;  %v2673_v7 = vsel %vm563_vm3, %v3528_v38, 0.0 }
 0x20f   : > { %v2768_v31 = vsel %vm563_vm3, %v2709_v56, 0.0  ;;  %2609 = vst.msk [vmem:[%s4669_s11 + $0xe8] sm:$0xff] %vm563_vm3, %v3529_v49  ;;  %v2669_v60 = vsel %vm563_vm3, %v3529_v49, 0.0  ;;  %v2710_v24 = vmul.f32 %v3529_v49, %v3529_v49  ;;  %v2772_v1 = vsel %vm563_vm3, %v2711_v20, 0.0 }
 0x210   : > { %v2670_v10 = vadd.f32 %v2669_v60, %v2668_v54  ;;  %v2769_v25 = vadd.f32 %v2768_v31, %v2767_v58  ;;  %v2774_v37 = vsel %vm563_vm3, %v2712_v46, 0.0 }
 0x211   : > { %v2770_v2 = vsel %vm563_vm3, %v2710_v24, 0.0 }
 0x212   : > { %v2672_v13 = vadd.f32 %v2671_v53, %v2670_v10  ;;  %v2771_v12 = vadd.f32 %v2770_v2, %v2769_v25 }
 0x214   : > { %v2674_v23 = vadd.f32 %v2673_v7, %v2672_v13  ;;  %v2773_v50 = vadd.f32 %v2772_v1, %v2771_v12 }
 0x216   : > { %v2675_v18 = vrot.slane %v2674_v23, 4  ;;  %v2775_v19 = vadd.f32 %v2774_v37, %v2773_v50 }
 0x218   : > { %v2676_v32 = vadd.f32 %v2675_v18, %v2674_v23  ;;  %v2776_v61 = vrot.slane %v2775_v19, 4 }
 0x21a   : > { %v2677_v62 = vrot.slane %v2676_v32, 2  ;;  %v2777_v42 = vadd.f32 %v2776_v61, %v2775_v19 }
 0x21c   : > { %v2678_v48 = vadd.f32 %v2677_v62, %v2676_v32  ;;  %v2778_v28 = vrot.slane %v2777_v42, 2 }
 0x21e   : > { %v2679_v29 = vrot.slane %v2678_v48, 1  ;;  %v2779_v55 = vadd.f32 %v2778_v28, %v2777_v42 }
 0x220   : > { %v2780_v41 = vrot.slane %v2779_v55, 1  ;;  %v2680_v39 = vadd.f32 %v2679_v29, %v2678_v48 }
 0x222   : > { %v2781_v8 = vadd.f32 %v2780_v41, %v2779_v55 }
 0x224   : > { %v2782_v44 = vsel %vm248_vm1, %v2680_v39, %v2781_v8 }
 0x225   : > { %2784 = vst.msk [vmem:[%s181_s17] sm:$0x3] %vm2783_vm5, %v2782_v44 }
 0x226 PF: > { %s14_s12 = sadd.s32 1, %s3779_s12  }
 0x227   : > { %p11_p4 = scmp.ge.s32.totalorder %s14_s12, 4  }
 0x229   :  { %13 = sbr.rel (!%p11_p4) target bundleno = 1 (0x1), region = 78 }

// kernel: basic_block_forward.4
= control target key start
LH: loop header
LB: loop body
LE: loop exit
PB: predicated region body
PF: predicated region fallthrough
CT: control target
= control target key end

     0   :  { %s3943_s15 = smov 0   ;;  %s5046_s0 = inlined_call_operand.vmem [shape: f32[2,256,4], index: 0, kind: input, shape index: {}]   ;;  %s5047_s1 = inlined_call_operand.vmem [shape: f32[2,4], index: 1, kind: input, shape index: {}]   ;;  %s5048_s2 = inlined_call_operand.vmem [shape: bf16[9,4,4], index: 2, kind: input, shape index: {}]   ;;  %s5049_s3 = inlined_call_operand.vmem [shape: f32[2,256,4], index: 3, kind: output, shape index: {0}]   ;;  %s5050_s4 = inlined_call_operand.vmem [shape: f32[2,2,4], index: 4, kind: output, shape index: {1}]  }
   0x1 LB: > { %s3004_s16 = sadd.s32 4294967295, %s3915_s15   ;;  %p3008_p0 = scmp.ge.s32.totalorder %s3915_s15, 1  ;;  %s3915_s15 = sphi %s3943_s15, %s15_s15  }
   0x2   : > { %p165_p1 = scmp.lt.s32.totalorder %s3915_s15, 3 }
   0x4   : > { %p166_p2 = pnand %p3008_p0, %p165_p1 }
   0x6   : > { %169 = sbr.rel (%p166_p2) target bundleno = 564 (0x234), region = 32 }
   0xd   : > { %v3016_v0 = vld [vmem:[%s5048_s2 + $0x2] sm:$0x3]  ;;  %vm745_vm0 = vcmask 1041408   ;;  %v3083_v1 = vld [vmem:[%s5048_s2 + $0x8] sm:$0x3]  ;;  %vm381_vm1 = vcmask 1040384  }
   0xe   : > { %3889 = vmatprep.subr.msk.bf16.mxu1 %vm745_vm0, %v3016_v0  ;;  %3893 = vmatprep.subr.msk.bf16.mxu0 %vm745_vm0, %v3083_v1  ;;  %v747_v2 = vsel %vm745_vm0, %v3016_v0, 0  ;;  %v3961_v3 = vsel %vm745_vm0, %v3083_v1, 0  ;;  %p195_p3 = scmp.lt.s32.totalorder %s3004_s16, 1  ;;  %v3917_v4 = vmov 0.0   ;;  %v532_v6 = vld [vmem:[%s5048_s2] sm:$0x3] }
   0xf   : > { %5080 = vst [vmem:[#allocation2_spill] sm:$0xff] %v3961_v3  ;;  %3326 = vmatpush3.bf16.msra.mxu1 %v747_v2  ;;  %3462 = vmatpush3.bf16.msra.mxu0 %v3961_v3  ;;  %v3964_v5 = vrot.slane %v3917_v4, 7  ;;  %v3100_v7 = vld [vmem:[%s5048_s2 + $0xa] sm:$0x3]  ;;  %vm565_vm2 = vcmask 1046528   ;;  %vm696_vm3 = vcmask 31744  }
  0x10   : > { %s5119_s16 = smov (!%p195_p3, %s3004_s16), 1  ;;  %3890 = vmatprep.subr.msk.bf16.mxu1 %vm745_vm0, %v532_v6  ;;  %3895 = vmatprep.subr.msk.bf16.mxu0 %vm745_vm0, %v3100_v7  ;;  %v3991_v13 = vld [vmem:[%s5047_s1] ss:$0 sm:$0xff]  ;;  %v4003_v14 = vld [vmem:[%s5047_s1 + $0x1] ss:$0 sm:$0xff]  ;;  %v4015_v20 = vsel %vm745_vm0, %v532_v6, 0 }
  0x11   : > { %v3976_v8 = vsel %vm381_vm1, 0.0, %v3964_v5  ;;  %v3980_v9 = vsel %vm381_vm1, %v3964_v5, 0.0  ;;  %v567_v10 = vrot.slane %v3964_v5, 1  ;;  %s3170_s25 = sshll.u32 %s5119_s16, 8  ;;  %v4008_v15 = vld [vmem:[%s5048_s2 + $0xc] sm:$0x3] }
  0x12   : > { %v566_v11 = vrot.slane %v3976_v8, 1  ;;  %v569_v12 = vrot.slane %v3980_v9, 1  ;;  %s3998_s30 = scalar_lea.vmem %s5046_s0, %s3170_s25  ;;  %v4019_v22 = vsel %vm745_vm0, %v3100_v7, 0  ;;  %v4036_v35 = vsel %vm745_vm0, %v4008_v15, 0  ;;  %s4900_s23 = scalar_lea.vmem %s5049_s3, %s3170_s25 }
  0x13   : > { %v212_v18 = vld [vmem:[%s3998_s30] sm:$0xff]  ;;  %v213_v19 = vld [vmem:[%s3998_s30 + $0x8] sm:$0xff]  ;;  %v214_v21 = vld [vmem:[%s3998_s30 + $0x10] sm:$0xff]  ;;  %vm1122_vm4 = vcmask 1045504   ;;  %s3013_s24 = sshll.u32 %s5119_s16, 1  ;;  %vm2916_vm5 = vcmask 25600  }
  0x14   : > { %v568_v16 = vsel %vm565_vm2, %v566_v11, %v567_v10  ;;  %v570_v17 = vsel %vm565_vm2, %v567_v10, %v569_v12  ;;  %v248_v24 = vmul.f32 %v3991_v13, %v212_v18  ;;  %v249_v25 = vmul.f32 %v3991_v13, %v213_v19  ;;  %v215_v26 = vld [vmem:[%s3998_s30 + $0x18] sm:$0xff]  ;;  %v216_v28 = vld [vmem:[%s3998_s30 + $0x20] sm:$0xff]  ;;  %v217_v29 = vld [vmem:[%s3998_s30 + $0x28] sm:$0xff]  ;;  %s208_s27 = scalar_lea.vmem %s5050_s4, %s3013_s24 }
  0x15   : > { %v4021_v23 = vpack.c.bf16 %v570_v17, %v568_v16  ;;  %v250_v27 = vmul.f32 %v3991_v13, %v214_v21  ;;  %v251_v30 = vmul.f32 %v3991_v13, %v215_v26  ;;  %v252_v31 = vmul.f32 %v3991_v13, %v216_v28  ;;  %v218_v33 = vld [vmem:[%s3998_s30 + $0x30] sm:$0xff]  ;;  %v219_v34 = vld [vmem:[%s3998_s30 + $0x38] sm:$0xff]  ;;  %v220_v26 = vld [vmem:[%s3998_s30 + $0x40] sm:$0xff] }
  0x16   : > { %v253_v32 = vmul.f32 %v3991_v13, %v217_v29  ;;  %v284_v36 = vadd.f32 %v4003_v14, %v248_v24  ;;  %v285_v37 = vadd.f32 %v4003_v14, %v249_v25  ;;  %v254_v39 = vmul.f32 %v3991_v13, %v218_v33  ;;  %v222_v28 = vld [vmem:[%s3998_s30 + $0x50] sm:$0xff]  ;;  %v223_v33 = vld [vmem:[%s3998_s30 + $0x58] sm:$0xff] }
  0x17   : > { %5081 = vst [vmem:[#allocation3_spill] sm:$0xff] %v4021_v23  ;;  %3327 = vmatprep.mubr.msk.bf16.mxu1 %vm696_vm3, %v4021_v23  ;;  %v286_v38 = vadd.f32 %v4003_v14, %v250_v27  ;;  %v287_v40 = vadd.f32 %v4003_v14, %v251_v30  ;;  %v288_v41 = vadd.f32 %v4003_v14, %v252_v31  ;;  %v221_v27 = vld [vmem:[%s3998_s30 + $0x48] sm:$0xff] }
  0x18   : > { %v289_v42 = vadd.f32 %v4003_v14, %v253_v32  ;;  %v255_v43 = vmul.f32 %v3991_v13, %v219_v34  ;;  %v316_v44 = vmax.f32 %v284_v36, 0.0  ;;  %v317_v45 = vmax.f32 %v285_v37, 0.0 }
  0x19   : > { %v318_v46 = vmax.f32 %v286_v38, 0.0  ;;  %v290_v47 = vadd.f32 %v4003_v14, %v254_v39  ;;  %v319_v48 = vmax.f32 %v287_v40, 0.0  ;;  %v320_v49 = vmax.f32 %v288_v41, 0.0  ;;  %v4104_v39 = vld [vmem:[%s5048_s2 + $0x4] sm:$0x3] }
  0x1a   : > { %v321_v50 = vmax.f32 %v289_v42, 0.0  ;;  %v291_v51 = vadd.f32 %v4003_v14, %v255_v43  ;;  %v384_v52 = vrot.slane %v316_v44, 7  ;;  %v385_v53 = vrot.slane %v317_v45, 7 }
  0x1b   : > { %v387_v54 = vrot.slane %v318_v46, 7  ;;  %v322_v55 = vmax.f32 %v290_v47, 0.0  ;;  %v388_v56 = vrot.slane %v319_v48, 7  ;;  %v390_v57 = vrot.slane %v320_v49, 7  ;;  %v224_v47 = vld [vmem:[%s3998_s30 + $0x60] sm:$0xff]  ;;  %v225_v48 = vld [vmem:[%s3998_s30 + $0x68] sm:$0xff] }
  0x1c   : > { %v391_v58 = vrot.slane %v321_v50, 7  ;;  %v323_v59 = vmax.f32 %v291_v51, 0.0  ;;  %v4051_v60 = vsel %vm381_vm1, %v384_v52, %v385_v53  ;;  %v4054_v61 = vsel %vm381_vm1, 0.0, %v384_v52 }
  0x1d   : > { %v4057_v62 = vsel %vm381_vm1, %v385_v53, 0.0  ;;  %v4060_v63 = vsel %vm381_vm1, 0.0, %v387_v54  ;;  %v571_v0 = vrot.slane %v4054_v61, 1  ;;  %v572_v1 = vrot.slane %v4051_v60, 1 }
  0x1e   : > { %v574_v2 = vrot.slane %v4057_v62, 1  ;;  %v4066_v4 = vsel %vm381_vm1, %v387_v54, %v388_v56  ;;  %v4069_v6 = vsel %vm381_vm1, %v388_v56, 0.0  ;;  %v576_v7 = vrot.slane %v4060_v63, 1 }
  0x1f   : > { %v577_v10 = vrot.slane %v4066_v4, 1  ;;  %v1133_v11 = vrot.slane %v4060_v63, 2  ;;  %v573_v12 = vsel %vm565_vm2, %v571_v0, %v572_v1  ;;  %v579_v17 = vrot.slane %v4069_v6, 1  ;;  %v226_v0 = vld [vmem:[%s3998_s30 + $0x70] sm:$0xff] }
  0x20   : > { %v575_v16 = vsel %vm565_vm2, %v572_v1, %v574_v2  ;;  %v1134_v18 = vrot.slane %v4066_v4, 2  ;;  %v1136_v24 = vrot.slane %v4069_v6, 2  ;;  %v4081_v25 = vsel %vm381_vm1, %v390_v57, %v391_v58 }
  0x21   : > { %v679_v19 = vpack.c.bf16 %v575_v16, %v573_v12  ;;  %v578_v21 = vsel %vm565_vm2, %v576_v7, %v577_v10  ;;  %v580_v29 = vsel %vm565_vm2, %v577_v10, %v579_v17  ;;  %v4088_v30 = vsel %vm381_vm1, 0.0, %v390_v57  ;;  %v227_v12 = vld [vmem:[%s3998_s30 + $0x78] sm:$0xff] }
  0x22   : > { %v4091_v31 = vsel %vm381_vm1, %v391_v58, 0.0  ;;  %v582_v32 = vrot.slane %v4081_v25, 1  ;;  %v4097_v34 = vpack.c.bf16 %v580_v29, %v578_v21  ;;  %v581_v36 = vrot.slane %v4088_v30, 1 }
  0x23   : > { %3328 = vmatmul.mubr.msk.bf16.vlgmr.msra.gmra.mrb[0].mxu1 %vm696_vm3, %v679_v19  ;;  %3463 = vmatprep.mubr.msk.bf16.mxu0 %vm696_vm3, %v679_v19  ;;  %v584_v37 = vrot.slane %v4091_v31, 1  ;;  %v393_v38 = vrot.slane %v322_v55, 7  ;;  %v394_v40 = vrot.slane %v323_v59, 7  ;;  %v256_v41 = vmul.f32 %v3991_v13, %v220_v26 }
  0x24   : > { %5082 = vst [vmem:[#allocation4_spill] sm:$0xff] %v4097_v34  ;;  %3360 = vmatpush3.bf16.msra.mxu1 %v4015_v20  ;;  %v257_v42 = vmul.f32 %v3991_v13, %v221_v27  ;;  %v258_v43 = vmul.f32 %v3991_v13, %v222_v28  ;;  %3464 = vmatmul.mubr.msk.bf16.vlgmr.msra.gmra.mrb[0].mxu0 %vm696_vm3, %v4097_v34 }
  0x25   : > { %3331 = vmatprep.mubr.msk.bf16.mxu1 %vm696_vm3, %v4097_v34  ;;  %v583_v44 = vsel %vm565_vm2, %v581_v36, %v582_v32  ;;  %v585_v45 = vsel %vm565_vm2, %v582_v32, %v584_v37  ;;  %v4117_v46 = vsel %vm381_vm1, 0.0, %v393_v38  ;;  %v259_v20 = vmul.f32 %v3991_v13, %v223_v33  ;;  %3496 = vmatpush3.bf16.msra.mxu0 %v4019_v22 }
  0x26   : > { %v4123_v49 = vpack.c.bf16 %v585_v45, %v583_v44  ;;  %v4126_v50 = vsel %vm381_vm1, %v393_v38, %v394_v40  ;;  %v4129_v51 = vsel %vm381_vm1, %v394_v40, 0.0  ;;  %v586_v52 = vrot.slane %v4117_v46, 1  ;;  %3891 = vmatprep.subr.msk.bf16.mxu1 %vm745_vm0, %v4104_v39  ;;  %3896 = vmatprep.subr.msk.bf16.mxu0 %vm745_vm0, %v4008_v15 }
  0x27   : > { %v587_v53 = vrot.slane %v4126_v50, 1  ;;  %v589_v54 = vrot.slane %v4129_v51, 1  ;;  %v292_v22 = vadd.f32 %v4003_v14, %v256_v41  ;;  %v293_v55 = vadd.f32 %v4003_v14, %v257_v42 }
  0x28   : > { %5083 = vst [vmem:[#allocation5_spill] sm:$0xff] %v4123_v49  ;;  %3467 = vmatprep.mubr.msk.bf16.mxu0 %vm696_vm3, %v4123_v49  ;;  %v294_v56 = vadd.f32 %v4003_v14, %v258_v43  ;;  %v295_v57 = vadd.f32 %v4003_v14, %v259_v20  ;;  %v260_v58 = vmul.f32 %v3991_v13, %v224_v47  ;;  %v1143_v23 = vrot.slane %v4117_v46, 2 }
  0x29   : > { %v261_v59 = vmul.f32 %v3991_v13, %v225_v48  ;;  %v588_v1 = vsel %vm565_vm2, %v586_v52, %v587_v53  ;;  %v590_v2 = vsel %vm565_vm2, %v587_v53, %v589_v54  ;;  %v324_v7 = vmax.f32 %v292_v22, 0.0 }
  0x2a   : > { %v325_v10 = vmax.f32 %v293_v55, 0.0  ;;  %v4150_v15 = vpack.c.bf16 %v590_v2, %v588_v1  ;;  %v326_v16 = vmax.f32 %v294_v56, 0.0  ;;  %v327_v17 = vmax.f32 %v295_v57, 0.0 }
  0x2b   : > { %v296_v19 = vadd.f32 %v4003_v14, %v260_v58  ;;  %3332 = vmatmul.mubr.msk.bf16.gmra.mrb[4].mxu1 %vm696_vm3, %v4123_v49  ;;  %v396_v21 = vrot.slane %v324_v7, 7  ;;  %v297_v27 = vadd.f32 %v4003_v14, %v261_v59  ;;  %v262_v28 = vmul.f32 %v3991_v13, %v226_v0  ;;  %v228_v0 = vld [vmem:[%s3998_s30 + $0x80] sm:$0xff] }
  0x2c   : > { %5084 = vst [vmem:[#allocation6_spill] sm:$0xff] %v4150_v15  ;;  %v397_v26 = vrot.slane %v325_v10, 7  ;;  %3335 = vmatprep.mubr.msk.bf16.mxu1 %vm696_vm3, %v4150_v15  ;;  %v399_v29 = vrot.slane %v326_v16, 7  ;;  %v400_v32 = vrot.slane %v327_v17, 7  ;;  %v263_v36 = vmul.f32 %v3991_v13, %v227_v12  ;;  %3468 = vmatmul.mubr.msk.bf16.gmra.mrb[4].mxu0 %vm696_vm3, %v4150_v15  ;;  %v229_v12 = vld [vmem:[%s3998_s30 + $0x88] sm:$0xff] }
  0x2d   : > { %v328_v33 = vmax.f32 %v296_v19, 0.0  ;;  %v4166_v38 = vsel %vm381_vm1, 0.0, %v396_v21  ;;  %v329_v41 = vmax.f32 %v297_v27, 0.0  ;;  %v298_v59 = vadd.f32 %v4003_v14, %v262_v28 }
  0x2e   : > { %v4163_v37 = vsel %vm381_vm1, %v396_v21, %v397_v26  ;;  %v4169_v40 = vsel %vm381_vm1, %v397_v26, 0.0  ;;  %v591_v42 = vrot.slane %v4166_v38, 1  ;;  %v4175_v45 = vsel %vm381_vm1, %v399_v29, %v400_v32 }
  0x2f   : > { %v592_v43 = vrot.slane %v4163_v37, 1  ;;  %v594_v44 = vrot.slane %v4169_v40, 1  ;;  %v4178_v20 = vsel %vm381_vm1, 0.0, %v399_v29  ;;  %v4181_v47 = vsel %vm381_vm1, %v400_v32, 0.0 }
  0x30   : > { %v597_v48 = vrot.slane %v4175_v45, 1  ;;  %v402_v52 = vrot.slane %v328_v33, 7  ;;  %v596_v22 = vrot.slane %v4178_v20, 1  ;;  %v599_v55 = vrot.slane %v4181_v47, 1 }
  0x31   : > { %v593_v53 = vsel %vm565_vm2, %v591_v42, %v592_v43  ;;  %v595_v54 = vsel %vm565_vm2, %v592_v43, %v594_v44  ;;  %v403_v57 = vrot.slane %v329_v41, 7  ;;  %v299_v10 = vadd.f32 %v4003_v14, %v263_v36 }
  0x32   : > { %v4188_v56 = vpack.c.bf16 %v595_v54, %v593_v53  ;;  %v4191_v58 = vsel %vm381_vm1, 0.0, %v402_v52  ;;  %v598_v1 = vsel %vm565_vm2, %v596_v22, %v597_v48  ;;  %v600_v2 = vsel %vm565_vm2, %v597_v48, %v599_v55  ;;  %v230_v55 = vld [vmem:[%s3998_s30 + $0x90] sm:$0xff] }
  0x33   : > { %v601_v7 = vrot.slane %v4191_v58, 1  ;;  %v4204_v16 = vpack.c.bf16 %v600_v2, %v598_v1  ;;  %v4207_v17 = vsel %vm381_vm1, %v402_v52, %v403_v57  ;;  %v4210_v19 = vsel %vm381_vm1, %v403_v57, 0.0 }
  0x34   : > { %5085 = vst [vmem:[#allocation7_spill] sm:$0xff] %v4188_v56  ;;  %3336 = vmatmul.mubr.msk.bf16.gmra.mrb[8].mxu1 %vm696_vm3, %v4188_v56  ;;  %3471 = vmatprep.mubr.msk.bf16.mxu0 %vm696_vm3, %v4188_v56  ;;  %v330_v21 = vmax.f32 %v298_v59, 0.0  ;;  %v602_v26 = vrot.slane %v4207_v17, 1  ;;  %v604_v27 = vrot.slane %v4210_v19, 1  ;;  %v331_v28 = vmax.f32 %v299_v10, 0.0 }
  0x35   : > { %5086 = vst [vmem:[#allocation8_spill] sm:$0xff] %v4204_v16  ;;  %v264_v29 = vmul.f32 %v3991_v13, %v228_v0  ;;  %3472 = vmatmul.mubr.msk.bf16.gmra.mrb[8].mxu0 %vm696_vm3, %v4204_v16  ;;  %3339 = vmatprep.mubr.msk.bf16.mxu1 %vm696_vm3, %v4204_v16  ;;  %v265_v33 = vmul.f32 %v3991_v13, %v229_v12  ;;  %v1128_v36 = vrot.slane %v4054_v61, 2  ;;  %v1129_v41 = vrot.slane %v4051_v60, 2 }
  0x36   : > { %v405_v32 = vrot.slane %v330_v21, 7  ;;  %v603_v42 = vsel %vm565_vm2, %v601_v7, %v602_v26  ;;  %v605_v43 = vsel %vm565_vm2, %v602_v26, %v604_v27  ;;  %v406_v44 = vrot.slane %v331_v28, 7  ;;  %v231_v28 = vld [vmem:[%s3998_s30 + $0x98] sm:$0xff] }
  0x37   : > { %v300_v48 = vadd.f32 %v4003_v14, %v264_v29  ;;  %v4225_v52 = vpack.c.bf16 %v605_v43, %v603_v42  ;;  %v301_v54 = vadd.f32 %v4003_v14, %v265_v33  ;;  %v1130_v22 = vsel %vm1122_vm4, %v1128_v36, %v1129_v41  ;;  %v233_v43 = vld [vmem:[%s3998_s30 + $0xa8] sm:$0xff] }
  0x38   : > { %v4228_v53 = vsel %vm381_vm1, 0.0, %v405_v32  ;;  %v4234_v57 = vsel %vm381_vm1, %v405_v32, %v406_v44  ;;  %v4237_v59 = vsel %vm381_vm1, %v406_v44, 0.0  ;;  %v1131_v12 = vrot.slane %v4057_v62, 2 }
  0x39   : > { %5087 = vst [vmem:[#allocation9_spill] sm:$0xff] %v4225_v52  ;;  %v606_v0 = vrot.slane %v4228_v53, 1  ;;  %v332_v1 = vmax.f32 %v300_v48, 0.0  ;;  %3475 = vmatprep.mubr.msk.bf16.mxu0 %vm696_vm3, %v4225_v52  ;;  %v607_v2 = vrot.slane %v4234_v57, 1  ;;  %v609_v7 = vrot.slane %v4237_v59, 1 }
  0x3a   : > { %v333_v10 = vmax.f32 %v301_v54, 0.0  ;;  %v1135_v26 = vsel %vm1122_vm4, %v1133_v11, %v1134_v18  ;;  %v1137_v27 = vsel %vm1122_vm4, %v1134_v18, %v1136_v24  ;;  %v266_v29 = vmul.f32 %v3991_v13, %v230_v55  ;;  %v232_v11 = vld [vmem:[%s3998_s30 + $0xa0] sm:$0xff] }
  0x3b   : > { %v408_v21 = vrot.slane %v332_v1, 7  ;;  %v608_v62 = vsel %vm565_vm2, %v606_v0, %v607_v2  ;;  %v610_v32 = vsel %vm565_vm2, %v607_v2, %v609_v7  ;;  %v1132_v36 = vsel %vm1122_vm4, %v1129_v41, %v1131_v12 }
  0x3c   : > { %3340 = vmatmul.mubr.msk.bf16.gmra.mrb[12].mxu1 %vm696_vm3, %v4225_v52  ;;  %v409_v33 = vrot.slane %v333_v10, 7  ;;  %v4263_v42 = vpack.c.bf16 %v610_v32, %v608_v62  ;;  %v4268_v18 = vpack.c.bf16 %v1132_v36, %v1130_v22  ;;  %v4270_v24 = vpack.c.bf16 %v1137_v27, %v1135_v26  ;;  %v234_v36 = vld [vmem:[%s3998_s30 + $0xb0] sm:$0xff] }
  0x3d   : > { %v4266_v6 = vsel %vm381_vm1, 0.0, %v408_v21  ;;  %v267_v41 = vmul.f32 %v3991_v13, %v231_v28  ;;  %v302_v0 = vadd.f32 %v4003_v14, %v266_v29  ;;  %v268_v1 = vmul.f32 %v3991_v13, %v232_v11 }
  0x3e   : > { %5088 = vst [vmem:[#allocation10_spill] sm:$0xff] %v4263_v42  ;;  %v4274_v44 = vsel %vm381_vm1, %v408_v21, %v409_v33  ;;  %v4277_v48 = vsel %vm381_vm1, %v409_v33, 0.0  ;;  %v611_v54 = vrot.slane %v4266_v6, 1  ;;  %3476 = vmatmul.mubr.msk.bf16.gmra.mrb[12].mxu0 %vm696_vm3, %v4263_v42  ;;  %3343 = vmatprep.mubr.msk.bf16.mxu1 %vm696_vm3, %v4263_v42  ;;  %v269_v7 = vmul.f32 %v3991_v13, %v233_v43 }
  0x3f   : > { %v612_v22 = vrot.slane %v4274_v44, 1  ;;  %v614_v55 = vrot.slane %v4277_v48, 1  ;;  %3497 = vmatprep.mubr.msk.bf16.mxu0 %vm696_vm3, %v4268_v18  ;;  %v303_v2 = vadd.f32 %v4003_v14, %v267_v41  ;;  %v1138_v10 = vrot.slane %v4088_v30, 2 }
  0x40   : > { %v1139_v12 = vrot.slane %v4081_v25, 2  ;;  %v334_v27 = vmax.f32 %v302_v0, 0.0  ;;  %v304_v28 = vadd.f32 %v4003_v14, %v268_v1  ;;  %v305_v32 = vadd.f32 %v4003_v14, %v269_v7 }
  0x41   : > { %v613_v21 = vsel %vm565_vm2, %v611_v54, %v612_v22  ;;  %v615_v26 = vsel %vm565_vm2, %v612_v22, %v614_v55  ;;  %v335_v62 = vmax.f32 %v303_v2, 0.0  ;;  %v1141_v41 = vrot.slane %v4091_v31, 2 }
  0x42   : > { %v4298_v29 = vpack.c.bf16 %v615_v26, %v613_v21  ;;  %v1140_v33 = vsel %vm1122_vm4, %v1138_v10, %v1139_v12  ;;  %v411_v11 = vrot.slane %v334_v27, 7  ;;  %v336_v43 = vmax.f32 %v304_v28, 0.0 }
  0x43   : > { %v412_v54 = vrot.slane %v335_v62, 7  ;;  %v337_v22 = vmax.f32 %v305_v32, 0.0  ;;  %v1144_v55 = vrot.slane %v4126_v50, 2  ;;  %v1146_v0 = vrot.slane %v4129_v51, 2  ;;  %v4324_v51 = vld [vmem:[%s5048_s2 + $0xe] sm:$0x3] }
  0x44   : > { %5089 = vst [vmem:[#allocation11_spill] sm:$0xff] %v4298_v29  ;;  %3344 = vmatmul.mubr.msk.bf16.gmra.mrb[16].mxu1 %vm696_vm3, %v4298_v29  ;;  %v4310_v1 = vsel %vm381_vm1, 0.0, %v411_v11  ;;  %v414_v2 = vrot.slane %v336_v43, 7  ;;  %v1142_v7 = vsel %vm1122_vm4, %v1139_v12, %v1141_v41  ;;  %v270_v31 = vmul.f32 %v3991_v13, %v234_v36  ;;  %v235_v36 = vld [vmem:[%s3998_s30 + $0xb8] sm:$0xff] }
  0x45   : > { %v4315_v10 = vsel %vm381_vm1, %v411_v11, %v412_v54  ;;  %v4318_v21 = vsel %vm381_vm1, %v412_v54, 0.0  ;;  %v616_v26 = vrot.slane %v4310_v1, 1  ;;  %v415_v27 = vrot.slane %v337_v22, 7  ;;  %v236_v22 = vld [vmem:[%s3998_s30 + $0xc0] sm:$0xff] }
  0x46   : > { %3498 = vmatmul.mubr.msk.bf16.vlgmr.msra.gmra.mrb[0].mxu0 %vm696_vm3, %v4270_v24  ;;  %v617_v12 = vrot.slane %v4315_v10, 1  ;;  %v619_v28 = vrot.slane %v4318_v21, 1  ;;  %v4331_v62 = vsel %vm381_vm1, 0.0, %v414_v2  ;;  %v4333_v32 = vpack.c.bf16 %v1142_v7, %v1140_v33 }
  0x47   : > { %3530 = vmatpush3.bf16.msra.mxu0 %v4036_v35  ;;  %v4338_v11 = vsel %vm381_vm1, %v414_v2, %v415_v27  ;;  %v4341_v43 = vsel %vm381_vm1, %v415_v27, 0.0  ;;  %v621_v41 = vrot.slane %v4331_v62, 1  ;;  %v1145_v54 = vsel %vm1122_vm4, %v1143_v23, %v1144_v55  ;;  %v237_v35 = vld [vmem:[%s3998_s30 + $0xc8] sm:$0xff] }
  0x48   : > { %v618_v3 = vsel %vm565_vm2, %v616_v26, %v617_v12  ;;  %v620_v29 = vsel %vm565_vm2, %v617_v12, %v619_v28  ;;  %v622_v33 = vrot.slane %v4338_v11, 1  ;;  %v624_v7 = vrot.slane %v4341_v43, 1  ;;  %3501 = vmatprep.mubr.msk.bf16.mxu0 %vm696_vm3, %v4333_v32  ;;  %3897 = vmatprep.subr.msk.bf16.mxu0 %vm745_vm0, %v4324_v51 }
  0x49   : > { %v4355_v2 = vpack.c.bf16 %v620_v29, %v618_v3  ;;  %v1147_v23 = vsel %vm1122_vm4, %v1144_v55, %v1146_v0  ;;  %v271_v27 = vmul.f32 %v3991_v13, %v235_v36  ;;  %v306_v26 = vadd.f32 %v4003_v14, %v270_v31 }
  0x4a   : > { %v623_v12 = vsel %vm565_vm2, %v621_v41, %v622_v33  ;;  %v625_v28 = vsel %vm565_vm2, %v622_v33, %v624_v7  ;;  %v4362_v42 = vpack.c.bf16 %v1147_v23, %v1145_v54  ;;  %v272_v52 = vmul.f32 %v3991_v13, %v236_v22 }
  0x4b   : > { %5090 = vst [vmem:[#allocation12_spill] sm:$0xff] %v4355_v2  ;;  %3347 = vmatprep.mubr.msk.bf16.mxu1 %vm696_vm3, %v4355_v2  ;;  %v4367_v16 = vpack.c.bf16 %v625_v28, %v623_v12  ;;  %v307_v3 = vadd.f32 %v4003_v14, %v271_v27  ;;  %v338_v29 = vmax.f32 %v306_v26, 0.0  ;;  %v273_v55 = vmul.f32 %v3991_v13, %v237_v35  ;;  %v241_v2 = vld [vmem:[%s3998_s30 + $0xe8] sm:$0xff] }
  0x4c   : > { %5091 = vst [vmem:[#allocation13_spill] sm:$0xff] %v4362_v42  ;;  %v308_v0 = vadd.f32 %v4003_v14, %v272_v52  ;;  %v1148_v31 = vrot.slane %v4166_v38, 2  ;;  %v1149_v36 = vrot.slane %v4163_v37, 2  ;;  %v1151_v41 = vrot.slane %v4169_v40, 2  ;;  %v238_v40 = vld [vmem:[%s3998_s30 + $0xd0] sm:$0xff] }
  0x4d   : > { %5092 = vst [vmem:[#allocation14_spill] sm:$0xff] %v4367_v16  ;;  %3348 = vmatmul.mubr.msk.bf16.gmra.mrb[20].mxu1 %vm696_vm3, %v4367_v16  ;;  %v339_v54 = vmax.f32 %v307_v3, 0.0  ;;  %v417_v22 = vrot.slane %v338_v29, 7  ;;  %v309_v33 = vadd.f32 %v4003_v14, %v273_v55  ;;  %v1153_v7 = vrot.slane %v4178_v20, 2 }
  0x4e   : > { %3502 = vmatmul.mubr.msk.bf16.gmra.mrb[4].mxu0 %vm696_vm3, %v4362_v42  ;;  %v340_v35 = vmax.f32 %v308_v0, 0.0  ;;  %v1150_v52 = vsel %vm1122_vm4, %v1148_v31, %v1149_v36  ;;  %v1152_v23 = vsel %vm1122_vm4, %v1149_v36, %v1151_v41  ;;  %v1154_v27 = vrot.slane %v4175_v45, 2 }
  0x4f   : > { %v418_v26 = vrot.slane %v339_v54, 7  ;;  %v4386_v12 = vsel %vm381_vm1, 0.0, %v417_v22  ;;  %v341_v28 = vmax.f32 %v309_v33, 0.0  ;;  %v4388_v3 = vpack.c.bf16 %v1152_v23, %v1150_v52  ;;  %v240_v23 = vld [vmem:[%s3998_s30 + $0xe0] sm:$0xff] }
  0x50   : > { %v626_v29 = vrot.slane %v4386_v12, 1  ;;  %v420_v55 = vrot.slane %v340_v35, 7  ;;  %v1155_v0 = vsel %vm1122_vm4, %v1153_v7, %v1154_v27  ;;  %v1156_v31 = vrot.slane %v4181_v47, 2 }
  0x51   : > { %5093 = vst [vmem:[#allocation15_spill] sm:$0xff] %v4388_v3  ;;  %v4394_v36 = vsel %vm381_vm1, %v417_v22, %v418_v26  ;;  %v4397_v41 = vsel %vm381_vm1, %v418_v26, 0.0  ;;  %v421_v54 = vrot.slane %v341_v28, 7  ;;  %3505 = vmatprep.mubr.msk.bf16.mxu0 %vm696_vm3, %v4388_v3  ;;  %v274_v33 = vmul.f32 %v3991_v13, %v238_v40  ;;  %v239_v22 = vld [vmem:[%s3998_s30 + $0xd8] sm:$0xff] }
  0x52   : > { %v627_v52 = vrot.slane %v4394_v36, 1  ;;  %v629_v35 = vrot.slane %v4397_v41, 1  ;;  %v4405_v7 = vsel %vm381_vm1, 0.0, %v420_v55  ;;  %v1157_v47 = vsel %vm1122_vm4, %v1154_v27, %v1156_v31 }
  0x53   : > { %v4411_v26 = vsel %vm381_vm1, %v420_v55, %v421_v54  ;;  %v4414_v28 = vsel %vm381_vm1, %v421_v54, 0.0  ;;  %v631_v16 = vrot.slane %v4405_v7, 1  ;;  %v4417_v40 = vpack.c.bf16 %v1157_v47, %v1155_v0 }
  0x54   : > { %v628_v56 = vsel %vm565_vm2, %v626_v29, %v627_v52  ;;  %v630_v15 = vsel %vm565_vm2, %v627_v52, %v629_v35  ;;  %v632_v49 = vrot.slane %v4411_v26, 1  ;;  %v634_v27 = vrot.slane %v4414_v28, 1 }
  0x55   : > { %5094 = vst [vmem:[#allocation16_spill] sm:$0xff] %v4417_v40  ;;  %v4424_v31 = vpack.c.bf16 %v630_v15, %v628_v56  ;;  %v275_v55 = vmul.f32 %v3991_v13, %v239_v22  ;;  %v310_v54 = vadd.f32 %v4003_v14, %v274_v33  ;;  %v276_v34 = vmul.f32 %v3991_v13, %v240_v23 }
  0x56   : > { %v633_v0 = vsel %vm565_vm2, %v631_v16, %v632_v49  ;;  %v635_v47 = vsel %vm565_vm2, %v632_v49, %v634_v27  ;;  %3506 = vmatmul.mubr.msk.bf16.gmra.mrb[8].mxu0 %vm696_vm3, %v4417_v40  ;;  %v277_v29 = vmul.f32 %v3991_v13, %v241_v2  ;;  %v1158_v52 = vrot.slane %v4191_v58, 2 }
  0x57   : > { %5095 = vst [vmem:[#allocation17_spill] sm:$0xff] %v4424_v31  ;;  %3351 = vmatprep.mubr.msk.bf16.mxu1 %vm696_vm3, %v4424_v31  ;;  %v4437_v15 = vpack.c.bf16 %v635_v47, %v633_v0  ;;  %v311_v56 = vadd.f32 %v4003_v14, %v275_v55  ;;  %v342_v33 = vmax.f32 %v310_v54, 0.0  ;;  %v312_v35 = vadd.f32 %v4003_v14, %v276_v34 }
  0x58   : > { %v313_v16 = vadd.f32 %v4003_v14, %v277_v29  ;;  %v1159_v49 = vrot.slane %v4207_v17, 2  ;;  %v1161_v22 = vrot.slane %v4210_v19, 2  ;;  %v1163_v2 = vrot.slane %v4228_v53, 2 }
  0x59   : > { %5096 = vst [vmem:[#allocation18_spill] sm:$0xff] %v4437_v15  ;;  %3352 = vmatmul.mubr.msk.bf16.gmra.mrb[24].mxu1 %vm696_vm3, %v4437_v15  ;;  %v343_v23 = vmax.f32 %v311_v56, 0.0  ;;  %v423_v27 = vrot.slane %v342_v33, 7  ;;  %v344_v0 = vmax.f32 %v312_v35, 0.0  ;;  %v1164_v47 = vrot.slane %v4234_v57, 2 }
  0x5a   : > { %v345_v55 = vmax.f32 %v313_v16, 0.0  ;;  %v1160_v54 = vsel %vm1122_vm4, %v1158_v52, %v1159_v49  ;;  %v1162_v34 = vsel %vm1122_vm4, %v1159_v49, %v1161_v22  ;;  %v1166_v29 = vrot.slane %v4237_v59, 2 }
  0x5b   : > { %v424_v31 = vrot.slane %v343_v23, 7  ;;  %v4452_v19 = vsel %vm381_vm1, 0.0, %v423_v27  ;;  %v426_v40 = vrot.slane %v344_v0, 7  ;;  %v4454_v3 = vpack.c.bf16 %v1162_v34, %v1160_v54 }
  0x5c   : > { %v636_v56 = vrot.slane %v4452_v19, 1  ;;  %v427_v33 = vrot.slane %v345_v55, 7  ;;  %v1165_v35 = vsel %vm1122_vm4, %v1163_v2, %v1164_v47  ;;  %v1167_v16 = vsel %vm1122_vm4, %v1164_v47, %v1166_v29 }
  0x5d   : > { %5097 = vst [vmem:[#allocation19_spill] sm:$0xff] %v4454_v3  ;;  %v4460_v52 = vsel %vm381_vm1, %v423_v27, %v424_v31  ;;  %v4463_v49 = vsel %vm381_vm1, %v424_v31, 0.0  ;;  %v4466_v59 = vsel %vm381_vm1, 0.0, %v426_v40  ;;  %3509 = vmatprep.mubr.msk.bf16.mxu0 %vm696_vm3, %v4454_v3  ;;  %v4470_v22 = vpack.c.bf16 %v1167_v16, %v1165_v35 }
  0x5e   : > { %v637_v23 = vrot.slane %v4460_v52, 1  ;;  %v639_v2 = vrot.slane %v4463_v49, 1  ;;  %v4475_v0 = vsel %vm381_vm1, %v426_v40, %v427_v33  ;;  %v4478_v27 = vsel %vm381_vm1, %v427_v33, 0.0 }
  0x5f   : > { %5098 = vst [vmem:[#allocation20_spill] sm:$0xff] %v4470_v22  ;;  %v641_v31 = vrot.slane %v4466_v59, 1  ;;  %v642_v47 = vrot.slane %v4475_v0, 1  ;;  %v644_v55 = vrot.slane %v4478_v27, 1  ;;  %3510 = vmatmul.mubr.msk.bf16.gmra.mrb[12].mxu0 %vm696_vm3, %v4470_v22  ;;  %v4487_v54 = vpack.c.bf16 %v3964_v5, %v3976_v8 }
  0x60   : > { %v638_v34 = vsel %vm565_vm2, %v636_v56, %v637_v23  ;;  %v640_v40 = vsel %vm565_vm2, %v637_v23, %v639_v2  ;;  %v1168_v29 = vrot.slane %v4266_v6, 2  ;;  %v1169_v33 = vrot.slane %v4274_v44, 2 }
  0x61   : > { %v4493_v35 = vpack.c.bf16 %v640_v40, %v638_v34  ;;  %v643_v16 = vsel %vm565_vm2, %v641_v31, %v642_v47  ;;  %v645_v15 = vsel %vm565_vm2, %v642_v47, %v644_v55  ;;  %v1171_v22 = vrot.slane %v4277_v48, 2 }
  0x62   : > { %v4498_v3 = vpack.c.bf16 %v645_v15, %v643_v16  ;;  %v1170_v42 = vsel %vm1122_vm4, %v1168_v29, %v1169_v33  ;;  %v1173_v56 = vrot.slane %v4310_v1, 2  ;;  %v1174_v23 = vrot.slane %v4315_v10, 2 }
  0x63   : > { %3355 = vmatprep.mubr.msk.bf16.mxu1 %vm696_vm3, %v4493_v35  ;;  %v4507_v2 = vpack.c.bf16 %v4051_v60, %v4054_v61  ;;  %v1172_v31 = vsel %vm1122_vm4, %v1169_v33, %v1171_v22  ;;  %v1176_v47 = vrot.slane %v4318_v21, 2  ;;  %v1178_v55 = vrot.slane %v4331_v62, 2 }
  0x64   : > { %3356 = vmatmul.mubr.msk.bf16.gmra.mrb[28].mxu1 %vm696_vm3, %v4498_v3  ;;  %v4513_v48 = vpack.c.bf16 %v1172_v31, %v1170_v42  ;;  %v1175_v15 = vsel %vm1122_vm4, %v1173_v56, %v1174_v23  ;;  %v1179_v34 = vrot.slane %v4338_v11, 2  ;;  %v1181_v61 = vrot.slane %v4341_v43, 2 }
  0x65   : > { %3361 = vmatprep.mubr.msk.bf16.mxu1 %vm696_vm3, %v4487_v54  ;;  %v1177_v60 = vsel %vm1122_vm4, %v1174_v23, %v1176_v47  ;;  %v1183_v21 = vrot.slane %v4386_v12, 2  ;;  %v1184_v22 = vrot.slane %v4394_v36, 2  ;;  %v1186_v29 = vrot.slane %v4397_v41, 2 }
  0x66   : > { %3513 = vmatprep.mubr.msk.bf16.mxu0 %vm696_vm3, %v4513_v48  ;;  %v4526_v42 = vpack.c.bf16 %v1177_v60, %v1175_v15  ;;  %v1180_v40 = vsel %vm1122_vm4, %v1178_v55, %v1179_v34  ;;  %v4532_v33 = vpack.c.bf16 %v4126_v50, %v4117_v46  ;;  %v1182_v43 = vsel %vm1122_vm4, %v1179_v34, %v1181_v61  ;;  %v242_v15 = vld [vmem:[%s3998_s30 + $0xf0] sm:$0xff] }
  0x67   : > { %v1185_v16 = vsel %vm1122_vm4, %v1183_v21, %v1184_v22  ;;  %v4538_v56 = vpack.c.bf16 %v4163_v37, %v4166_v38  ;;  %v1188_v23 = vrot.slane %v4405_v7, 2  ;;  %v4543_v31 = vpack.c.bf16 %v1182_v43, %v1180_v40  ;;  %v4577_v21 = vld [vmem:[%s5048_s2 + $0x6] sm:$0x3] }
  0x68   : > { %3514 = vmatmul.mubr.msk.bf16.gmra.mrb[16].mxu0 %vm696_vm3, %v4526_v42  ;;  %v1187_v41 = vsel %vm1122_vm4, %v1184_v22, %v1186_v29  ;;  %v1189_v46 = vrot.slane %v4411_v26, 2  ;;  %v1191_v50 = vrot.slane %v4414_v28, 2  ;;  %v1123_v47 = vrot.slane %v3976_v8, 2 }
  0x69   : > { %v1302_v37 = vsel %vm745_vm0, %v4104_v39, 0  ;;  %v4553_v38 = vpack.c.bf16 %v4066_v4, %v4060_v63  ;;  %3517 = vmatprep.mubr.msk.bf16.mxu0 %vm696_vm3, %v4543_v31  ;;  %v4562_v28 = vpack.c.bf16 %v4175_v45, %v4178_v20  ;;  %v4566_v8 = vpack.c.bf16 %v4207_v17, %v4191_v58  ;;  %v243_v39 = vld [vmem:[%s3998_s30 + $0xf8] sm:$0xff] }
  0x6a   : > { %v1190_v55 = vsel %vm1122_vm4, %v1188_v23, %v1189_v46  ;;  %v1192_v34 = vsel %vm1122_vm4, %v1189_v46, %v1191_v50  ;;  %v1126_v63 = vrot.slane %v3980_v9, 2  ;;  %v4570_v4 = vpack.c.bf16 %v1187_v41, %v1185_v16 }
  0x6b   : > { %v1193_v60 = vrot.slane %v4452_v19, 2  ;;  %v1194_v61 = vrot.slane %v4460_v52, 2  ;;  %v4581_v45 = vpack.c.bf16 %v1192_v34, %v1190_v55  ;;  %v1196_v20 = vrot.slane %v4463_v49, 2 }
  0x6c   : > { %3362 = vmatmul.mubr.msk.bf16.vlgmr.msra.gmra.mrb[0].mxu1 %vm696_vm3, %v4507_v2  ;;  %v1198_v9 = vrot.slane %v4466_v59, 2  ;;  %v278_v58 = vmul.f32 %v3991_v13, %v242_v15  ;;  %v279_v17 = vmul.f32 %v3991_v13, %v243_v39  ;;  %v4591_v22 = vpack.c.bf16 %v4234_v57, %v4228_v53 }
  0x6d   : > { %3394 = vmatpush3.bf16.msra.mxu1 %v1302_v37  ;;  %3365 = vmatprep.mubr.msk.bf16.mxu1 %vm696_vm3, %v4553_v38  ;;  %v4595_v40 = vpack.c.bf16 %v4274_v44, %v4266_v6  ;;  %v1124_v49 = vrot.slane %v3964_v5, 2  ;;  %v1199_v29 = vrot.slane %v4475_v0, 2  ;;  %v1201_v43 = vrot.slane %v4478_v27, 2 }
  0x6e   : > { %v314_v16 = vadd.f32 %v4003_v14, %v278_v58  ;;  %v4603_v23 = vpack.c.bf16 %v4315_v10, %v4310_v1  ;;  %3892 = vmatprep.subr.msk.bf16.mxu1 %vm745_vm0, %v4577_v21  ;;  %v4609_v13 = vpack.c.bf16 %v4081_v25, %v4088_v30  ;;  %v315_v53 = vadd.f32 %v4003_v14, %v279_v17  ;;  %v3151_v17 = vld [vmem:[%s5048_s2 + $0x10] sm:$0x3] }
  0x6f   : > { %v4614_v5 = vpack.c.bf16 %v4338_v11, %v4331_v62  ;;  %v4618_v57 = vpack.c.bf16 %v4394_v36, %v4386_v12  ;;  %v1195_v6 = vsel %vm1122_vm4, %v1193_v60, %v1194_v61  ;;  %v4625_v25 = vpack.c.bf16 %v4411_v26, %v4405_v7 }
  0x70   : > { %3518 = vmatmul.mubr.msk.bf16.gmra.mrb[20].mxu0 %vm696_vm3, %v4570_v4  ;;  %v346_v44 = vmax.f32 %v314_v16, 0.0  ;;  %v4629_v14 = vpack.c.bf16 %v4475_v0, %v4466_v59  ;;  %v1197_v30 = vsel %vm1122_vm4, %v1194_v61, %v1196_v20  ;;  %v347_v1 = vmax.f32 %v315_v53, 0.0  ;;  %v5103_v16 = vld [vmem:[#allocation19_spill] sm:$0xff]  ;;  %v5104_v53 = vld [vmem:[#allocation20_spill] sm:$0xff] }
  0x71   : > { %3521 = vmatprep.mubr.msk.bf16.mxu0 %vm696_vm3, %v4581_v45  ;;  %v1125_v10 = vsel %vm1122_vm4, %v1123_v47, %v1124_v49  ;;  %v1127_v62 = vsel %vm1122_vm4, %v1124_v49, %v1126_v63  ;;  %v1200_v11 = vsel %vm1122_vm4, %v1198_v9, %v1199_v29  ;;  %v1202_v12 = vsel %vm1122_vm4, %v1199_v29, %v1201_v43  ;;  %v5100_v49 = vld [vmem:[#allocation15_spill] sm:$0xff]  ;;  %v5101_v29 = vld [vmem:[#allocation16_spill] sm:$0xff] }
  0x72   : > { %v429_v36 = vrot.slane %v346_v44, 7  ;;  %v4638_v7 = vpack.c.bf16 %v1127_v62, %v1125_v10  ;;  %v430_v26 = vrot.slane %v347_v1, 7  ;;  %v4642_v59 = vpack.c.bf16 %v1197_v30, %v1195_v6  ;;  %v5102_v43 = vld [vmem:[#allocation4_spill] sm:$0xff]  ;;  %v5105_v44 = vld [vmem:[#allocation5_spill] sm:$0xff]  ;;  %v5106_v30 = vld [vmem:[#allocation6_spill] sm:$0xff] }
  0x73   : > { %v4647_v27 = vpack.c.bf16 %v1202_v12, %v1200_v11  ;;  %v2320_v58 = vsel %vm745_vm0, %v4324_v51, 0  ;;  %v4701_v51 = vpack.c.bf16 %v4460_v52, %v4452_v19  ;;  %v1504_v19 = vsel %vm745_vm0, %v4577_v21, 0  ;;  %v3908_v52 = vld [vmem:[%s5048_s2 + $0x8] sm:$0x3]  ;;  %v5108_v1 = vld [vmem:[#allocation8_spill] sm:$0xff]  ;;  %v5109_v10 = vld [vmem:[#allocation9_spill] sm:$0xff] }
  0x74   : > { %3366 = vmatmul.mubr.msk.bf16.gmra.mrb[4].mxu1 %vm696_vm3, %v4609_v13  ;;  %v498_v0 = vsel %vm381_vm1, 0.0, %v429_v36  ;;  %v431_v41 = vsel %vm381_vm1, %v429_v36, %v430_v26  ;;  %v515_v46 = vsel %vm381_vm1, %v430_v26, 0.0  ;;  %v2518_v6 = vsel %vm745_vm0, %v3151_v17, 0  ;;  %v5110_v62 = vld [vmem:[#allocation10_spill] sm:$0xff]  ;;  %v5111_v11 = vld [vmem:[#allocation11_spill] sm:$0xff]  ;;  %v5112_v12 = vld [vmem:[#allocation12_spill] sm:$0xff] }
  0x75   : > { %3369 = vmatprep.mubr.msk.bf16.mxu1 %vm696_vm3, %v4532_v33  ;;  %v1910_v50 = vrot.slane %v498_v0, 2  ;;  %v1911_v47 = vrot.slane %v431_v41, 2  ;;  %v1913_v37 = vrot.slane %v515_v46, 2  ;;  %v1701_v39 = vrot.slane %v498_v0, 1  ;;  %v5113_v36 = vld [vmem:[#allocation14_spill] sm:$0xff]  ;;  %v5114_v26 = vld [vmem:[#allocation17_spill] sm:$0xff] }
  0x76   : > { %v1702_v63 = vrot.slane %v431_v41, 1  ;;  %v1704_v60 = vrot.slane %v515_v46, 1  ;;  %v1497_v21 = vpack.c.bf16 %v431_v41, %v498_v0  ;;  %v5115_v0 = vld [vmem:[#allocation2_spill] sm:$0xff] }
  0x77   : > { %v1912_v15 = vsel %vm1122_vm4, %v1910_v50, %v1911_v47  ;;  %v1914_v55 = vsel %vm1122_vm4, %v1911_v47, %v1913_v37  ;;  %v5116_v41 = vld [vmem:[#allocation18_spill] sm:$0xff] }
  0x78   : > { %3522 = vmatmul.mubr.msk.bf16.gmra.mrb[24].mxu0 %vm696_vm3, %v4642_v59  ;;  %v4659_v34 = vpack.c.bf16 %v1914_v55, %v1912_v15  ;;  %v1703_v61 = vsel %vm565_vm2, %v1701_v39, %v1702_v63  ;;  %v1705_v20 = vsel %vm565_vm2, %v1702_v63, %v1704_v60 }
  0x79   : > { %3525 = vmatprep.mubr.msk.bf16.mxu0 %vm696_vm3, %v4647_v27  ;;  %v4669_v9 = vpack.c.bf16 %v1705_v20, %v1703_v61 }
  0x7c   : > { %3370 = vmatmul.mubr.msk.bf16.gmra.mrb[8].mxu1 %vm696_vm3, %v4538_v56 }
  0x7d   : > { %3373 = vmatprep.mubr.msk.bf16.mxu1 %vm696_vm3, %v4562_v28 }
  0x80   : > { %3526 = vmatmul.mubr.msk.bf16.gmra.mrb[28].mxu0 %vm696_vm3, %v4659_v34 }
  0x81   : > { %3531 = vmatprep.mubr.msk.bf16.mxu0 %vm696_vm3, %v4553_v38 }
  0x84   : > { %3374 = vmatmul.mubr.msk.bf16.gmra.mrb[12].mxu1 %vm696_vm3, %v4566_v8 }
  0x85   : > { %3377 = vmatprep.mubr.msk.bf16.mxu1 %vm696_vm3, %v4591_v22 }
  0x88   : > { %3532 = vmatmul.mubr.msk.bf16.vlgmr.msra.gmra.mrb[0].mxu0 %vm696_vm3, %v4609_v13 }
  0x89   : > { %3564 = vmatpush3.bf16.msra.mxu0 %v2320_v58  ;;  %3535 = vmatprep.mubr.msk.bf16.mxu0 %vm696_vm3, %v4532_v33 }
  0x8a   : > { %3898 = vmatprep.subr.msk.bf16.mxu0 %vm745_vm0, %v3151_v17 }
  0x8c   : > { %3378 = vmatmul.mubr.msk.bf16.gmra.mrb[16].mxu1 %vm696_vm3, %v4595_v40 }
  0x8d   : > { %3381 = vmatprep.mubr.msk.bf16.mxu1 %vm696_vm3, %v4603_v23 }
  0x90   : > { %3536 = vmatmul.mubr.msk.bf16.gmra.mrb[4].mxu0 %vm696_vm3, %v4538_v56 }
  0x91   : > { %3539 = vmatprep.mubr.msk.bf16.mxu0 %vm696_vm3, %v4562_v28 }
  0x94   : > { %3382 = vmatmul.mubr.msk.bf16.gmra.mrb[20].mxu1 %vm696_vm3, %v4614_v5 }
  0x95   : > { %3385 = vmatprep.mubr.msk.bf16.mxu1 %vm696_vm3, %v4618_v57 }
  0x98   : > { %3540 = vmatmul.mubr.msk.bf16.gmra.mrb[8].mxu0 %vm696_vm3, %v4566_v8 }
  0x99   : > { %3543 = vmatprep.mubr.msk.bf16.mxu0 %vm696_vm3, %v4591_v22 }
  0x9c   : > { %3386 = vmatmul.mubr.msk.bf16.gmra.mrb[24].mxu1 %vm696_vm3, %v4625_v25 }
  0x9d   : > { %3389 = vmatprep.mubr.msk.bf16.mxu1 %vm696_vm3, %v4701_v51 }
  0xa0   : > { %3544 = vmatmul.mubr.msk.bf16.gmra.mrb[12].mxu0 %vm696_vm3, %v4595_v40 }
  0xa1   : > { %3547 = vmatprep.mubr.msk.bf16.mxu0 %vm696_vm3, %v4603_v23 }
  0xa4   : > { %3390 = vmatmul.mubr.msk.bf16.gmra.mrb[28].mxu1 %vm696_vm3, %v4629_v14 }
  0xa5   : > { %3395 = vmatprep.mubr.msk.bf16.mxu1 %vm696_vm3, %v4638_v7 }
  0xa8   : > { %3548 = vmatmul.mubr.msk.bf16.gmra.mrb[16].mxu0 %vm696_vm3, %v4614_v5 }
  0xa9   : > { %3551 = vmatprep.mubr.msk.bf16.mxu0 %vm696_vm3, %v4618_v57 }
  0xac   : > { %3396 = vmatmul.mubr.msk.bf16.vlgmr.msra.gmra.mrb[0].mxu1 %vm696_vm3, %v4268_v18  ;;  %v5099_v18 = vld [vmem:[#allocation13_spill] sm:$0xff] }
  0xad   : > { %3428 = vmatpush3.bf16.msra.mxu1 %v1504_v19  ;;  %3399 = vmatprep.mubr.msk.bf16.mxu1 %vm696_vm3, %v4270_v24 }
  0xae   : > { %3894 = vmatprep.subr.msk.bf16.mxu1 %vm745_vm0, %v3908_v52 }
  0xb0   : > { %3552 = vmatmul.mubr.msk.bf16.gmra.mrb[20].mxu0 %vm696_vm3, %v4625_v25 }
  0xb1   : > { %3555 = vmatprep.mubr.msk.bf16.mxu0 %vm696_vm3, %v4701_v51 }
  0xb4   : > { %3400 = vmatmul.mubr.msk.bf16.gmra.mrb[4].mxu1 %vm696_vm3, %v4333_v32 }
  0xb5   : > { %3403 = vmatprep.mubr.msk.bf16.mxu1 %vm696_vm3, %v5099_v18 }
  0xb8   : > { %3556 = vmatmul.mubr.msk.bf16.gmra.mrb[24].mxu0 %vm696_vm3, %v4629_v14 }
  0xb9   : > { %3559 = vmatprep.mubr.msk.bf16.mxu0 %vm696_vm3, %v1497_v21 }
  0xbc   : > { %3404 = vmatmul.mubr.msk.bf16.gmra.mrb[8].mxu1 %vm696_vm3, %v5100_v49 }
  0xbd   : > { %3407 = vmatprep.mubr.msk.bf16.mxu1 %vm696_vm3, %v5101_v29 }
  0xc0   : > { %3560 = vmatmul.mubr.msk.bf16.gmra.mrb[28].mxu0 %vm696_vm3, %v4487_v54  ;;  %v5107_v54 = vld [vmem:[#allocation7_spill] sm:$0xff] }
  0xc1   : > { %3565 = vmatprep.mubr.msk.bf16.mxu0 %vm696_vm3, %v5102_v43 }
  0xc4   : > { %3408 = vmatmul.mubr.msk.bf16.gmra.mrb[12].mxu1 %vm696_vm3, %v5103_v16 }
  0xc5   : > { %3411 = vmatprep.mubr.msk.bf16.mxu1 %vm696_vm3, %v5104_v53 }
  0xc8   : > { %3566 = vmatmul.mubr.msk.bf16.vlgmr.msra.gmra.mrb[0].mxu0 %vm696_vm3, %v5105_v44 }
  0xc9   : > { %3598 = vmatpush3.bf16.msra.mxu0 %v2518_v6  ;;  %3569 = vmatprep.mubr.msk.bf16.mxu0 %vm696_vm3, %v5106_v30 }
  0xcc   : > { %3412 = vmatmul.mubr.msk.bf16.gmra.mrb[16].mxu1 %vm696_vm3, %v4513_v48 }
  0xcd   : > { %3415 = vmatprep.mubr.msk.bf16.mxu1 %vm696_vm3, %v4526_v42 }
  0xd0   : > { %3570 = vmatmul.mubr.msk.bf16.gmra.mrb[4].mxu0 %vm696_vm3, %v5107_v54 }
  0xd1   : > { %3573 = vmatprep.mubr.msk.bf16.mxu0 %vm696_vm3, %v5108_v1 }
  0xd4   : > { %3416 = vmatmul.mubr.msk.bf16.gmra.mrb[20].mxu1 %vm696_vm3, %v4543_v31 }
  0xd5   : > { %3419 = vmatprep.mubr.msk.bf16.mxu1 %vm696_vm3, %v4570_v4 }
  0xd8   : > { %3574 = vmatmul.mubr.msk.bf16.gmra.mrb[8].mxu0 %vm696_vm3, %v5109_v10 }
  0xd9   : > { %3577 = vmatprep.mubr.msk.bf16.mxu0 %vm696_vm3, %v5110_v62 }
  0xdc   : > { %3420 = vmatmul.mubr.msk.bf16.gmra.mrb[24].mxu1 %vm696_vm3, %v4581_v45 }
  0xdd   : > { %3423 = vmatprep.mubr.msk.bf16.mxu1 %vm696_vm3, %v4642_v59 }
  0xe0   : > { %3578 = vmatmul.mubr.msk.bf16.gmra.mrb[12].mxu0 %vm696_vm3, %v5111_v11 }
  0xe1   : > { %3581 = vmatprep.mubr.msk.bf16.mxu0 %vm696_vm3, %v5112_v12 }
  0xe4   : > { %3424 = vmatmul.mubr.msk.bf16.gmra.mrb[28].mxu1 %vm696_vm3, %v4647_v27 }
  0xe5   : > { %3429 = vmatprep.mubr.msk.bf16.mxu1 %vm696_vm3, %v4507_v2  ;;  %v5117_v2 = vld [vmem:[#allocation3_spill] sm:$0xff] }
  0xe8   : > { %3582 = vmatmul.mubr.msk.bf16.gmra.mrb[16].mxu0 %vm696_vm3, %v5113_v36 }
  0xe9   : > { %3585 = vmatprep.mubr.msk.bf16.mxu0 %vm696_vm3, %v5114_v26 }
  0xec   : > { %3430 = vmatmul.mubr.msk.bf16.vlgmr.msra.gmra.mrb[0].mxu1 %vm696_vm3, %v4553_v38 }
  0xed   : > { %3632 = vmatpush3.bf16.msra.mxu1 %v5115_v0  ;;  %3433 = vmatprep.mubr.msk.bf16.mxu1 %vm696_vm3, %v4609_v13 }
  0xf0   : > { %3586 = vmatmul.mubr.msk.bf16.gmra.mrb[20].mxu0 %vm696_vm3, %v5116_v41 }
  0xf1   : > { %3589 = vmatprep.mubr.msk.bf16.mxu0 %vm696_vm3, %v4493_v35 }
  0xf4   : > { %3434 = vmatmul.mubr.msk.bf16.gmra.mrb[4].mxu1 %vm696_vm3, %v4532_v33 }
  0xf5   : > { %3437 = vmatprep.mubr.msk.bf16.mxu1 %vm696_vm3, %v4538_v56 }
  0xf8   : > { %3590 = vmatmul.mubr.msk.bf16.gmra.mrb[24].mxu0 %vm696_vm3, %v4498_v3 }
  0xf9   : > { %3593 = vmatprep.mubr.msk.bf16.mxu0 %vm696_vm3, %v4669_v9 }
  0xfc   : > { %3438 = vmatmul.mubr.msk.bf16.gmra.mrb[8].mxu1 %vm696_vm3, %v4562_v28 }
  0xfd   : > { %3441 = vmatprep.mubr.msk.bf16.mxu1 %vm696_vm3, %v4566_v8 }
 0x100   : > { %3594 = vmatmul.mubr.msk.bf16.gmra.mrb[28].mxu0 %vm696_vm3, %v5117_v2 }
 0x101   : > { %3599 = vmatprep.mubr.msk.bf16.mxu0 %vm696_vm3, %v4270_v24 }
 0x104   : > { %3442 = vmatmul.mubr.msk.bf16.gmra.mrb[12].mxu1 %vm696_vm3, %v4591_v22 }
 0x105   : > { %3445 = vmatprep.mubr.msk.bf16.mxu1 %vm696_vm3, %v4595_v40 }
 0x108   : > { %3600 = vmatmul.mubr.msk.bf16.vlgmr.msra.gmra.mrb[0].mxu0 %vm696_vm3, %v4333_v32 }
 0x109   : > { %3603 = vmatprep.mubr.msk.bf16.mxu0 %vm696_vm3, %v5099_v18 }
 0x10c   : > { %3446 = vmatmul.mubr.msk.bf16.gmra.mrb[16].mxu1 %vm696_vm3, %v4603_v23 }
 0x10d   : > { %3449 = vmatprep.mubr.msk.bf16.mxu1 %vm696_vm3, %v4614_v5 }
 0x110   : > { %3604 = vmatmul.mubr.msk.bf16.gmra.mrb[4].mxu0 %vm696_vm3, %v5100_v49 }
 0x111   : > { %3607 = vmatprep.mubr.msk.bf16.mxu0 %vm696_vm3, %v5101_v29 }
 0x114   : > { %3450 = vmatmul.mubr.msk.bf16.gmra.mrb[20].mxu1 %vm696_vm3, %v4618_v57 }
 0x115   : > { %3453 = vmatprep.mubr.msk.bf16.mxu1 %vm696_vm3, %v4625_v25 }
 0x118   : > { %3608 = vmatmul.mubr.msk.bf16.gmra.mrb[8].mxu0 %vm696_vm3, %v5103_v16 }
 0x119   : > { %3611 = vmatprep.mubr.msk.bf16.mxu0 %vm696_vm3, %v5104_v53 }
 0x11c   : > { %3454 = vmatmul.mubr.msk.bf16.gmra.mrb[24].mxu1 %vm696_vm3, %v4701_v51 }
 0x11d   : > { %3457 = vmatprep.mubr.msk.bf16.mxu1 %vm696_vm3, %v4629_v14 }
 0x120   : > { %3612 = vmatmul.mubr.msk.bf16.gmra.mrb[12].mxu0 %vm696_vm3, %v4513_v48 }
 0x121   : > { %3615 = vmatprep.mubr.msk.bf16.mxu0 %vm696_vm3, %v4526_v42 }
 0x124   : > { %3458 = vmatmul.mubr.msk.bf16.gmra.mrb[28].mxu1 %vm696_vm3, %v1497_v21 }
 0x125   : > { %3479 = vmatprep.mubr.msk.bf16.mxu1 %vm696_vm3, %v5111_v11 }
 0x128   : > { %3616 = vmatmul.mubr.msk.bf16.gmra.mrb[16].mxu0 %vm696_vm3, %v4543_v31 }
 0x129   : > { %3619 = vmatprep.mubr.msk.bf16.mxu0 %vm696_vm3, %v4570_v4 }
 0x12c   : > { %3480 = vmatmul.mubr.msk.bf16.vlgmr.msra.gmra.mrb[16].mxu1 %vm696_vm3, %v5112_v12 }
 0x12d   : > { %3483 = vmatprep.mubr.msk.bf16.mxu1 %vm696_vm3, %v5113_v36 }
 0x130   : > { %3620 = vmatmul.mubr.msk.bf16.gmra.mrb[20].mxu0 %vm696_vm3, %v4581_v45 }
 0x131   : > { %3623 = vmatprep.mubr.msk.bf16.mxu0 %vm696_vm3, %v4642_v59 }
 0x134   : > { %3484 = vmatmul.mubr.msk.bf16.gmra.mrb[20].mxu1 %vm696_vm3, %v5114_v26 }
 0x135   : > { %3487 = vmatprep.mubr.msk.bf16.mxu1 %vm696_vm3, %v5116_v41 }
 0x138   : > { %3624 = vmatmul.mubr.msk.bf16.gmra.mrb[24].mxu0 %vm696_vm3, %v4647_v27 }
 0x139   : > { %3627 = vmatprep.mubr.msk.bf16.mxu0 %vm696_vm3, %v4659_v34 }
 0x13c   : > { %3488 = vmatmul.mubr.msk.bf16.gmra.mrb[24].mxu1 %vm696_vm3, %v4493_v35 }
 0x13d   : > { %3491 = vmatprep.mubr.msk.bf16.mxu1 %vm696_vm3, %v4498_v3 }
 0x140   : > { %3628 = vmatmul.mubr.msk.bf16.gmra.mrb[28].mxu0 %vm696_vm3, %v4638_v7 }
 0x144   : > { %3492 = vmatmul.mubr.msk.bf16.gmra.mrb[28].mxu1 %vm696_vm3, %v4669_v9 }
 0x1bf   : > { %v3431_v24 = vpop.f32.mrb[0].mxu1 }
 0x1c0   : > { %v1540_v32 = vpop.f32.mrb[1].mxu1 }
 0x1c1   : > { %v3432_v48 = vpop.f32.mrb[2].mxu1 }
 0x1c2   : > { %v1543_v42 = vpop.f32.mrb[3].mxu1 }
 0x1c7   : > { %v3435_v33 = vpop.f32.mrb[4].mxu1 }
 0x1c8   : > { %v1556_v56 = vpop.f32.mrb[5].mxu1 }
 0x1c9   : > { %v3436_v31 = vpop.f32.mrb[6].mxu1 }
 0x1ca   : > { %v1559_v38 = vpop.f32.mrb[7].mxu1 }
 0x1cf   : > { %v4879_v28 = vpop.f32.mrb[8].mxu1 }
 0x1d0   : > { %v4881_v35 = vpop.f32.mrb[9].mxu1 }
 0x1d1   : > { %v4883_v3 = vpop.f32.mrb[10].mxu1 }
 0x1d2   : > { %v4885_v8 = vpop.f32.mrb[11].mxu1 }
 0x1d7   : > { %v4887_v4 = vpop.f32.mrb[12].mxu1 }
 0x1d8   : > { %v4889_v45 = vpop.f32.mrb[13].mxu1 }
 0x1d9   : > { %v4891_v22 = vpop.f32.mrb[14].mxu1 }
 0x1da   : > { %v4893_v40 = vpop.f32.mrb[15].mxu1 }
 0x1db   : > { %v3601_v23 = vpop.f32.mrb[0].mxu0 }
 0x1dc   : > { %v3633_v13 = vadd.f32 %v3601_v23, %v3431_v24  ;;  %v2554_v5 = vpop.f32.mrb[1].mxu0 }
 0x1dd   : > { %v3634_v57 = vadd.f32 %v2554_v5, %v1540_v32  ;;  %v3602_v25 = vpop.f32.mrb[2].mxu0 }
 0x1de   : > { %2715 = vst.msk [vmem:[%s4900_s23 + $0x10] sm:$0xff] %vm696_vm3, %v3633_v13  ;;  %v3635_v14 = vadd.f32 %v3602_v25, %v3432_v48  ;;  %v2557_v7 = vpop.f32.mrb[3].mxu0  ;;  %v2816_v46 = vmul.f32 %v3633_v13, %v3633_v13  ;;  %v2748_v34 = vsel %vm696_vm3, %v3633_v13, 0.0 }
 0x1df   : > { %2713 = vst.msk [vmem:[%s4900_s23] sm:$0xff] %vm696_vm3, %v3634_v57  ;;  %v2814_v59 = vmul.f32 %v3634_v57, %v3634_v57  ;;  %v3636_v27 = vadd.f32 %v2557_v7, %v1543_v42  ;;  %v2745_v50 = vsel %vm696_vm3, %v3634_v57, 0.0 }
 0x1e0   : > { %2716 = vst.msk [vmem:[%s4900_s23 + $0x18] sm:$0xff] %vm696_vm3, %v3635_v14  ;;  %v2817_v15 = vmul.f32 %v3635_v14, %v3635_v14  ;;  %v2849_v17 = vsel %vm696_vm3, %v2816_v46, 0.0  ;;  %v2750_v51 = vsel %vm696_vm3, %v3635_v14, 0.0 }
 0x1e1   : > { %2714 = vst.msk [vmem:[%s4900_s23 + $0x8] sm:$0xff] %vm696_vm3, %v3636_v27  ;;  %v2746_v47 = vsel %vm696_vm3, %v3636_v27, 0.0  ;;  %v2815_v37 = vmul.f32 %v3636_v27, %v3636_v27  ;;  %v2846_v39 = vsel %vm696_vm3, %v2814_v59, 0.0 }
 0x1e2   : > { %v2747_v55 = vadd.f32 %v2746_v47, %v2745_v50  ;;  %v2851_v18 = vsel %vm696_vm3, %v2817_v15, 0.0 }
 0x1e3   : > { %v2847_v63 = vsel %vm696_vm3, %v2815_v37, 0.0  ;;  %v3605_v60 = vpop.f32.mrb[4].mxu0 }
 0x1e4   : > { %v2749_v61 = vadd.f32 %v2748_v34, %v2747_v55  ;;  %v2848_v20 = vadd.f32 %v2847_v63, %v2846_v39  ;;  %v3637_v9 = vadd.f32 %v3605_v60, %v3435_v33  ;;  %v2570_v58 = vpop.f32.mrb[5].mxu0 }
 0x1e5   : > { %v3638_v19 = vadd.f32 %v2570_v58, %v1556_v56  ;;  %v3606_v52 = vpop.f32.mrb[6].mxu0 }
 0x1e6   : > { %v2850_v21 = vadd.f32 %v2849_v17, %v2848_v20  ;;  %2719 = vst.msk [vmem:[%s4900_s23 + $0x30] sm:$0xff] %vm696_vm3, %v3637_v9  ;;  %v2751_v49 = vadd.f32 %v2750_v51, %v2749_v61  ;;  %v2573_v29 = vpop.f32.mrb[7].mxu0  ;;  %v3639_v53 = vadd.f32 %v3606_v52, %v3436_v31  ;;  %v2820_v10 = vmul.f32 %v3637_v9, %v3637_v9 }
 0x1e7   : > { %2717 = vst.msk [vmem:[%s4900_s23 + $0x20] sm:$0xff] %vm696_vm3, %v3638_v19  ;;  %v2752_v43 = vsel %vm696_vm3, %v3638_v19, 0.0  ;;  %v2818_v16 = vmul.f32 %v3638_v19, %v3638_v19  ;;  %v3640_v6 = vadd.f32 %v2573_v29, %v1559_v38  ;;  %v2756_v36 = vsel %vm696_vm3, %v3637_v9, 0.0 }
 0x1e8   : > { %v2753_v44 = vadd.f32 %v2752_v43, %v2751_v49  ;;  %v2852_v30 = vadd.f32 %v2851_v18, %v2850_v21  ;;  %2720 = vst.msk [vmem:[%s4900_s23 + $0x38] sm:$0xff] %vm696_vm3, %v3639_v53  ;;  %v2821_v0 = vmul.f32 %v3639_v53, %v3639_v53  ;;  %v2758_v48 = vsel %vm696_vm3, %v3639_v53, 0.0 }
 0x1e9   : > { %v2853_v54 = vsel %vm696_vm3, %v2818_v16, 0.0  ;;  %2718 = vst.msk [vmem:[%s4900_s23 + $0x28] sm:$0xff] %vm696_vm3, %v3640_v6  ;;  %v2754_v1 = vsel %vm696_vm3, %v3640_v6, 0.0  ;;  %v2819_v12 = vmul.f32 %v3640_v6, %v3640_v6  ;;  %v2857_v31 = vsel %vm696_vm3, %v2820_v10, 0.0 }
 0x1ea   : > { %v2854_v62 = vadd.f32 %v2853_v54, %v2852_v30  ;;  %v2755_v11 = vadd.f32 %v2754_v1, %v2753_v44 }
 0x1eb   : > { %v3609_v26 = vpop.f32.mrb[8].mxu0  ;;  %v2855_v2 = vsel %vm696_vm3, %v2819_v12, 0.0 }
 0x1ec   : > { %v2757_v41 = vadd.f32 %v2756_v36, %v2755_v11  ;;  %v3641_v24 = vadd.f32 %v3609_v26, %v4879_v28  ;;  %v2586_v32 = vpop.f32.mrb[9].mxu0  ;;  %v2856_v42 = vadd.f32 %v2855_v2, %v2854_v62 }
 0x1ed   : > { %v3642_v33 = vadd.f32 %v2586_v32, %v4881_v35  ;;  %v3610_v56 = vpop.f32.mrb[10].mxu0  ;;  %v2859_v35 = vsel %vm696_vm3, %v2821_v0, 0.0 }
 0x1ee   : > { %2723 = vst.msk [vmem:[%s4900_s23 + $0x50] sm:$0xff] %vm696_vm3, %v3641_v24  ;;  %v2759_v38 = vadd.f32 %v2758_v48, %v2757_v41  ;;  %v3643_v23 = vadd.f32 %v3610_v56, %v4883_v3  ;;  %v2589_v13 = vpop.f32.mrb[11].mxu0  ;;  %v2858_v5 = vadd.f32 %v2857_v31, %v2856_v42  ;;  %v2824_v46 = vmul.f32 %v3641_v24, %v3641_v24 }
 0x1ef   : > { %2721 = vst.msk [vmem:[%s4900_s23 + $0x40] sm:$0xff] %vm696_vm3, %v3642_v33  ;;  %v2760_v28 = vsel %vm696_vm3, %v3642_v33, 0.0  ;;  %v2822_v57 = vmul.f32 %v3642_v33, %v3642_v33  ;;  %v3644_v25 = vadd.f32 %v2589_v13, %v4885_v8  ;;  %v2764_v47 = vsel %vm696_vm3, %v3641_v24, 0.0 }
 0x1f0   : > { %v2761_v14 = vadd.f32 %v2760_v28, %v2759_v38  ;;  %2724 = vst.msk [vmem:[%s4900_s23 + $0x58] sm:$0xff] %vm696_vm3, %v3643_v23  ;;  %v2860_v7 = vadd.f32 %v2859_v35, %v2858_v5  ;;  %v2825_v55 = vmul.f32 %v3643_v23, %v3643_v23  ;;  %v2766_v60 = vsel %vm696_vm3, %v3643_v23, 0.0 }
 0x1f1   : > { %v2861_v59 = vsel %vm696_vm3, %v2822_v57, 0.0  ;;  %2722 = vst.msk [vmem:[%s4900_s23 + $0x48] sm:$0xff] %vm696_vm3, %v3644_v25  ;;  %v2762_v3 = vsel %vm696_vm3, %v3644_v25, 0.0  ;;  %v2823_v27 = vmul.f32 %v3644_v25, %v3644_v25  ;;  %v2865_v58 = vsel %vm696_vm3, %v2824_v46, 0.0 }
 0x1f2   : > { %v2763_v50 = vadd.f32 %v2762_v3, %v2761_v14  ;;  %v2862_v37 = vadd.f32 %v2861_v59, %v2860_v7 }
 0x1f3   : > { %v2863_v8 = vsel %vm696_vm3, %v2823_v27, 0.0  ;;  %v3613_v15 = vpop.f32.mrb[12].mxu0 }
 0x1f4   : > { %v2765_v34 = vadd.f32 %v2764_v47, %v2763_v50  ;;  %v3645_v39 = vadd.f32 %v3613_v15, %v4887_v4  ;;  %v2602_v63 = vpop.f32.mrb[13].mxu0  ;;  %v2864_v61 = vadd.f32 %v2863_v8, %v2862_v37 }
 0x1f5   : > { %v3646_v20 = vadd.f32 %v2602_v63, %v4889_v45  ;;  %v3614_v9 = vpop.f32.mrb[14].mxu0  ;;  %v2867_v45 = vsel %vm696_vm3, %v2825_v55, 0.0 }
 0x1f6   : > { %2727 = vst.msk [vmem:[%s4900_s23 + $0x70] sm:$0xff] %vm696_vm3, %v3645_v39  ;;  %v2767_v17 = vadd.f32 %v2766_v60, %v2765_v34  ;;  %v3647_v51 = vadd.f32 %v3614_v9, %v4891_v22  ;;  %v2605_v19 = vpop.f32.mrb[15].mxu0  ;;  %v2866_v52 = vadd.f32 %v2865_v58, %v2864_v61  ;;  %v2828_v53 = vmul.f32 %v3645_v39, %v3645_v39 }
 0x1f7   : > { %2725 = vst.msk [vmem:[%s4900_s23 + $0x60] sm:$0xff] %vm696_vm3, %v3646_v20  ;;  %v2768_v4 = vsel %vm696_vm3, %v3646_v20, 0.0  ;;  %v2826_v18 = vmul.f32 %v3646_v20, %v3646_v20  ;;  %v3648_v21 = vadd.f32 %v2605_v19, %v4893_v40  ;;  %v2772_v44 = vsel %vm696_vm3, %v3645_v39, 0.0 }
 0x1f8   : > { %v2769_v49 = vadd.f32 %v2768_v4, %v2767_v17  ;;  %2728 = vst.msk [vmem:[%s4900_s23 + $0x78] sm:$0xff] %vm696_vm3, %v3647_v51  ;;  %v2868_v29 = vadd.f32 %v2867_v45, %v2866_v52  ;;  %v2829_v1 = vmul.f32 %v3647_v51, %v3647_v51  ;;  %v2774_v11 = vsel %vm696_vm3, %v3647_v51, 0.0 }
 0x1f9   : > { %v2869_v43 = vsel %vm696_vm3, %v2826_v18, 0.0  ;;  %2726 = vst.msk [vmem:[%s4900_s23 + $0x68] sm:$0xff] %vm696_vm3, %v3648_v21  ;;  %v2770_v22 = vsel %vm696_vm3, %v3648_v21, 0.0  ;;  %v2827_v16 = vmul.f32 %v3648_v21, %v3648_v21  ;;  %v2873_v26 = vsel %vm696_vm3, %v2828_v53, 0.0 }
 0x1fa   : > { %v2771_v6 = vadd.f32 %v2770_v22, %v2769_v49  ;;  %v2870_v30 = vadd.f32 %v2869_v43, %v2868_v29  ;;  %v2875_v32 = vsel %vm696_vm3, %v2829_v1, 0.0 }
 0x1fb   : > { %v2871_v40 = vsel %vm696_vm3, %v2827_v16, 0.0  ;;  %v3617_v54 = vpop.f32.mrb[16].mxu0 }
 0x1fc   : > { %v2773_v10 = vadd.f32 %v2772_v44, %v2771_v6  ;;  %v2618_v62 = vpop.f32.mrb[17].mxu0  ;;  %v2872_v12 = vadd.f32 %v2871_v40, %v2870_v30 }
 0x1fd   : > { %v3618_v36 = vpop.f32.mrb[18].mxu0 }
 0x1fe   : > { %v2775_v0 = vadd.f32 %v2774_v11, %v2773_v10  ;;  %v2621_v41 = vpop.f32.mrb[19].mxu0  ;;  %v2874_v2 = vadd.f32 %v2873_v26, %v2872_v12 }
 0x1ff   : > { %v3481_v24 = vpop.f32.mrb[16].mxu1 }
 0x200   : > { %v1815_v48 = vpop.f32.mrb[17].mxu1  ;;  %v3649_v42 = vadd.f32 %v3617_v54, %v3481_v24  ;;  %v2876_v31 = vadd.f32 %v2875_v32, %v2874_v2 }
 0x201   : > { %v3482_v33 = vpop.f32.mrb[18].mxu1  ;;  %v3650_v56 = vadd.f32 %v2618_v62, %v1815_v48 }
 0x202   : > { %2731 = vst.msk [vmem:[%s4900_s23 + $0x90] sm:$0xff] %vm696_vm3, %v3649_v42  ;;  %v1818_v38 = vpop.f32.mrb[19].mxu1  ;;  %v3651_v23 = vadd.f32 %v3618_v36, %v3482_v33  ;;  %v2832_v14 = vmul.f32 %v3649_v42, %v3649_v42  ;;  %v2780_v8 = vsel %vm696_vm3, %v3649_v42, 0.0 }
 0x203   : > { %2729 = vst.msk [vmem:[%s4900_s23 + $0x80] sm:$0xff] %vm696_vm3, %v3650_v56  ;;  %v2776_v13 = vsel %vm696_vm3, %v3650_v56, 0.0  ;;  %v2830_v5 = vmul.f32 %v3650_v56, %v3650_v56  ;;  %v3652_v28 = vadd.f32 %v2621_v41, %v1818_v38  ;;  %v3621_v57 = vpop.f32.mrb[20].mxu0 }
 0x204   : > { %v2777_v25 = vadd.f32 %v2776_v13, %v2775_v0  ;;  %2732 = vst.msk [vmem:[%s4900_s23 + $0x98] sm:$0xff] %vm696_vm3, %v3651_v23  ;;  %v2634_v35 = vpop.f32.mrb[21].mxu0  ;;  %v2833_v50 = vmul.f32 %v3651_v23, %v3651_v23  ;;  %v2881_v61 = vsel %vm696_vm3, %v2832_v14, 0.0  ;;  %v2782_v20 = vsel %vm696_vm3, %v3651_v23, 0.0 }
 0x205   : > { %v2877_v7 = vsel %vm696_vm3, %v2830_v5, 0.0  ;;  %2730 = vst.msk [vmem:[%s4900_s23 + $0x88] sm:$0xff] %vm696_vm3, %v3652_v28  ;;  %v2778_v59 = vsel %vm696_vm3, %v3652_v28, 0.0  ;;  %v2831_v3 = vmul.f32 %v3652_v28, %v3652_v28  ;;  %v3622_v27 = vpop.f32.mrb[22].mxu0 }
 0x206   : > { %v2878_v46 = vadd.f32 %v2877_v7, %v2876_v31  ;;  %v2779_v47 = vadd.f32 %v2778_v59, %v2777_v25  ;;  %v2637_v37 = vpop.f32.mrb[23].mxu0  ;;  %v2883_v17 = vsel %vm696_vm3, %v2833_v50, 0.0 }
 0x207   : > { %v2879_v15 = vsel %vm696_vm3, %v2831_v3, 0.0  ;;  %v3485_v55 = vpop.f32.mrb[20].mxu1 }
 0x208   : > { %v2781_v34 = vadd.f32 %v2780_v8, %v2779_v47  ;;  %v2880_v39 = vadd.f32 %v2879_v15, %v2878_v46  ;;  %v1831_v63 = vpop.f32.mrb[21].mxu1  ;;  %v3653_v60 = vadd.f32 %v3621_v57, %v3485_v55 }
 0x209   : > { %v3486_v9 = vpop.f32.mrb[22].mxu1  ;;  %v3654_v58 = vadd.f32 %v2634_v35, %v1831_v63 }
 0x20a   : > { %v2882_v51 = vadd.f32 %v2881_v61, %v2880_v39  ;;  %2735 = vst.msk [vmem:[%s4900_s23 + $0xb0] sm:$0xff] %vm696_vm3, %v3653_v60  ;;  %v2783_v19 = vadd.f32 %v2782_v20, %v2781_v34  ;;  %v1834_v52 = vpop.f32.mrb[23].mxu1  ;;  %v3655_v21 = vadd.f32 %v3622_v27, %v3486_v9  ;;  %v2836_v44 = vmul.f32 %v3653_v60, %v3653_v60 }
 0x20b   : > { %2733 = vst.msk [vmem:[%s4900_s23 + $0xa0] sm:$0xff] %vm696_vm3, %v3654_v58  ;;  %v2784_v4 = vsel %vm696_vm3, %v3654_v58, 0.0  ;;  %v2834_v18 = vmul.f32 %v3654_v58, %v3654_v58  ;;  %v3656_v45 = vadd.f32 %v2637_v37, %v1834_v52  ;;  %v3625_v49 = vpop.f32.mrb[24].mxu0  ;;  %v2788_v10 = vsel %vm696_vm3, %v3653_v60, 0.0 }
 0x20c   : > { %v2785_v29 = vadd.f32 %v2784_v4, %v2783_v19  ;;  %v2884_v43 = vadd.f32 %v2883_v17, %v2882_v51  ;;  %v2650_v22 = vpop.f32.mrb[25].mxu0  ;;  %2736 = vst.msk [vmem:[%s4900_s23 + $0xb8] sm:$0xff] %vm696_vm3, %v3655_v21  ;;  %v2837_v11 = vmul.f32 %v3655_v21, %v3655_v21  ;;  %v2790_v41 = vsel %vm696_vm3, %v3655_v21, 0.0 }
 0x20d   : > { %v2885_v16 = vsel %vm696_vm3, %v2834_v18, 0.0  ;;  %2734 = vst.msk [vmem:[%s4900_s23 + $0xa8] sm:$0xff] %vm696_vm3, %v3656_v45  ;;  %v2786_v53 = vsel %vm696_vm3, %v3656_v45, 0.0  ;;  %v3626_v6 = vpop.f32.mrb[26].mxu0  ;;  %v2835_v54 = vmul.f32 %v3656_v45, %v3656_v45  ;;  %v2889_v48 = vsel %vm696_vm3, %v2836_v44, 0.0 }
 0x20e   : > { %v2886_v30 = vadd.f32 %v2885_v16, %v2884_v43  ;;  %v2787_v40 = vadd.f32 %v2786_v53, %v2785_v29  ;;  %v2653_v1 = vpop.f32.mrb[27].mxu0  ;;  %v2891_v28 = vsel %vm696_vm3, %v2837_v11, 0.0 }
 0x20f   : > { %v3489_v62 = vpop.f32.mrb[24].mxu1  ;;  %v2887_v36 = vsel %vm696_vm3, %v2835_v54, 0.0 }
 0x210   : > { %v2789_v12 = vadd.f32 %v2788_v10, %v2787_v40  ;;  %v1847_v26 = vpop.f32.mrb[25].mxu1  ;;  %v3657_v0 = vadd.f32 %v3625_v49, %v3489_v62  ;;  %v2888_v2 = vadd.f32 %v2887_v36, %v2886_v30 }
 0x211   : > { %v3490_v24 = vpop.f32.mrb[26].mxu1  ;;  %v3658_v32 = vadd.f32 %v2650_v22, %v1847_v26 }
 0x212   : > { %2739 = vst.msk [vmem:[%s4900_s23 + $0xd0] sm:$0xff] %vm696_vm3, %v3657_v0  ;;  %v2791_v42 = vadd.f32 %v2790_v41, %v2789_v12  ;;  %v1850_v33 = vpop.f32.mrb[27].mxu1  ;;  %v3659_v56 = vadd.f32 %v3626_v6, %v3490_v24  ;;  %v2890_v31 = vadd.f32 %v2889_v48, %v2888_v2  ;;  %v2840_v27 = vmul.f32 %v3657_v0, %v3657_v0 }
 0x213   : > { %2737 = vst.msk [vmem:[%s4900_s23 + $0xc0] sm:$0xff] %vm696_vm3, %v3658_v32  ;;  %v2792_v38 = vsel %vm696_vm3, %v3658_v32, 0.0  ;;  %v2838_v23 = vmul.f32 %v3658_v32, %v3658_v32  ;;  %v3660_v13 = vadd.f32 %v2653_v1, %v1850_v33  ;;  %v3629_v5 = vpop.f32.mrb[28].mxu0  ;;  %v2796_v47 = vsel %vm696_vm3, %v3657_v0, 0.0 }
 0x214   : > { %v2793_v57 = vadd.f32 %v2792_v38, %v2791_v42  ;;  %2740 = vst.msk [vmem:[%s4900_s23 + $0xd8] sm:$0xff] %vm696_vm3, %v3659_v56  ;;  %v2666_v25 = vpop.f32.mrb[29].mxu0  ;;  %v2892_v35 = vadd.f32 %v2891_v28, %v2890_v31  ;;  %v2841_v55 = vmul.f32 %v3659_v56, %v3659_v56  ;;  %v2798_v60 = vsel %vm696_vm3, %v3659_v56, 0.0 }
 0x215   : > { %v2893_v14 = vsel %vm696_vm3, %v2838_v23, 0.0  ;;  %2738 = vst.msk [vmem:[%s4900_s23 + $0xc8] sm:$0xff] %vm696_vm3, %v3660_v13  ;;  %v2794_v7 = vsel %vm696_vm3, %v3660_v13, 0.0  ;;  %v2839_v59 = vmul.f32 %v3660_v13, %v3660_v13  ;;  %v3630_v3 = vpop.f32.mrb[30].mxu0  ;;  %v2897_v58 = vsel %vm696_vm3, %v2840_v27, 0.0 }
 0x216   : > { %v2795_v46 = vadd.f32 %v2794_v7, %v2793_v57  ;;  %v2669_v50 = vpop.f32.mrb[31].mxu0  ;;  %v2894_v37 = vadd.f32 %v2893_v14, %v2892_v35  ;;  %v2899_v45 = vsel %vm696_vm3, %v2841_v55, 0.0 }
 0x217   : > { %v2895_v8 = vsel %vm696_vm3, %v2839_v59, 0.0  ;;  %v3493_v15 = vpop.f32.mrb[28].mxu1 }
 0x218   : > { %v2797_v34 = vadd.f32 %v2796_v47, %v2795_v46  ;;  %v1863_v39 = vpop.f32.mrb[29].mxu1  ;;  %v3661_v63 = vadd.f32 %v3629_v5, %v3493_v15  ;;  %v2896_v61 = vadd.f32 %v2895_v8, %v2894_v37 }
 0x219   : > { %v3494_v20 = vpop.f32.mrb[30].mxu1  ;;  %v3662_v9 = vadd.f32 %v2666_v25, %v1863_v39 }
 0x21a   : > { %2743 = vst.msk [vmem:[%s4900_s23 + $0xf0] sm:$0xff] %vm696_vm3, %v3661_v63  ;;  %v2799_v17 = vadd.f32 %v2798_v60, %v2797_v34  ;;  %v1866_v51 = vpop.f32.mrb[31].mxu1  ;;  %v3663_v19 = vadd.f32 %v3630_v3, %v3494_v20  ;;  %v2898_v52 = vadd.f32 %v2897_v58, %v2896_v61  ;;  %v2844_v53 = vmul.f32 %v3661_v63, %v3661_v63 }
 0x21b   : > { %2741 = vst.msk [vmem:[%s4900_s23 + $0xe0] sm:$0xff] %vm696_vm3, %v3662_v9  ;;  %v2800_v4 = vsel %vm696_vm3, %v3662_v9, 0.0  ;;  %v2842_v18 = vmul.f32 %v3662_v9, %v3662_v9  ;;  %v3664_v21 = vadd.f32 %v2669_v50, %v1866_v51  ;;  %v2804_v44 = vsel %vm696_vm3, %v3661_v63, 0.0 }
 0x21c   : > { %v2801_v49 = vadd.f32 %v2800_v4, %v2799_v17  ;;  %2744 = vst.msk [vmem:[%s4900_s23 + $0xf8] sm:$0xff] %vm696_vm3, %v3663_v19  ;;  %v2900_v29 = vadd.f32 %v2899_v45, %v2898_v52  ;;  %v2845_v54 = vmul.f32 %v3663_v19, %v3663_v19  ;;  %v2806_v10 = vsel %vm696_vm3, %v3663_v19, 0.0 }
 0x21d   : > { %v2901_v43 = vsel %vm696_vm3, %v2842_v18, 0.0  ;;  %2742 = vst.msk [vmem:[%s4900_s23 + $0xe8] sm:$0xff] %vm696_vm3, %v3664_v21  ;;  %v2802_v22 = vsel %vm696_vm3, %v3664_v21, 0.0  ;;  %v2843_v16 = vmul.f32 %v3664_v21, %v3664_v21  ;;  %v2905_v11 = vsel %vm696_vm3, %v2844_v53, 0.0 }
 0x21e   : > { %v2803_v6 = vadd.f32 %v2802_v22, %v2801_v49  ;;  %v2902_v30 = vadd.f32 %v2901_v43, %v2900_v29  ;;  %v2907_v26 = vsel %vm696_vm3, %v2845_v54, 0.0 }
 0x21f   : > { %v2903_v40 = vsel %vm696_vm3, %v2843_v16, 0.0 }
 0x220   : > { %v2805_v1 = vadd.f32 %v2804_v44, %v2803_v6  ;;  %v2904_v62 = vadd.f32 %v2903_v40, %v2902_v30 }
 0x222   : > { %v2807_v12 = vadd.f32 %v2806_v10, %v2805_v1  ;;  %v2906_v36 = vadd.f32 %v2905_v11, %v2904_v62 }
 0x224   : > { %v2808_v0 = vrot.slane %v2807_v12, 4  ;;  %v2908_v41 = vadd.f32 %v2907_v26, %v2906_v36 }
 0x226   : > { %v2809_v2 = vadd.f32 %v2808_v0, %v2807_v12  ;;  %v2909_v24 = vrot.slane %v2908_v41, 4 }
 0x228   : > { %v2810_v32 = vrot.slane %v2809_v2, 2  ;;  %v2910_v48 = vadd.f32 %v2909_v24, %v2908_v41 }
 0x22a   : > { %v2811_v42 = vadd.f32 %v2810_v32, %v2809_v2  ;;  %v2911_v33 = vrot.slane %v2910_v48, 2 }
 0x22c   : > { %v2812_v56 = vrot.slane %v2811_v42, 1  ;;  %v2912_v31 = vadd.f32 %v2911_v33, %v2910_v48 }
 0x22e   : > { %v2913_v38 = vrot.slane %v2912_v31, 1  ;;  %v2813_v23 = vadd.f32 %v2812_v56, %v2811_v42 }
 0x230   : > { %v2914_v13 = vadd.f32 %v2913_v38, %v2912_v31 }
 0x232   : > { %v2915_v5 = vsel %vm381_vm1, %v2813_v23, %v2914_v13 }
 0x233   : > { %2917 = vst.msk [vmem:[%s208_s27] sm:$0x3] %vm2916_vm5, %v2915_v5 }
 0x234 PF: > { %s15_s15 = sadd.s32 1, %s3915_s15  }
 0x235   : > { %p12_p4 = scmp.ge.s32.totalorder %s15_s15, 4  }
 0x237   :  { %14 = sbr.rel (!%p12_p4) target bundleno = 1 (0x1), region = 82 }

</bundles_post_ra>
